<compile_context>
chip_gen: v6e
topology: v6e:2x2x1
jax: 0.10.0
libtpu: 0.0.40
codegen_flags: <defaults>
</compile_context>

<pallas_src>
import functools
import numpy as np
import jax
import jax.numpy as jnp
from jax.experimental import pallas as pl
from jax.experimental.pallas import tpu as pltpu


# ---------------------------------------------------------------------------
# Element-wise helpers: single-EUP-push (tanh) forms, kept in f32.
# ---------------------------------------------------------------------------
def _sigmoid(x):
    return 0.5 * jnp.tanh(0.5 * x) + 0.5


def _swish(x):
    return x * _sigmoid(x)


def _same_pad(size, k, s):
    out = -(-size // s)
    total = max((out - 1) * s + k - size, 0)
    return out, total // 2


def _const_index_map(ndim):
    return lambda b: (0,) * ndim


# ---------------------------------------------------------------------------
# One MBConv block on VMEM-resident values:
#   expand 1x1 (bf16 MXU) -> dw3x3 (VPU, padded VMEM scratch) -> SE
#   -> project 1x1 with the SE gate folded into the weight -> optional skip.
# ---------------------------------------------------------------------------
def _mbconv(x, H, W, refs, dw_scr, skip):
    (ew_ref, eshift_ref, dww_ref, dwshift_ref,
     sew1_ref, seb1_ref, sew2_ref, seb2_ref, pw_ref, pshift_ref) = refs
    HW = H * W

    # expand 1x1 + folded-BN shift + swish (bf16 operands, f32 accumulate)
    y = jnp.dot(x.astype(jnp.bfloat16), ew_ref[...],
                preferred_element_type=jnp.float32) + eshift_ref[0]
    y = _swish(y)                                          # (HW, Cmid) f32
    Cmid = y.shape[-1]

    # depthwise 3x3, stride 1, 'same', via a padded VMEM scratch.
    # Only the 1-px halo is zeroed (per step, for megacore safety); the interior
    # is fully overwritten every step.
    y3 = y.reshape(H, W, Cmid)
    zrow = jnp.zeros((1, W + 2, Cmid), jnp.float32)
    zcol = jnp.zeros((H, 1, Cmid), jnp.float32)
    dw_scr[0:1, :, :] = zrow
    dw_scr[H + 1:H + 2, :, :] = zrow
    dw_scr[1:H + 1, 0:1, :] = zcol
    dw_scr[1:H + 1, W + 1:W + 2, :] = zcol
    dw_scr[1:H + 1, 1:W + 1, :] = y3

    wdw = dww_ref[...].astype(jnp.float32)                 # (9, Cmid)
    acc = jnp.zeros((H, W, Cmid), jnp.float32)
    # TODO(synk): the dx=1,2 windows are sublane-unaligned slices (XLU relayout);
    # for production widths consider a lane-major (H, W*Cmid) layout with pltpu.roll taps.
    for dy in range(3):
        for dx in range(3):
            acc = acc + dw_scr[dy:dy + H, dx:dx + W, :] * wdw[dy * 3 + dx, :]
    acc = _swish(acc + dwshift_ref[0]).reshape(HW, Cmid)

    # squeeze-and-excitation.  Excite FC computed column-oriented:
    # (Cmid, Cse) * (1, Cse) -> lane-reduce -> (Cmid, 1), so the gate folds
    # straight into the projection weights (no full-map VPU multiply).
    se = jnp.mean(acc, axis=0, keepdims=True)              # (1, Cmid) f32
    h = jnp.dot(se, sew1_ref[...],
                preferred_element_type=jnp.float32) + seb1_ref[...]
    h = _swish(h)                                          # (1, Cse)
    s = jnp.sum(sew2_ref[...] * h, axis=1, keepdims=True) + seb2_ref[...]
    s = _sigmoid(s)                                        # (Cmid, 1)

    # project 1x1; SE gate pre-multiplied into the (Cmid, Cout) weight
    pw = (pw_ref[...].astype(jnp.float32) * s).astype(jnp.bfloat16)
    z = jnp.dot(acc.astype(jnp.bfloat16), pw,
                preferred_element_type=jnp.float32) + pshift_ref[0]
    if skip:
        z = z + x
    return z


# ---------------------------------------------------------------------------
# Fully fused forward kernel: stem -> MBConv blocks -> head 1x1 + mean over f.
# ---------------------------------------------------------------------------
def _effinet_fused_kernel(*refs, Ho, Wo, skips):
    nb = len(skips)
    xsd_ref, stem_w_ref, stem_shift_ref = refs[0], refs[1], refs[2]
    blk_refs = [refs[3 + 10 * i: 3 + 10 * (i + 1)] for i in range(nb)]
    head_w_ref = refs[3 + 10 * nb]
    head_shift_ref = refs[4 + 10 * nb]
    o_ref = refs[5 + 10 * nb]
    dw_scrs = refs[6 + 10 * nb:]

    H, W = Ho, Wo
    HW = H * W

    # --- stem: 3x3 stride-2 conv (Cin=1) as 9 shifted VPU MACs (no im2col, no MXU)
    # on the space-to-depth phase tensor, + folded-BN shift + swish.
    x = xsd_ref[0].astype(jnp.float32)                     # (Ho+1, Wo+1, 4)
    wst = stem_w_ref[...].astype(jnp.float32)              # (9, C_STEM)
    Cs = wst.shape[-1]
    acc = jnp.zeros((H, W, Cs), jnp.float32)
    for dy in range(3):
        a, p = divmod(dy, 2)
        for dx in range(3):
            b, q = divmod(dx, 2)
            tap = x[a:a + H, b:b + W, p * 2 + q:p * 2 + q + 1]  # (H, W, 1)
            acc = acc + tap * wst[dy * 3 + dx, :]
    y = _swish(acc + stem_shift_ref[0]).reshape(HW, Cs)

    # --- MBConv blocks (activations never leave VMEM)
    for i, skip in enumerate(skips):
        y = _mbconv(y, H, W, blk_refs[i], dw_scrs[i], skip)

    # --- head 1x1 + swish + reduce 'b c f t -> b t c' (mean over frequency)
    z = jnp.dot(y.astype(jnp.bfloat16), head_w_ref[...],
                preferred_element_type=jnp.float32) + head_shift_ref[0]
    z = _swish(z)                                          # (HW, C_HEAD)
    CH = z.shape[-1]
    o_ref[0] = jnp.mean(z.reshape(H, W, CH), axis=0).astype(o_ref.dtype)


# ---------------------------------------------------------------------------
# Wrapper: space-to-depth glue + one pallas_call over the batch.
# ---------------------------------------------------------------------------
def effinet_forward(x, params):
    """x: (B, F, T) float32 -> (B, T', C_head) float32 in a single pallas_call."""
    B, F, T = x.shape
    Ho, ph = _same_pad(F, 3, 2)
    Wo, pt = _same_pad(T, 3, 2)

    # 'b f t -> b 1 f t' is implicit in the NHWC layout (C=1 on lanes).
    # Space-to-depth phase split (input-sized traffic) so the stride-2 stem conv
    # becomes 9 statically sliced MACs in-kernel.  The trailing pad rows/cols beyond
    # TF-'same' (to 2*Ho+2 / 2*Wo+2) are never read by the 9 taps.
    xp = jnp.pad(x, ((0, 0),
                     (ph, 2 * Ho + 2 - F - ph),
                     (pt, 2 * Wo + 2 - T - pt)))
    xsd = xp.reshape(B, Ho + 1, 2, Wo + 1, 2).transpose(0, 1, 3, 2, 4)
    xsd = xsd.reshape(B, Ho + 1, Wo + 1, 4)

    flat = [params["stem_w"], params["stem_shift"]]
    skips, cmids = [], []
    for p in params["blocks"]:
        flat += [p["expand_w"], p["expand_shift"], p["dw_w"], p["dw_shift"],
                 p["se_w1"], p["se_b1"], p["se_w2"], p["se_b2"],
                 p["proj_w"], p["proj_shift"]]
        skips.append(p["skip"])
        cmids.append(p["expand_w"].shape[-1])
    flat += [params["head_w"], params["head_shift"]]
    CH = params["head_w"].shape[-1]

    kernel = functools.partial(_effinet_fused_kernel, Ho=Ho, Wo=Wo,
                               skips=tuple(skips))
    in_specs = [pl.BlockSpec((1, Ho + 1, Wo + 1, 4), lambda b: (b, 0, 0, 0))]
    in_specs += [pl.BlockSpec(w.shape, _const_index_map(w.ndim)) for w in flat]
    scratch_shapes = [pltpu.VMEM((Ho + 2, Wo + 2, c), jnp.float32) for c in cmids]

    return pl.pallas_call(
        kernel,
        out_shape=jax.ShapeDtypeStruct((B, Wo, CH), x.dtype),
        grid=(B,),
        in_specs=in_specs,
        out_specs=pl.BlockSpec((1, Wo, CH), lambda b: (b, 0, 0)),
        scratch_shapes=scratch_shapes,
        compiler_params=pltpu.CompilerParams(
            dimension_semantics=("parallel",),
            vmem_limit_bytes=48 * 1024 * 1024),   # explicit; <= v7x 64 MiB physical
    )(xsd, *flat)


# ---------------------------------------------------------------------------
# Deterministic parameter construction (synthetic weights).
# Frozen-BN scale is folded into the weight columns; only the shift survives.
# MXU weights (expand / project / head) are stored bf16; VPU weights and all
# shifts/biases stay f32.
# ---------------------------------------------------------------------------
def make_params(key):
    C_STEM, C_HEAD, C_SE = 16, 32, 8
    block_cfg = [
        dict(cin=C_STEM, expand=4, cout=24, skip=False),
        dict(cin=24, expand=4, cout=24, skip=True),
    ]
    keys = iter(jax.random.split(key, 64))

    def w_init(shape, fan_in):
        return jax.random.normal(next(keys), shape, jnp.float32) / np.sqrt(fan_in)

    def bn_fold(w, c):
        scale = 1.0 + 0.1 * jax.random.normal(next(keys), (1, c), jnp.float32)
        shift = 0.1 * jax.random.normal(next(keys), (1, c), jnp.float32)
        return w * scale, shift

    params = {}
    params["stem_w"], params["stem_shift"] = bn_fold(w_init((9, C_STEM), 9.0), C_STEM)

    blocks = []
    for cfg in block_cfg:
        cin, cout = cfg["cin"], cfg["cout"]
        cmid = cin * cfg["expand"]
        p = dict(skip=cfg["skip"])
        ew, es = bn_fold(w_init((cin, cmid), cin), cmid)
        p["expand_w"], p["expand_shift"] = ew.astype(jnp.bfloat16), es
        p["dw_w"], p["dw_shift"] = bn_fold(w_init((9, cmid), 9.0), cmid)
        p["se_w1"] = w_init((cmid, C_SE), cmid)
        p["se_b1"] = 0.1 * jax.random.normal(next(keys), (1, C_SE), jnp.float32)
        # excite weights stored (Cmid, Cse) so the SE gate comes out column-oriented
        # and folds straight into proj_w.
        p["se_w2"] = w_init((cmid, C_SE), C_SE)
        p["se_b2"] = 0.1 * jax.random.normal(next(keys), (cmid, 1), jnp.float32)
        pwv, ps = bn_fold(w_init((cmid, cout), cmid), cout)
        p["proj_w"], p["proj_shift"] = pwv.astype(jnp.bfloat16), ps
        blocks.append(p)
    params["blocks"] = blocks

    hw, hs = bn_fold(w_init((block_cfg[-1]["cout"], C_HEAD),
                            float(block_cfg[-1]["cout"])), C_HEAD)
    params["head_w"], params["head_shift"] = hw.astype(jnp.bfloat16), hs
    return params


if __name__ == "__main__":
    key = jax.random.PRNGKey(0)
    pkey, xkey = jax.random.split(key)
    params = make_params(pkey)

    B, F, T = 2, 16, 16                       # (batch, freq bins, time frames)
    x = jax.random.normal(xkey, (B, F, T), jnp.float32)

    fwd = jax.jit(functools.partial(effinet_forward, params=params))
    out = jax.block_until_ready(fwd(x))

    assert out.shape == (B, T // 2, 32), out.shape      # (b, t', c)
    assert out.dtype == jnp.float32
    assert bool(jnp.all(jnp.isfinite(out)))
    print("KERNEL_OK")
</pallas_src>

<mosaic_0001>
module attributes {stable_mosaic.version = 11 : i64} {
  func.func @_effinet_fused_kernel(%arg0: i32, %arg1: memref<1x9x9x4xf32, #tpu.memory_space<vmem>>, %arg2: memref<9x16xf32, #tpu.memory_space<vmem>>, %arg3: memref<1x16xf32, #tpu.memory_space<vmem>>, %arg4: memref<16x64xbf16, #tpu.memory_space<vmem>>, %arg5: memref<1x64xf32, #tpu.memory_space<vmem>>, %arg6: memref<9x64xf32, #tpu.memory_space<vmem>>, %arg7: memref<1x64xf32, #tpu.memory_space<vmem>>, %arg8: memref<64x8xf32, #tpu.memory_space<vmem>>, %arg9: memref<1x8xf32, #tpu.memory_space<vmem>>, %arg10: memref<64x8xf32, #tpu.memory_space<vmem>>, %arg11: memref<64x1xf32, #tpu.memory_space<vmem>>, %arg12: memref<64x24xbf16, #tpu.memory_space<vmem>>, %arg13: memref<1x24xf32, #tpu.memory_space<vmem>>, %arg14: memref<24x96xbf16, #tpu.memory_space<vmem>>, %arg15: memref<1x96xf32, #tpu.memory_space<vmem>>, %arg16: memref<9x96xf32, #tpu.memory_space<vmem>>, %arg17: memref<1x96xf32, #tpu.memory_space<vmem>>, %arg18: memref<96x8xf32, #tpu.memory_space<vmem>>, %arg19: memref<1x8xf32, #tpu.memory_space<vmem>>, %arg20: memref<96x8xf32, #tpu.memory_space<vmem>>, %arg21: memref<96x1xf32, #tpu.memory_space<vmem>>, %arg22: memref<96x24xbf16, #tpu.memory_space<vmem>>, %arg23: memref<1x24xf32, #tpu.memory_space<vmem>>, %arg24: memref<24x32xbf16, #tpu.memory_space<vmem>>, %arg25: memref<1x32xf32, #tpu.memory_space<vmem>>, %arg26: memref<1x8x32xf32, #tpu.memory_space<vmem>>, %arg27: memref<10x10x64xf32, #tpu.memory_space<vmem>>, %arg28: memref<10x10x96xf32, #tpu.memory_space<vmem>>) attributes {dimension_semantics = [#tpu.dimension_semantics<parallel>], iteration_bounds = array<i64: 2>, scalar_prefetch = 0 : i64, scratch_operands = 2 : i64, tpu.core_type = #tpu.core_type<tc>, window_params = [{transform_indices = @transform_0, window_bounds = array<i64: 1, 9, 9, 4>}, {pipeline_mode = #tpu.pipeline_mode<synchronous>, transform_indices = @transform_1, window_bounds = array<i64: 9, 16>}, {pipeline_mode = #tpu.pipeline_mode<synchronous>, transform_indices = @transform_2, window_bounds = array<i64: 1, 16>}, {pipeline_mode = #tpu.pipeline_mode<synchronous>, transform_indices = @transform_3, window_bounds = array<i64: 16, 64>}, {pipeline_mode = #tpu.pipeline_mode<synchronous>, transform_indices = @transform_4, window_bounds = array<i64: 1, 64>}, {pipeline_mode = #tpu.pipeline_mode<synchronous>, transform_indices = @transform_5, window_bounds = array<i64: 9, 64>}, {pipeline_mode = #tpu.pipeline_mode<synchronous>, transform_indices = @transform_6, window_bounds = array<i64: 1, 64>}, {pipeline_mode = #tpu.pipeline_mode<synchronous>, transform_indices = @transform_7, window_bounds = array<i64: 64, 8>}, {pipeline_mode = #tpu.pipeline_mode<synchronous>, transform_indices = @transform_8, window_bounds = array<i64: 1, 8>}, {pipeline_mode = #tpu.pipeline_mode<synchronous>, transform_indices = @transform_9, window_bounds = array<i64: 64, 8>}, {pipeline_mode = #tpu.pipeline_mode<synchronous>, transform_indices = @transform_10, window_bounds = array<i64: 64, 1>}, {pipeline_mode = #tpu.pipeline_mode<synchronous>, transform_indices = @transform_11, window_bounds = array<i64: 64, 24>}, {pipeline_mode = #tpu.pipeline_mode<synchronous>, transform_indices = @transform_12, window_bounds = array<i64: 1, 24>}, {pipeline_mode = #tpu.pipeline_mode<synchronous>, transform_indices = @transform_13, window_bounds = array<i64: 24, 96>}, {pipeline_mode = #tpu.pipeline_mode<synchronous>, transform_indices = @transform_14, window_bounds = array<i64: 1, 96>}, {pipeline_mode = #tpu.pipeline_mode<synchronous>, transform_indices = @transform_15, window_bounds = array<i64: 9, 96>}, {pipeline_mode = #tpu.pipeline_mode<synchronous>, transform_indices = @transform_16, window_bounds = array<i64: 1, 96>}, {pipeline_mode = #tpu.pipeline_mode<synchronous>, transform_indices = @transform_17, window_bounds = array<i64: 96, 8>}, {pipeline_mode = #tpu.pipeline_mode<synchronous>, transform_indices = @transform_18, window_bounds = array<i64: 1, 8>}, {pipeline_mode = #tpu.pipeline_mode<synchronous>, transform_indices = @transform_19, window_bounds = array<i64: 96, 8>}, {pipeline_mode = #tpu.pipeline_mode<synchronous>, transform_indices = @transform_20, window_bounds = array<i64: 96, 1>}, {pipeline_mode = #tpu.pipeline_mode<synchronous>, transform_indices = @transform_21, window_bounds = array<i64: 96, 24>}, {pipeline_mode = #tpu.pipeline_mode<synchronous>, transform_indices = @transform_22, window_bounds = array<i64: 1, 24>}, {pipeline_mode = #tpu.pipeline_mode<synchronous>, transform_indices = @transform_23, window_bounds = array<i64: 24, 32>}, {pipeline_mode = #tpu.pipeline_mode<synchronous>, transform_indices = @transform_24, window_bounds = array<i64: 1, 32>}, {transform_indices = @transform_25, window_bounds = array<i64: 1, 8, 32>}]} {
    %c0 = arith.constant 0 : index
    %c0_0 = arith.constant 0 : index
    %c0_1 = arith.constant 0 : index
    %c0_2 = arith.constant 0 : index
    %0 = vector.load %arg1[%c0, %c0_0, %c0_1, %c0_2] : memref<1x9x9x4xf32, #tpu.memory_space<vmem>>, vector<1x9x9x4xf32>
    %1 = vector.shape_cast %0 : vector<1x9x9x4xf32> to vector<9x9x4xf32>
    %c0_3 = arith.constant 0 : index
    %c0_4 = arith.constant 0 : index
    %2 = vector.load %arg2[%c0_3, %c0_4] : memref<9x16xf32, #tpu.memory_space<vmem>>, vector<9x16xf32>
    %cst = arith.constant 0.000000e+00 : f32
    %3 = vector.broadcast %cst : f32 to vector<8x8x16xf32>
    %4 = vector.extract_strided_slice %1 {offsets = [0, 0, 0], sizes = [8, 8, 1], strides = [1, 1, 1]} : vector<9x9x4xf32> to vector<8x8x1xf32>
    %5 = vector.extract_strided_slice %2 {offsets = [0, 0], sizes = [1, 16], strides = [1, 1]} : vector<9x16xf32> to vector<1x16xf32>
    %6 = vector.shape_cast %5 : vector<1x16xf32> to vector<16xf32>
    %7 = vector.shape_cast %6 : vector<16xf32> to vector<1x1x16xf32>
    %8 = vector.broadcast %4 : vector<8x8x1xf32> to vector<8x8x16xf32>
    %9 = vector.broadcast %7 : vector<1x1x16xf32> to vector<8x8x16xf32>
    %10 = arith.mulf %8, %9 : vector<8x8x16xf32>
    %11 = arith.addf %3, %10 : vector<8x8x16xf32>
    %12 = vector.extract_strided_slice %1 {offsets = [0, 0, 1], sizes = [8, 8, 1], strides = [1, 1, 1]} : vector<9x9x4xf32> to vector<8x8x1xf32>
    %13 = vector.extract_strided_slice %2 {offsets = [1, 0], sizes = [1, 16], strides = [1, 1]} : vector<9x16xf32> to vector<1x16xf32>
    %14 = vector.shape_cast %13 : vector<1x16xf32> to vector<16xf32>
    %15 = vector.shape_cast %14 : vector<16xf32> to vector<1x1x16xf32>
    %16 = vector.broadcast %12 : vector<8x8x1xf32> to vector<8x8x16xf32>
    %17 = vector.broadcast %15 : vector<1x1x16xf32> to vector<8x8x16xf32>
    %18 = arith.mulf %16, %17 : vector<8x8x16xf32>
    %19 = arith.addf %11, %18 : vector<8x8x16xf32>
    %20 = vector.extract_strided_slice %1 {offsets = [0, 1, 0], sizes = [8, 8, 1], strides = [1, 1, 1]} : vector<9x9x4xf32> to vector<8x8x1xf32>
    %21 = vector.extract_strided_slice %2 {offsets = [2, 0], sizes = [1, 16], strides = [1, 1]} : vector<9x16xf32> to vector<1x16xf32>
    %22 = vector.shape_cast %21 : vector<1x16xf32> to vector<16xf32>
    %23 = vector.shape_cast %22 : vector<16xf32> to vector<1x1x16xf32>
    %24 = vector.broadcast %20 : vector<8x8x1xf32> to vector<8x8x16xf32>
    %25 = vector.broadcast %23 : vector<1x1x16xf32> to vector<8x8x16xf32>
    %26 = arith.mulf %24, %25 : vector<8x8x16xf32>
    %27 = arith.addf %19, %26 : vector<8x8x16xf32>
    %28 = vector.extract_strided_slice %1 {offsets = [0, 0, 2], sizes = [8, 8, 1], strides = [1, 1, 1]} : vector<9x9x4xf32> to vector<8x8x1xf32>
    %29 = vector.extract_strided_slice %2 {offsets = [3, 0], sizes = [1, 16], strides = [1, 1]} : vector<9x16xf32> to vector<1x16xf32>
    %30 = vector.shape_cast %29 : vector<1x16xf32> to vector<16xf32>
    %31 = vector.shape_cast %30 : vector<16xf32> to vector<1x1x16xf32>
    %32 = vector.broadcast %28 : vector<8x8x1xf32> to vector<8x8x16xf32>
    %33 = vector.broadcast %31 : vector<1x1x16xf32> to vector<8x8x16xf32>
    %34 = arith.mulf %32, %33 : vector<8x8x16xf32>
    %35 = arith.addf %27, %34 : vector<8x8x16xf32>
    %36 = vector.extract_strided_slice %1 {offsets = [0, 0, 3], sizes = [8, 8, 1], strides = [1, 1, 1]} : vector<9x9x4xf32> to vector<8x8x1xf32>
    %37 = vector.extract_strided_slice %2 {offsets = [4, 0], sizes = [1, 16], strides = [1, 1]} : vector<9x16xf32> to vector<1x16xf32>
    %38 = vector.shape_cast %37 : vector<1x16xf32> to vector<16xf32>
    %39 = vector.shape_cast %38 : vector<16xf32> to vector<1x1x16xf32>
    %40 = vector.broadcast %36 : vector<8x8x1xf32> to vector<8x8x16xf32>
    %41 = vector.broadcast %39 : vector<1x1x16xf32> to vector<8x8x16xf32>
    %42 = arith.mulf %40, %41 : vector<8x8x16xf32>
    %43 = arith.addf %35, %42 : vector<8x8x16xf32>
    %44 = vector.extract_strided_slice %1 {offsets = [0, 1, 2], sizes = [8, 8, 1], strides = [1, 1, 1]} : vector<9x9x4xf32> to vector<8x8x1xf32>
    %45 = vector.extract_strided_slice %2 {offsets = [5, 0], sizes = [1, 16], strides = [1, 1]} : vector<9x16xf32> to vector<1x16xf32>
    %46 = vector.shape_cast %45 : vector<1x16xf32> to vector<16xf32>
    %47 = vector.shape_cast %46 : vector<16xf32> to vector<1x1x16xf32>
    %48 = vector.broadcast %44 : vector<8x8x1xf32> to vector<8x8x16xf32>
    %49 = vector.broadcast %47 : vector<1x1x16xf32> to vector<8x8x16xf32>
    %50 = arith.mulf %48, %49 : vector<8x8x16xf32>
    %51 = arith.addf %43, %50 : vector<8x8x16xf32>
    %52 = vector.extract_strided_slice %1 {offsets = [1, 0, 0], sizes = [8, 8, 1], strides = [1, 1, 1]} : vector<9x9x4xf32> to vector<8x8x1xf32>
    %53 = vector.extract_strided_slice %2 {offsets = [6, 0], sizes = [1, 16], strides = [1, 1]} : vector<9x16xf32> to vector<1x16xf32>
    %54 = vector.shape_cast %53 : vector<1x16xf32> to vector<16xf32>
    %55 = vector.shape_cast %54 : vector<16xf32> to vector<1x1x16xf32>
    %56 = vector.broadcast %52 : vector<8x8x1xf32> to vector<8x8x16xf32>
    %57 = vector.broadcast %55 : vector<1x1x16xf32> to vector<8x8x16xf32>
    %58 = arith.mulf %56, %57 : vector<8x8x16xf32>
    %59 = arith.addf %51, %58 : vector<8x8x16xf32>
    %60 = vector.extract_strided_slice %1 {offsets = [1, 0, 1], sizes = [8, 8, 1], strides = [1, 1, 1]} : vector<9x9x4xf32> to vector<8x8x1xf32>
    %61 = vector.extract_strided_slice %2 {offsets = [7, 0], sizes = [1, 16], strides = [1, 1]} : vector<9x16xf32> to vector<1x16xf32>
    %62 = vector.shape_cast %61 : vector<1x16xf32> to vector<16xf32>
    %63 = vector.shape_cast %62 : vector<16xf32> to vector<1x1x16xf32>
    %64 = vector.broadcast %60 : vector<8x8x1xf32> to vector<8x8x16xf32>
    %65 = vector.broadcast %63 : vector<1x1x16xf32> to vector<8x8x16xf32>
    %66 = arith.mulf %64, %65 : vector<8x8x16xf32>
    %67 = arith.addf %59, %66 : vector<8x8x16xf32>
    %68 = vector.extract_strided_slice %1 {offsets = [1, 1, 0], sizes = [8, 8, 1], strides = [1, 1, 1]} : vector<9x9x4xf32> to vector<8x8x1xf32>
    %69 = vector.extract_strided_slice %2 {offsets = [8, 0], sizes = [1, 16], strides = [1, 1]} : vector<9x16xf32> to vector<1x16xf32>
    %70 = vector.shape_cast %69 : vector<1x16xf32> to vector<16xf32>
    %71 = vector.shape_cast %70 : vector<16xf32> to vector<1x1x16xf32>
    %72 = vector.broadcast %68 : vector<8x8x1xf32> to vector<8x8x16xf32>
    %73 = vector.broadcast %71 : vector<1x1x16xf32> to vector<8x8x16xf32>
    %74 = arith.mulf %72, %73 : vector<8x8x16xf32>
    %75 = arith.addf %67, %74 : vector<8x8x16xf32>
    %c0_5 = arith.constant 0 : index
    %c0_6 = arith.constant 0 : index
    %76 = vector.load %arg3[%c0_5, %c0_6] : memref<1x16xf32, #tpu.memory_space<vmem>>, vector<1x16xf32>
    %77 = vector.shape_cast %76 : vector<1x16xf32> to vector<16xf32>
    %78 = vector.shape_cast %77 : vector<16xf32> to vector<1x1x16xf32>
    %79 = vector.broadcast %78 : vector<1x1x16xf32> to vector<8x8x16xf32>
    %80 = arith.addf %75, %79 : vector<8x8x16xf32>
    %cst_7 = arith.constant 5.000000e-01 : f32
    %81 = vector.broadcast %cst_7 : f32 to vector<8x8x16xf32>
    %82 = arith.mulf %81, %80 : vector<8x8x16xf32>
    %83 = math.tanh %82 : vector<8x8x16xf32>
    %cst_8 = arith.constant 5.000000e-01 : f32
    %84 = vector.broadcast %cst_8 : f32 to vector<8x8x16xf32>
    %85 = arith.mulf %84, %83 : vector<8x8x16xf32>
    %cst_9 = arith.constant 5.000000e-01 : f32
    %86 = vector.broadcast %cst_9 : f32 to vector<8x8x16xf32>
    %87 = arith.addf %85, %86 : vector<8x8x16xf32>
    %88 = arith.mulf %80, %87 : vector<8x8x16xf32>
    %89 = vector.shape_cast %88 : vector<8x8x16xf32> to vector<64x16xf32>
    %90 = arith.truncf %89 : vector<64x16xf32> to vector<64x16xbf16>
    %c0_10 = arith.constant 0 : index
    %c0_11 = arith.constant 0 : index
    %91 = vector.load %arg4[%c0_10, %c0_11] : memref<16x64xbf16, #tpu.memory_space<vmem>>, vector<16x64xbf16>
    %cst_12 = arith.constant dense<0.000000e+00> : vector<64x64xf32>
    %92 = tpu.matmul %90, %91, %cst_12 {dimension_numbers = #tpu.dot_dimension_numbers<[1], [0], [0], [1], [0, 0, 1, 1], [], []>} : vector<64x16xbf16>, vector<16x64xbf16>, vector<64x64xf32> -> vector<64x64xf32>
    %c0_13 = arith.constant 0 : index
    %c0_14 = arith.constant 0 : index
    %93 = vector.load %arg5[%c0_13, %c0_14] : memref<1x64xf32, #tpu.memory_space<vmem>>, vector<1x64xf32>
    %94 = vector.shape_cast %93 : vector<1x64xf32> to vector<64xf32>
    %95 = vector.shape_cast %94 : vector<64xf32> to vector<1x64xf32>
    %96 = vector.broadcast %95 : vector<1x64xf32> to vector<64x64xf32>
    %97 = arith.addf %92, %96 : vector<64x64xf32>
    %cst_15 = arith.constant 5.000000e-01 : f32
    %98 = vector.broadcast %cst_15 : f32 to vector<64x64xf32>
    %99 = arith.mulf %98, %97 : vector<64x64xf32>
    %100 = math.tanh %99 : vector<64x64xf32>
    %cst_16 = arith.constant 5.000000e-01 : f32
    %101 = vector.broadcast %cst_16 : f32 to vector<64x64xf32>
    %102 = arith.mulf %101, %100 : vector<64x64xf32>
    %cst_17 = arith.constant 5.000000e-01 : f32
    %103 = vector.broadcast %cst_17 : f32 to vector<64x64xf32>
    %104 = arith.addf %102, %103 : vector<64x64xf32>
    %105 = arith.mulf %97, %104 : vector<64x64xf32>
    %106 = vector.shape_cast %105 : vector<64x64xf32> to vector<8x8x64xf32>
    %cst_18 = arith.constant 0.000000e+00 : f32
    %107 = vector.broadcast %cst_18 : f32 to vector<1x10x64xf32>
    %cst_19 = arith.constant 0.000000e+00 : f32
    %108 = vector.broadcast %cst_19 : f32 to vector<8x1x64xf32>
    %c0_20 = arith.constant 0 : index
    %c0_21 = arith.constant 0 : index
    %c0_22 = arith.constant 0 : index
    %109 = vector.load %arg27[%c0_20, %c0_21, %c0_22] : memref<10x10x64xf32, #tpu.memory_space<vmem>>, vector<1x10x64xf32>
    tpu.vector_store %arg27[%c0_20, %c0_21, %c0_22], %107 {strides = array<i32>} : memref<10x10x64xf32, #tpu.memory_space<vmem>>, vector<1x10x64xf32>,
    %c9 = arith.constant 9 : index
    %c0_23 = arith.constant 0 : index
    %c0_24 = arith.constant 0 : index
    %110 = vector.load %arg27[%c9, %c0_23, %c0_24] : memref<10x10x64xf32, #tpu.memory_space<vmem>>, vector<1x10x64xf32>
    tpu.vector_store %arg27[%c9, %c0_23, %c0_24], %107 {strides = array<i32>} : memref<10x10x64xf32, #tpu.memory_space<vmem>>, vector<1x10x64xf32>,
    %c1 = arith.constant 1 : index
    %c0_25 = arith.constant 0 : index
    %c0_26 = arith.constant 0 : index
    %111 = vector.load %arg27[%c1, %c0_25, %c0_26] : memref<10x10x64xf32, #tpu.memory_space<vmem>>, vector<8x1x64xf32>
    tpu.vector_store %arg27[%c1, %c0_25, %c0_26], %108 {strides = array<i32>} : memref<10x10x64xf32, #tpu.memory_space<vmem>>, vector<8x1x64xf32>,
    %c1_27 = arith.constant 1 : index
    %c9_28 = arith.constant 9 : index
    %c0_29 = arith.constant 0 : index
    %112 = vector.load %arg27[%c1_27, %c9_28, %c0_29] : memref<10x10x64xf32, #tpu.memory_space<vmem>>, vector<8x1x64xf32>
    tpu.vector_store %arg27[%c1_27, %c9_28, %c0_29], %108 {strides = array<i32>} : memref<10x10x64xf32, #tpu.memory_space<vmem>>, vector<8x1x64xf32>,
    %c1_30 = arith.constant 1 : index
    %c1_31 = arith.constant 1 : index
    %c0_32 = arith.constant 0 : index
    %113 = vector.load %arg27[%c1_30, %c1_31, %c0_32] : memref<10x10x64xf32, #tpu.memory_space<vmem>>, vector<8x8x64xf32>
    tpu.vector_store %arg27[%c1_30, %c1_31, %c0_32], %106 {strides = array<i32>} : memref<10x10x64xf32, #tpu.memory_space<vmem>>, vector<8x8x64xf32>,
    %c0_33 = arith.constant 0 : index
    %c0_34 = arith.constant 0 : index
    %114 = vector.load %arg6[%c0_33, %c0_34] : memref<9x64xf32, #tpu.memory_space<vmem>>, vector<9x64xf32>
    %cst_35 = arith.constant 0.000000e+00 : f32
    %115 = vector.broadcast %cst_35 : f32 to vector<8x8x64xf32>
    %c0_36 = arith.constant 0 : index
    %c0_37 = arith.constant 0 : index
    %c0_38 = arith.constant 0 : index
    %116 = vector.load %arg27[%c0_36, %c0_37, %c0_38] : memref<10x10x64xf32, #tpu.memory_space<vmem>>, vector<8x8x64xf32>
    %117 = vector.extract_strided_slice %114 {offsets = [0, 0], sizes = [1, 64], strides = [1, 1]} : vector<9x64xf32> to vector<1x64xf32>
    %118 = vector.shape_cast %117 : vector<1x64xf32> to vector<64xf32>
    %119 = vector.shape_cast %118 : vector<64xf32> to vector<1x1x64xf32>
    %120 = vector.broadcast %119 : vector<1x1x64xf32> to vector<8x8x64xf32>
    %121 = arith.mulf %116, %120 : vector<8x8x64xf32>
    %122 = arith.addf %115, %121 : vector<8x8x64xf32>
    %c0_39 = arith.constant 0 : index
    %c1_40 = arith.constant 1 : index
    %c0_41 = arith.constant 0 : index
    %123 = vector.load %arg27[%c0_39, %c1_40, %c0_41] : memref<10x10x64xf32, #tpu.memory_space<vmem>>, vector<8x8x64xf32>
    %124 = vector.extract_strided_slice %114 {offsets = [1, 0], sizes = [1, 64], strides = [1, 1]} : vector<9x64xf32> to vector<1x64xf32>
    %125 = vector.shape_cast %124 : vector<1x64xf32> to vector<64xf32>
    %126 = vector.shape_cast %125 : vector<64xf32> to vector<1x1x64xf32>
    %127 = vector.broadcast %126 : vector<1x1x64xf32> to vector<8x8x64xf32>
    %128 = arith.mulf %123, %127 : vector<8x8x64xf32>
    %129 = arith.addf %122, %128 : vector<8x8x64xf32>
    %c0_42 = arith.constant 0 : index
    %c2 = arith.constant 2 : index
    %c0_43 = arith.constant 0 : index
    %130 = vector.load %arg27[%c0_42, %c2, %c0_43] : memref<10x10x64xf32, #tpu.memory_space<vmem>>, vector<8x8x64xf32>
    %131 = vector.extract_strided_slice %114 {offsets = [2, 0], sizes = [1, 64], strides = [1, 1]} : vector<9x64xf32> to vector<1x64xf32>
    %132 = vector.shape_cast %131 : vector<1x64xf32> to vector<64xf32>
    %133 = vector.shape_cast %132 : vector<64xf32> to vector<1x1x64xf32>
    %134 = vector.broadcast %133 : vector<1x1x64xf32> to vector<8x8x64xf32>
    %135 = arith.mulf %130, %134 : vector<8x8x64xf32>
    %136 = arith.addf %129, %135 : vector<8x8x64xf32>
    %c1_44 = arith.constant 1 : index
    %c0_45 = arith.constant 0 : index
    %c0_46 = arith.constant 0 : index
    %137 = vector.load %arg27[%c1_44, %c0_45, %c0_46] : memref<10x10x64xf32, #tpu.memory_space<vmem>>, vector<8x8x64xf32>
    %138 = vector.extract_strided_slice %114 {offsets = [3, 0], sizes = [1, 64], strides = [1, 1]} : vector<9x64xf32> to vector<1x64xf32>
    %139 = vector.shape_cast %138 : vector<1x64xf32> to vector<64xf32>
    %140 = vector.shape_cast %139 : vector<64xf32> to vector<1x1x64xf32>
    %141 = vector.broadcast %140 : vector<1x1x64xf32> to vector<8x8x64xf32>
    %142 = arith.mulf %137, %141 : vector<8x8x64xf32>
    %143 = arith.addf %136, %142 : vector<8x8x64xf32>
    %c1_47 = arith.constant 1 : index
    %c1_48 = arith.constant 1 : index
    %c0_49 = arith.constant 0 : index
    %144 = vector.load %arg27[%c1_47, %c1_48, %c0_49] : memref<10x10x64xf32, #tpu.memory_space<vmem>>, vector<8x8x64xf32>
    %145 = vector.extract_strided_slice %114 {offsets = [4, 0], sizes = [1, 64], strides = [1, 1]} : vector<9x64xf32> to vector<1x64xf32>
    %146 = vector.shape_cast %145 : vector<1x64xf32> to vector<64xf32>
    %147 = vector.shape_cast %146 : vector<64xf32> to vector<1x1x64xf32>
    %148 = vector.broadcast %147 : vector<1x1x64xf32> to vector<8x8x64xf32>
    %149 = arith.mulf %144, %148 : vector<8x8x64xf32>
    %150 = arith.addf %143, %149 : vector<8x8x64xf32>
    %c1_50 = arith.constant 1 : index
    %c2_51 = arith.constant 2 : index
    %c0_52 = arith.constant 0 : index
    %151 = vector.load %arg27[%c1_50, %c2_51, %c0_52] : memref<10x10x64xf32, #tpu.memory_space<vmem>>, vector<8x8x64xf32>
    %152 = vector.extract_strided_slice %114 {offsets = [5, 0], sizes = [1, 64], strides = [1, 1]} : vector<9x64xf32> to vector<1x64xf32>
    %153 = vector.shape_cast %152 : vector<1x64xf32> to vector<64xf32>
    %154 = vector.shape_cast %153 : vector<64xf32> to vector<1x1x64xf32>
    %155 = vector.broadcast %154 : vector<1x1x64xf32> to vector<8x8x64xf32>
    %156 = arith.mulf %151, %155 : vector<8x8x64xf32>
    %157 = arith.addf %150, %156 : vector<8x8x64xf32>
    %c2_53 = arith.constant 2 : index
    %c0_54 = arith.constant 0 : index
    %c0_55 = arith.constant 0 : index
    %158 = vector.load %arg27[%c2_53, %c0_54, %c0_55] : memref<10x10x64xf32, #tpu.memory_space<vmem>>, vector<8x8x64xf32>
    %159 = vector.extract_strided_slice %114 {offsets = [6, 0], sizes = [1, 64], strides = [1, 1]} : vector<9x64xf32> to vector<1x64xf32>
    %160 = vector.shape_cast %159 : vector<1x64xf32> to vector<64xf32>
    %161 = vector.shape_cast %160 : vector<64xf32> to vector<1x1x64xf32>
    %162 = vector.broadcast %161 : vector<1x1x64xf32> to vector<8x8x64xf32>
    %163 = arith.mulf %158, %162 : vector<8x8x64xf32>
    %164 = arith.addf %157, %163 : vector<8x8x64xf32>
    %c2_56 = arith.constant 2 : index
    %c1_57 = arith.constant 1 : index
    %c0_58 = arith.constant 0 : index
    %165 = vector.load %arg27[%c2_56, %c1_57, %c0_58] : memref<10x10x64xf32, #tpu.memory_space<vmem>>, vector<8x8x64xf32>
    %166 = vector.extract_strided_slice %114 {offsets = [7, 0], sizes = [1, 64], strides = [1, 1]} : vector<9x64xf32> to vector<1x64xf32>
    %167 = vector.shape_cast %166 : vector<1x64xf32> to vector<64xf32>
    %168 = vector.shape_cast %167 : vector<64xf32> to vector<1x1x64xf32>
    %169 = vector.broadcast %168 : vector<1x1x64xf32> to vector<8x8x64xf32>
    %170 = arith.mulf %165, %169 : vector<8x8x64xf32>
    %171 = arith.addf %164, %170 : vector<8x8x64xf32>
    %c2_59 = arith.constant 2 : index
    %c2_60 = arith.constant 2 : index
    %c0_61 = arith.constant 0 : index
    %172 = vector.load %arg27[%c2_59, %c2_60, %c0_61] : memref<10x10x64xf32, #tpu.memory_space<vmem>>, vector<8x8x64xf32>
    %173 = vector.extract_strided_slice %114 {offsets = [8, 0], sizes = [1, 64], strides = [1, 1]} : vector<9x64xf32> to vector<1x64xf32>
    %174 = vector.shape_cast %173 : vector<1x64xf32> to vector<64xf32>
    %175 = vector.shape_cast %174 : vector<64xf32> to vector<1x1x64xf32>
    %176 = vector.broadcast %175 : vector<1x1x64xf32> to vector<8x8x64xf32>
    %177 = arith.mulf %172, %176 : vector<8x8x64xf32>
    %178 = arith.addf %171, %177 : vector<8x8x64xf32>
    %c0_62 = arith.constant 0 : index
    %c0_63 = arith.constant 0 : index
    %179 = vector.load %arg7[%c0_62, %c0_63] : memref<1x64xf32, #tpu.memory_space<vmem>>, vector<1x64xf32>
    %180 = vector.shape_cast %179 : vector<1x64xf32> to vector<64xf32>
    %181 = vector.shape_cast %180 : vector<64xf32> to vector<1x1x64xf32>
    %182 = vector.broadcast %181 : vector<1x1x64xf32> to vector<8x8x64xf32>
    %183 = arith.addf %178, %182 : vector<8x8x64xf32>
    %cst_64 = arith.constant 5.000000e-01 : f32
    %184 = vector.broadcast %cst_64 : f32 to vector<8x8x64xf32>
    %185 = arith.mulf %184, %183 : vector<8x8x64xf32>
    %186 = math.tanh %185 : vector<8x8x64xf32>
    %cst_65 = arith.constant 5.000000e-01 : f32
    %187 = vector.broadcast %cst_65 : f32 to vector<8x8x64xf32>
    %188 = arith.mulf %187, %186 : vector<8x8x64xf32>
    %cst_66 = arith.constant 5.000000e-01 : f32
    %189 = vector.broadcast %cst_66 : f32 to vector<8x8x64xf32>
    %190 = arith.addf %188, %189 : vector<8x8x64xf32>
    %191 = arith.mulf %183, %190 : vector<8x8x64xf32>
    %192 = vector.shape_cast %191 : vector<8x8x64xf32> to vector<64x64xf32>
    %cst_67 = arith.constant dense<0.000000e+00> : vector<64xf32>
    %193 = vector.multi_reduction <add>, %192, %cst_67 [0] : vector<64x64xf32> to vector<64xf32>
    %194 = vector.shape_cast %193 : vector<64xf32> to vector<1x64xf32>
    %cst_68 = arith.constant 6.400000e+01 : f32
    %195 = vector.broadcast %cst_68 : f32 to vector<1x64xf32>
    %196 = arith.divf %194, %195 : vector<1x64xf32>
    %c0_69 = arith.constant 0 : index
    %c0_70 = arith.constant 0 : index
    %197 = vector.load %arg8[%c0_69, %c0_70] : memref<64x8xf32, #tpu.memory_space<vmem>>, vector<64x8xf32>
    %cst_71 = arith.constant dense<0.000000e+00> : vector<1x8xf32>
    %198 = tpu.matmul %196, %197, %cst_71 {dimension_numbers = #tpu.dot_dimension_numbers<[1], [0], [0], [1], [0, 0, 1, 1], [], []>} : vector<1x64xf32>, vector<64x8xf32>, vector<1x8xf32> -> vector<1x8xf32>
    %c0_72 = arith.constant 0 : index
    %c0_73 = arith.constant 0 : index
    %199 = vector.load %arg9[%c0_72, %c0_73] : memref<1x8xf32, #tpu.memory_space<vmem>>, vector<1x8xf32>
    %200 = arith.addf %198, %199 : vector<1x8xf32>
    %cst_74 = arith.constant 5.000000e-01 : f32
    %201 = vector.broadcast %cst_74 : f32 to vector<1x8xf32>
    %202 = arith.mulf %201, %200 : vector<1x8xf32>
    %203 = math.tanh %202 : vector<1x8xf32>
    %cst_75 = arith.constant 5.000000e-01 : f32
    %204 = vector.broadcast %cst_75 : f32 to vector<1x8xf32>
    %205 = arith.mulf %204, %203 : vector<1x8xf32>
    %cst_76 = arith.constant 5.000000e-01 : f32
    %206 = vector.broadcast %cst_76 : f32 to vector<1x8xf32>
    %207 = arith.addf %205, %206 : vector<1x8xf32>
    %208 = arith.mulf %200, %207 : vector<1x8xf32>
    %c0_77 = arith.constant 0 : index
    %c0_78 = arith.constant 0 : index
    %209 = vector.load %arg10[%c0_77, %c0_78] : memref<64x8xf32, #tpu.memory_space<vmem>>, vector<64x8xf32>
    %210 = vector.broadcast %208 : vector<1x8xf32> to vector<64x8xf32>
    %211 = arith.mulf %209, %210 : vector<64x8xf32>
    %cst_79 = arith.constant dense<0.000000e+00> : vector<64xf32>
    %212 = vector.multi_reduction <add>, %211, %cst_79 [1] : vector<64x8xf32> to vector<64xf32>
    %213 = vector.shape_cast %212 : vector<64xf32> to vector<64x1xf32>
    %c0_80 = arith.constant 0 : index
    %c0_81 = arith.constant 0 : index
    %214 = vector.load %arg11[%c0_80, %c0_81] : memref<64x1xf32, #tpu.memory_space<vmem>>, vector<64x1xf32>
    %215 = arith.addf %213, %214 : vector<64x1xf32>
    %cst_82 = arith.constant 5.000000e-01 : f32
    %216 = vector.broadcast %cst_82 : f32 to vector<64x1xf32>
    %217 = arith.mulf %216, %215 : vector<64x1xf32>
    %218 = math.tanh %217 : vector<64x1xf32>
    %cst_83 = arith.constant 5.000000e-01 : f32
    %219 = vector.broadcast %cst_83 : f32 to vector<64x1xf32>
    %220 = arith.mulf %219, %218 : vector<64x1xf32>
    %cst_84 = arith.constant 5.000000e-01 : f32
    %221 = vector.broadcast %cst_84 : f32 to vector<64x1xf32>
    %222 = arith.addf %220, %221 : vector<64x1xf32>
    %c0_85 = arith.constant 0 : index
    %c0_86 = arith.constant 0 : index
    %223 = vector.load %arg12[%c0_85, %c0_86] : memref<64x24xbf16, #tpu.memory_space<vmem>>, vector<64x24xbf16>
    %224 = arith.extf %223 : vector<64x24xbf16> to vector<64x24xf32>
    %225 = vector.broadcast %222 : vector<64x1xf32> to vector<64x24xf32>
    %226 = arith.mulf %224, %225 : vector<64x24xf32>
    %227 = arith.truncf %226 : vector<64x24xf32> to vector<64x24xbf16>
    %228 = arith.truncf %192 : vector<64x64xf32> to vector<64x64xbf16>
    %cst_87 = arith.constant dense<0.000000e+00> : vector<64x24xf32>
    %229 = tpu.matmul %228, %227, %cst_87 {dimension_numbers = #tpu.dot_dimension_numbers<[1], [0], [0], [1], [0, 0, 1, 1], [], []>} : vector<64x64xbf16>, vector<64x24xbf16>, vector<64x24xf32> -> vector<64x24xf32>
    %c0_88 = arith.constant 0 : index
    %c0_89 = arith.constant 0 : index
    %230 = vector.load %arg13[%c0_88, %c0_89] : memref<1x24xf32, #tpu.memory_space<vmem>>, vector<1x24xf32>
    %231 = vector.shape_cast %230 : vector<1x24xf32> to vector<24xf32>
    %232 = vector.shape_cast %231 : vector<24xf32> to vector<1x24xf32>
    %233 = vector.broadcast %232 : vector<1x24xf32> to vector<64x24xf32>
    %234 = arith.addf %229, %233 : vector<64x24xf32>
    %235 = arith.truncf %234 : vector<64x24xf32> to vector<64x24xbf16>
    %c0_90 = arith.constant 0 : index
    %c0_91 = arith.constant 0 : index
    %236 = vector.load %arg14[%c0_90, %c0_91] : memref<24x96xbf16, #tpu.memory_space<vmem>>, vector<24x96xbf16>
    %cst_92 = arith.constant dense<0.000000e+00> : vector<64x96xf32>
    %237 = tpu.matmul %235, %236, %cst_92 {dimension_numbers = #tpu.dot_dimension_numbers<[1], [0], [0], [1], [0, 0, 1, 1], [], []>} : vector<64x24xbf16>, vector<24x96xbf16>, vector<64x96xf32> -> vector<64x96xf32>
    %c0_93 = arith.constant 0 : index
    %c0_94 = arith.constant 0 : index
    %238 = vector.load %arg15[%c0_93, %c0_94] : memref<1x96xf32, #tpu.memory_space<vmem>>, vector<1x96xf32>
    %239 = vector.shape_cast %238 : vector<1x96xf32> to vector<96xf32>
    %240 = vector.shape_cast %239 : vector<96xf32> to vector<1x96xf32>
    %241 = vector.broadcast %240 : vector<1x96xf32> to vector<64x96xf32>
    %242 = arith.addf %237, %241 : vector<64x96xf32>
    %cst_95 = arith.constant 5.000000e-01 : f32
    %243 = vector.broadcast %cst_95 : f32 to vector<64x96xf32>
    %244 = arith.mulf %243, %242 : vector<64x96xf32>
    %245 = math.tanh %244 : vector<64x96xf32>
    %cst_96 = arith.constant 5.000000e-01 : f32
    %246 = vector.broadcast %cst_96 : f32 to vector<64x96xf32>
    %247 = arith.mulf %246, %245 : vector<64x96xf32>
    %cst_97 = arith.constant 5.000000e-01 : f32
    %248 = vector.broadcast %cst_97 : f32 to vector<64x96xf32>
    %249 = arith.addf %247, %248 : vector<64x96xf32>
    %250 = arith.mulf %242, %249 : vector<64x96xf32>
    %251 = vector.shape_cast %250 : vector<64x96xf32> to vector<8x8x96xf32>
    %cst_98 = arith.constant 0.000000e+00 : f32
    %252 = vector.broadcast %cst_98 : f32 to vector<1x10x96xf32>
    %cst_99 = arith.constant 0.000000e+00 : f32
    %253 = vector.broadcast %cst_99 : f32 to vector<8x1x96xf32>
    %c0_100 = arith.constant 0 : index
    %c0_101 = arith.constant 0 : index
    %c0_102 = arith.constant 0 : index
    %254 = vector.load %arg28[%c0_100, %c0_101, %c0_102] : memref<10x10x96xf32, #tpu.memory_space<vmem>>, vector<1x10x96xf32>
    tpu.vector_store %arg28[%c0_100, %c0_101, %c0_102], %252 {strides = array<i32>} : memref<10x10x96xf32, #tpu.memory_space<vmem>>, vector<1x10x96xf32>,
    %c9_103 = arith.constant 9 : index
    %c0_104 = arith.constant 0 : index
    %c0_105 = arith.constant 0 : index
    %255 = vector.load %arg28[%c9_103, %c0_104, %c0_105] : memref<10x10x96xf32, #tpu.memory_space<vmem>>, vector<1x10x96xf32>
    tpu.vector_store %arg28[%c9_103, %c0_104, %c0_105], %252 {strides = array<i32>} : memref<10x10x96xf32, #tpu.memory_space<vmem>>, vector<1x10x96xf32>,
    %c1_106 = arith.constant 1 : index
    %c0_107 = arith.constant 0 : index
    %c0_108 = arith.constant 0 : index
    %256 = vector.load %arg28[%c1_106, %c0_107, %c0_108] : memref<10x10x96xf32, #tpu.memory_space<vmem>>, vector<8x1x96xf32>
    tpu.vector_store %arg28[%c1_106, %c0_107, %c0_108], %253 {strides = array<i32>} : memref<10x10x96xf32, #tpu.memory_space<vmem>>, vector<8x1x96xf32>,
    %c1_109 = arith.constant 1 : index
    %c9_110 = arith.constant 9 : index
    %c0_111 = arith.constant 0 : index
    %257 = vector.load %arg28[%c1_109, %c9_110, %c0_111] : memref<10x10x96xf32, #tpu.memory_space<vmem>>, vector<8x1x96xf32>
    tpu.vector_store %arg28[%c1_109, %c9_110, %c0_111], %253 {strides = array<i32>} : memref<10x10x96xf32, #tpu.memory_space<vmem>>, vector<8x1x96xf32>,
    %c1_112 = arith.constant 1 : index
    %c1_113 = arith.constant 1 : index
    %c0_114 = arith.constant 0 : index
    %258 = vector.load %arg28[%c1_112, %c1_113, %c0_114] : memref<10x10x96xf32, #tpu.memory_space<vmem>>, vector<8x8x96xf32>
    tpu.vector_store %arg28[%c1_112, %c1_113, %c0_114], %251 {strides = array<i32>} : memref<10x10x96xf32, #tpu.memory_space<vmem>>, vector<8x8x96xf32>,
    %c0_115 = arith.constant 0 : index
    %c0_116 = arith.constant 0 : index
    %259 = vector.load %arg16[%c0_115, %c0_116] : memref<9x96xf32, #tpu.memory_space<vmem>>, vector<9x96xf32>
    %cst_117 = arith.constant 0.000000e+00 : f32
    %260 = vector.broadcast %cst_117 : f32 to vector<8x8x96xf32>
    %c0_118 = arith.constant 0 : index
    %c0_119 = arith.constant 0 : index
    %c0_120 = arith.constant 0 : index
    %261 = vector.load %arg28[%c0_118, %c0_119, %c0_120] : memref<10x10x96xf32, #tpu.memory_space<vmem>>, vector<8x8x96xf32>
    %262 = vector.extract_strided_slice %259 {offsets = [0, 0], sizes = [1, 96], strides = [1, 1]} : vector<9x96xf32> to vector<1x96xf32>
    %263 = vector.shape_cast %262 : vector<1x96xf32> to vector<96xf32>
    %264 = vector.shape_cast %263 : vector<96xf32> to vector<1x1x96xf32>
    %265 = vector.broadcast %264 : vector<1x1x96xf32> to vector<8x8x96xf32>
    %266 = arith.mulf %261, %265 : vector<8x8x96xf32>
    %267 = arith.addf %260, %266 : vector<8x8x96xf32>
    %c0_121 = arith.constant 0 : index
    %c1_122 = arith.constant 1 : index
    %c0_123 = arith.constant 0 : index
    %268 = vector.load %arg28[%c0_121, %c1_122, %c0_123] : memref<10x10x96xf32, #tpu.memory_space<vmem>>, vector<8x8x96xf32>
    %269 = vector.extract_strided_slice %259 {offsets = [1, 0], sizes = [1, 96], strides = [1, 1]} : vector<9x96xf32> to vector<1x96xf32>
    %270 = vector.shape_cast %269 : vector<1x96xf32> to vector<96xf32>
    %271 = vector.shape_cast %270 : vector<96xf32> to vector<1x1x96xf32>
    %272 = vector.broadcast %271 : vector<1x1x96xf32> to vector<8x8x96xf32>
    %273 = arith.mulf %268, %272 : vector<8x8x96xf32>
    %274 = arith.addf %267, %273 : vector<8x8x96xf32>
    %c0_124 = arith.constant 0 : index
    %c2_125 = arith.constant 2 : index
    %c0_126 = arith.constant 0 : index
    %275 = vector.load %arg28[%c0_124, %c2_125, %c0_126] : memref<10x10x96xf32, #tpu.memory_space<vmem>>, vector<8x8x96xf32>
    %276 = vector.extract_strided_slice %259 {offsets = [2, 0], sizes = [1, 96], strides = [1, 1]} : vector<9x96xf32> to vector<1x96xf32>
    %277 = vector.shape_cast %276 : vector<1x96xf32> to vector<96xf32>
    %278 = vector.shape_cast %277 : vector<96xf32> to vector<1x1x96xf32>
    %279 = vector.broadcast %278 : vector<1x1x96xf32> to vector<8x8x96xf32>
    %280 = arith.mulf %275, %279 : vector<8x8x96xf32>
    %281 = arith.addf %274, %280 : vector<8x8x96xf32>
    %c1_127 = arith.constant 1 : index
    %c0_128 = arith.constant 0 : index
    %c0_129 = arith.constant 0 : index
    %282 = vector.load %arg28[%c1_127, %c0_128, %c0_129] : memref<10x10x96xf32, #tpu.memory_space<vmem>>, vector<8x8x96xf32>
    %283 = vector.extract_strided_slice %259 {offsets = [3, 0], sizes = [1, 96], strides = [1, 1]} : vector<9x96xf32> to vector<1x96xf32>
    %284 = vector.shape_cast %283 : vector<1x96xf32> to vector<96xf32>
    %285 = vector.shape_cast %284 : vector<96xf32> to vector<1x1x96xf32>
    %286 = vector.broadcast %285 : vector<1x1x96xf32> to vector<8x8x96xf32>
    %287 = arith.mulf %282, %286 : vector<8x8x96xf32>
    %288 = arith.addf %281, %287 : vector<8x8x96xf32>
    %c1_130 = arith.constant 1 : index
    %c1_131 = arith.constant 1 : index
    %c0_132 = arith.constant 0 : index
    %289 = vector.load %arg28[%c1_130, %c1_131, %c0_132] : memref<10x10x96xf32, #tpu.memory_space<vmem>>, vector<8x8x96xf32>
    %290 = vector.extract_strided_slice %259 {offsets = [4, 0], sizes = [1, 96], strides = [1, 1]} : vector<9x96xf32> to vector<1x96xf32>
    %291 = vector.shape_cast %290 : vector<1x96xf32> to vector<96xf32>
    %292 = vector.shape_cast %291 : vector<96xf32> to vector<1x1x96xf32>
    %293 = vector.broadcast %292 : vector<1x1x96xf32> to vector<8x8x96xf32>
    %294 = arith.mulf %289, %293 : vector<8x8x96xf32>
    %295 = arith.addf %288, %294 : vector<8x8x96xf32>
    %c1_133 = arith.constant 1 : index
    %c2_134 = arith.constant 2 : index
    %c0_135 = arith.constant 0 : index
    %296 = vector.load %arg28[%c1_133, %c2_134, %c0_135] : memref<10x10x96xf32, #tpu.memory_space<vmem>>, vector<8x8x96xf32>
    %297 = vector.extract_strided_slice %259 {offsets = [5, 0], sizes = [1, 96], strides = [1, 1]} : vector<9x96xf32> to vector<1x96xf32>
    %298 = vector.shape_cast %297 : vector<1x96xf32> to vector<96xf32>
    %299 = vector.shape_cast %298 : vector<96xf32> to vector<1x1x96xf32>
    %300 = vector.broadcast %299 : vector<1x1x96xf32> to vector<8x8x96xf32>
    %301 = arith.mulf %296, %300 : vector<8x8x96xf32>
    %302 = arith.addf %295, %301 : vector<8x8x96xf32>
    %c2_136 = arith.constant 2 : index
    %c0_137 = arith.constant 0 : index
    %c0_138 = arith.constant 0 : index
    %303 = vector.load %arg28[%c2_136, %c0_137, %c0_138] : memref<10x10x96xf32, #tpu.memory_space<vmem>>, vector<8x8x96xf32>
    %304 = vector.extract_strided_slice %259 {offsets = [6, 0], sizes = [1, 96], strides = [1, 1]} : vector<9x96xf32> to vector<1x96xf32>
    %305 = vector.shape_cast %304 : vector<1x96xf32> to vector<96xf32>
    %306 = vector.shape_cast %305 : vector<96xf32> to vector<1x1x96xf32>
    %307 = vector.broadcast %306 : vector<1x1x96xf32> to vector<8x8x96xf32>
    %308 = arith.mulf %303, %307 : vector<8x8x96xf32>
    %309 = arith.addf %302, %308 : vector<8x8x96xf32>
    %c2_139 = arith.constant 2 : index
    %c1_140 = arith.constant 1 : index
    %c0_141 = arith.constant 0 : index
    %310 = vector.load %arg28[%c2_139, %c1_140, %c0_141] : memref<10x10x96xf32, #tpu.memory_space<vmem>>, vector<8x8x96xf32>
    %311 = vector.extract_strided_slice %259 {offsets = [7, 0], sizes = [1, 96], strides = [1, 1]} : vector<9x96xf32> to vector<1x96xf32>
    %312 = vector.shape_cast %311 : vector<1x96xf32> to vector<96xf32>
    %313 = vector.shape_cast %312 : vector<96xf32> to vector<1x1x96xf32>
    %314 = vector.broadcast %313 : vector<1x1x96xf32> to vector<8x8x96xf32>
    %315 = arith.mulf %310, %314 : vector<8x8x96xf32>
    %316 = arith.addf %309, %315 : vector<8x8x96xf32>
    %c2_142 = arith.constant 2 : index
    %c2_143 = arith.constant 2 : index
    %c0_144 = arith.constant 0 : index
    %317 = vector.load %arg28[%c2_142, %c2_143, %c0_144] : memref<10x10x96xf32, #tpu.memory_space<vmem>>, vector<8x8x96xf32>
    %318 = vector.extract_strided_slice %259 {offsets = [8, 0], sizes = [1, 96], strides = [1, 1]} : vector<9x96xf32> to vector<1x96xf32>
    %319 = vector.shape_cast %318 : vector<1x96xf32> to vector<96xf32>
    %320 = vector.shape_cast %319 : vector<96xf32> to vector<1x1x96xf32>
    %321 = vector.broadcast %320 : vector<1x1x96xf32> to vector<8x8x96xf32>
    %322 = arith.mulf %317, %321 : vector<8x8x96xf32>
    %323 = arith.addf %316, %322 : vector<8x8x96xf32>
    %c0_145 = arith.constant 0 : index
    %c0_146 = arith.constant 0 : index
    %324 = vector.load %arg17[%c0_145, %c0_146] : memref<1x96xf32, #tpu.memory_space<vmem>>, vector<1x96xf32>
    %325 = vector.shape_cast %324 : vector<1x96xf32> to vector<96xf32>
    %326 = vector.shape_cast %325 : vector<96xf32> to vector<1x1x96xf32>
    %327 = vector.broadcast %326 : vector<1x1x96xf32> to vector<8x8x96xf32>
    %328 = arith.addf %323, %327 : vector<8x8x96xf32>
    %cst_147 = arith.constant 5.000000e-01 : f32
    %329 = vector.broadcast %cst_147 : f32 to vector<8x8x96xf32>
    %330 = arith.mulf %329, %328 : vector<8x8x96xf32>
    %331 = math.tanh %330 : vector<8x8x96xf32>
    %cst_148 = arith.constant 5.000000e-01 : f32
    %332 = vector.broadcast %cst_148 : f32 to vector<8x8x96xf32>
    %333 = arith.mulf %332, %331 : vector<8x8x96xf32>
    %cst_149 = arith.constant 5.000000e-01 : f32
    %334 = vector.broadcast %cst_149 : f32 to vector<8x8x96xf32>
    %335 = arith.addf %333, %334 : vector<8x8x96xf32>
    %336 = arith.mulf %328, %335 : vector<8x8x96xf32>
    %337 = vector.shape_cast %336 : vector<8x8x96xf32> to vector<64x96xf32>
    %cst_150 = arith.constant dense<0.000000e+00> : vector<96xf32>
    %338 = vector.multi_reduction <add>, %337, %cst_150 [0] : vector<64x96xf32> to vector<96xf32>
    %339 = vector.shape_cast %338 : vector<96xf32> to vector<1x96xf32>
    %cst_151 = arith.constant 6.400000e+01 : f32
    %340 = vector.broadcast %cst_151 : f32 to vector<1x96xf32>
    %341 = arith.divf %339, %340 : vector<1x96xf32>
    %c0_152 = arith.constant 0 : index
    %c0_153 = arith.constant 0 : index
    %342 = vector.load %arg18[%c0_152, %c0_153] : memref<96x8xf32, #tpu.memory_space<vmem>>, vector<96x8xf32>
    %cst_154 = arith.constant dense<0.000000e+00> : vector<1x8xf32>
    %343 = tpu.matmul %341, %342, %cst_154 {dimension_numbers = #tpu.dot_dimension_numbers<[1], [0], [0], [1], [0, 0, 1, 1], [], []>} : vector<1x96xf32>, vector<96x8xf32>, vector<1x8xf32> -> vector<1x8xf32>
    %c0_155 = arith.constant 0 : index
    %c0_156 = arith.constant 0 : index
    %344 = vector.load %arg19[%c0_155, %c0_156] : memref<1x8xf32, #tpu.memory_space<vmem>>, vector<1x8xf32>
    %345 = arith.addf %343, %344 : vector<1x8xf32>
    %cst_157 = arith.constant 5.000000e-01 : f32
    %346 = vector.broadcast %cst_157 : f32 to vector<1x8xf32>
    %347 = arith.mulf %346, %345 : vector<1x8xf32>
    %348 = math.tanh %347 : vector<1x8xf32>
    %cst_158 = arith.constant 5.000000e-01 : f32
    %349 = vector.broadcast %cst_158 : f32 to vector<1x8xf32>
    %350 = arith.mulf %349, %348 : vector<1x8xf32>
    %cst_159 = arith.constant 5.000000e-01 : f32
    %351 = vector.broadcast %cst_159 : f32 to vector<1x8xf32>
    %352 = arith.addf %350, %351 : vector<1x8xf32>
    %353 = arith.mulf %345, %352 : vector<1x8xf32>
    %c0_160 = arith.constant 0 : index
    %c0_161 = arith.constant 0 : index
    %354 = vector.load %arg20[%c0_160, %c0_161] : memref<96x8xf32, #tpu.memory_space<vmem>>, vector<96x8xf32>
    %355 = vector.broadcast %353 : vector<1x8xf32> to vector<96x8xf32>
    %356 = arith.mulf %354, %355 : vector<96x8xf32>
    %cst_162 = arith.constant dense<0.000000e+00> : vector<96xf32>
    %357 = vector.multi_reduction <add>, %356, %cst_162 [1] : vector<96x8xf32> to vector<96xf32>
    %358 = vector.shape_cast %357 : vector<96xf32> to vector<96x1xf32>
    %c0_163 = arith.constant 0 : index
    %c0_164 = arith.constant 0 : index
    %359 = vector.load %arg21[%c0_163, %c0_164] : memref<96x1xf32, #tpu.memory_space<vmem>>, vector<96x1xf32>
    %360 = arith.addf %358, %359 : vector<96x1xf32>
    %cst_165 = arith.constant 5.000000e-01 : f32
    %361 = vector.broadcast %cst_165 : f32 to vector<96x1xf32>
    %362 = arith.mulf %361, %360 : vector<96x1xf32>
    %363 = math.tanh %362 : vector<96x1xf32>
    %cst_166 = arith.constant 5.000000e-01 : f32
    %364 = vector.broadcast %cst_166 : f32 to vector<96x1xf32>
    %365 = arith.mulf %364, %363 : vector<96x1xf32>
    %cst_167 = arith.constant 5.000000e-01 : f32
    %366 = vector.broadcast %cst_167 : f32 to vector<96x1xf32>
    %367 = arith.addf %365, %366 : vector<96x1xf32>
    %c0_168 = arith.constant 0 : index
    %c0_169 = arith.constant 0 : index
    %368 = vector.load %arg22[%c0_168, %c0_169] : memref<96x24xbf16, #tpu.memory_space<vmem>>, vector<96x24xbf16>
    %369 = arith.extf %368 : vector<96x24xbf16> to vector<96x24xf32>
    %370 = vector.broadcast %367 : vector<96x1xf32> to vector<96x24xf32>
    %371 = arith.mulf %369, %370 : vector<96x24xf32>
    %372 = arith.truncf %371 : vector<96x24xf32> to vector<96x24xbf16>
    %373 = arith.truncf %337 : vector<64x96xf32> to vector<64x96xbf16>
    %cst_170 = arith.constant dense<0.000000e+00> : vector<64x24xf32>
    %374 = tpu.matmul %373, %372, %cst_170 {dimension_numbers = #tpu.dot_dimension_numbers<[1], [0], [0], [1], [0, 0, 1, 1], [], []>} : vector<64x96xbf16>, vector<96x24xbf16>, vector<64x24xf32> -> vector<64x24xf32>
    %c0_171 = arith.constant 0 : index
    %c0_172 = arith.constant 0 : index
    %375 = vector.load %arg23[%c0_171, %c0_172] : memref<1x24xf32, #tpu.memory_space<vmem>>, vector<1x24xf32>
    %376 = vector.shape_cast %375 : vector<1x24xf32> to vector<24xf32>
    %377 = vector.shape_cast %376 : vector<24xf32> to vector<1x24xf32>
    %378 = vector.broadcast %377 : vector<1x24xf32> to vector<64x24xf32>
    %379 = arith.addf %374, %378 : vector<64x24xf32>
    %380 = arith.addf %379, %234 : vector<64x24xf32>
    %381 = arith.truncf %380 : vector<64x24xf32> to vector<64x24xbf16>
    %c0_173 = arith.constant 0 : index
    %c0_174 = arith.constant 0 : index
    %382 = vector.load %arg24[%c0_173, %c0_174] : memref<24x32xbf16, #tpu.memory_space<vmem>>, vector<24x32xbf16>
    %cst_175 = arith.constant dense<0.000000e+00> : vector<64x32xf32>
    %383 = tpu.matmul %381, %382, %cst_175 {dimension_numbers = #tpu.dot_dimension_numbers<[1], [0], [0], [1], [0, 0, 1, 1], [], []>} : vector<64x24xbf16>, vector<24x32xbf16>, vector<64x32xf32> -> vector<64x32xf32>
    %c0_176 = arith.constant 0 : index
    %c0_177 = arith.constant 0 : index
    %384 = vector.load %arg25[%c0_176, %c0_177] : memref<1x32xf32, #tpu.memory_space<vmem>>, vector<1x32xf32>
    %385 = vector.shape_cast %384 : vector<1x32xf32> to vector<32xf32>
    %386 = vector.shape_cast %385 : vector<32xf32> to vector<1x32xf32>
    %387 = vector.broadcast %386 : vector<1x32xf32> to vector<64x32xf32>
    %388 = arith.addf %383, %387 : vector<64x32xf32>
    %cst_178 = arith.constant 5.000000e-01 : f32
    %389 = vector.broadcast %cst_178 : f32 to vector<64x32xf32>
    %390 = arith.mulf %389, %388 : vector<64x32xf32>
    %391 = math.tanh %390 : vector<64x32xf32>
    %cst_179 = arith.constant 5.000000e-01 : f32
    %392 = vector.broadcast %cst_179 : f32 to vector<64x32xf32>
    %393 = arith.mulf %392, %391 : vector<64x32xf32>
    %cst_180 = arith.constant 5.000000e-01 : f32
    %394 = vector.broadcast %cst_180 : f32 to vector<64x32xf32>
    %395 = arith.addf %393, %394 : vector<64x32xf32>
    %396 = arith.mulf %388, %395 : vector<64x32xf32>
    %397 = vector.shape_cast %396 : vector<64x32xf32> to vector<8x8x32xf32>
    %cst_181 = arith.constant dense<0.000000e+00> : vector<8x32xf32>
    %398 = vector.multi_reduction <add>, %397, %cst_181 [0] : vector<8x8x32xf32> to vector<8x32xf32>
    %cst_182 = arith.constant 8.000000e+00 : f32
    %399 = vector.broadcast %cst_182 : f32 to vector<8x32xf32>
    %400 = arith.divf %398, %399 : vector<8x32xf32>
    %c0_183 = arith.constant 0 : index
    %c0_184 = arith.constant 0 : index
    %c0_185 = arith.constant 0 : index
    %401 = vector.load %arg26[%c0_183, %c0_184, %c0_185] : memref<1x8x32xf32, #tpu.memory_space<vmem>>, vector<1x8x32xf32>
    %402 = vector.shape_cast %401 : vector<1x8x32xf32> to vector<8x32xf32>
    %403 = vector.shape_cast %400 : vector<8x32xf32> to vector<1x8x32xf32>
    tpu.vector_store %arg26[%c0_183, %c0_184, %c0_185], %403 {strides = array<i32>} : memref<1x8x32xf32, #tpu.memory_space<vmem>>, vector<1x8x32xf32>,
    return
  }
  func.func @transform_0(%arg0: i32) -> (i32, i32, i32, i32) {
    %c0_i32 = arith.constant 0 : i32
    %c0_i32_0 = arith.constant 0 : i32
    %c0_i32_1 = arith.constant 0 : i32
    %c0_i32_2 = arith.constant 0 : i32
    return %arg0, %c0_i32, %c0_i32_0, %c0_i32_1 : i32, i32, i32, i32
  }
  func.func @transform_1(%arg0: i32) -> (i32, i32) {
    %c0_i32 = arith.constant 0 : i32
    %c0_i32_0 = arith.constant 0 : i32
    %c0_i32_1 = arith.constant 0 : i32
    return %c0_i32, %c0_i32_0 : i32, i32
  }
  func.func @transform_2(%arg0: i32) -> (i32, i32) {
    %c0_i32 = arith.constant 0 : i32
    %c0_i32_0 = arith.constant 0 : i32
    %c0_i32_1 = arith.constant 0 : i32
    return %c0_i32, %c0_i32_0 : i32, i32
  }
  func.func @transform_3(%arg0: i32) -> (i32, i32) {
    %c0_i32 = arith.constant 0 : i32
    %c0_i32_0 = arith.constant 0 : i32
    %c0_i32_1 = arith.constant 0 : i32
    return %c0_i32, %c0_i32_0 : i32, i32
  }
  func.func @transform_4(%arg0: i32) -> (i32, i32) {
    %c0_i32 = arith.constant 0 : i32
    %c0_i32_0 = arith.constant 0 : i32
    %c0_i32_1 = arith.constant 0 : i32
    return %c0_i32, %c0_i32_0 : i32, i32
  }
  func.func @transform_5(%arg0: i32) -> (i32, i32) {
    %c0_i32 = arith.constant 0 : i32
    %c0_i32_0 = arith.constant 0 : i32
    %c0_i32_1 = arith.constant 0 : i32
    return %c0_i32, %c0_i32_0 : i32, i32
  }
  func.func @transform_6(%arg0: i32) -> (i32, i32) {
    %c0_i32 = arith.constant 0 : i32
    %c0_i32_0 = arith.constant 0 : i32
    %c0_i32_1 = arith.constant 0 : i32
    return %c0_i32, %c0_i32_0 : i32, i32
  }
  func.func @transform_7(%arg0: i32) -> (i32, i32) {
    %c0_i32 = arith.constant 0 : i32
    %c0_i32_0 = arith.constant 0 : i32
    %c0_i32_1 = arith.constant 0 : i32
    return %c0_i32, %c0_i32_0 : i32, i32
  }
  func.func @transform_8(%arg0: i32) -> (i32, i32) {
    %c0_i32 = arith.constant 0 : i32
    %c0_i32_0 = arith.constant 0 : i32
    %c0_i32_1 = arith.constant 0 : i32
    return %c0_i32, %c0_i32_0 : i32, i32
  }
  func.func @transform_9(%arg0: i32) -> (i32, i32) {
    %c0_i32 = arith.constant 0 : i32
    %c0_i32_0 = arith.constant 0 : i32
    %c0_i32_1 = arith.constant 0 : i32
    return %c0_i32, %c0_i32_0 : i32, i32
  }
  func.func @transform_10(%arg0: i32) -> (i32, i32) {
    %c0_i32 = arith.constant 0 : i32
    %c0_i32_0 = arith.constant 0 : i32
    %c0_i32_1 = arith.constant 0 : i32
    return %c0_i32, %c0_i32_0 : i32, i32
  }
  func.func @transform_11(%arg0: i32) -> (i32, i32) {
    %c0_i32 = arith.constant 0 : i32
    %c0_i32_0 = arith.constant 0 : i32
    %c0_i32_1 = arith.constant 0 : i32
    return %c0_i32, %c0_i32_0 : i32, i32
  }
  func.func @transform_12(%arg0: i32) -> (i32, i32) {
    %c0_i32 = arith.constant 0 : i32
    %c0_i32_0 = arith.constant 0 : i32
    %c0_i32_1 = arith.constant 0 : i32
    return %c0_i32, %c0_i32_0 : i32, i32
  }
  func.func @transform_13(%arg0: i32) -> (i32, i32) {
    %c0_i32 = arith.constant 0 : i32
    %c0_i32_0 = arith.constant 0 : i32
    %c0_i32_1 = arith.constant 0 : i32
    return %c0_i32, %c0_i32_0 : i32, i32
  }
  func.func @transform_14(%arg0: i32) -> (i32, i32) {
    %c0_i32 = arith.constant 0 : i32
    %c0_i32_0 = arith.constant 0 : i32
    %c0_i32_1 = arith.constant 0 : i32
    return %c0_i32, %c0_i32_0 : i32, i32
  }
  func.func @transform_15(%arg0: i32) -> (i32, i32) {
    %c0_i32 = arith.constant 0 : i32
    %c0_i32_0 = arith.constant 0 : i32
    %c0_i32_1 = arith.constant 0 : i32
    return %c0_i32, %c0_i32_0 : i32, i32
  }
  func.func @transform_16(%arg0: i32) -> (i32, i32) {
    %c0_i32 = arith.constant 0 : i32
    %c0_i32_0 = arith.constant 0 : i32
    %c0_i32_1 = arith.constant 0 : i32
    return %c0_i32, %c0_i32_0 : i32, i32
  }
  func.func @transform_17(%arg0: i32) -> (i32, i32) {
    %c0_i32 = arith.constant 0 : i32
    %c0_i32_0 = arith.constant 0 : i32
    %c0_i32_1 = arith.constant 0 : i32
    return %c0_i32, %c0_i32_0 : i32, i32
  }
  func.func @transform_18(%arg0: i32) -> (i32, i32) {
    %c0_i32 = arith.constant 0 : i32
    %c0_i32_0 = arith.constant 0 : i32
    %c0_i32_1 = arith.constant 0 : i32
    return %c0_i32, %c0_i32_0 : i32, i32
  }
  func.func @transform_19(%arg0: i32) -> (i32, i32) {
    %c0_i32 = arith.constant 0 : i32
    %c0_i32_0 = arith.constant 0 : i32
    %c0_i32_1 = arith.constant 0 : i32
    return %c0_i32, %c0_i32_0 : i32, i32
  }
  func.func @transform_20(%arg0: i32) -> (i32, i32) {
    %c0_i32 = arith.constant 0 : i32
    %c0_i32_0 = arith.constant 0 : i32
    %c0_i32_1 = arith.constant 0 : i32
    return %c0_i32, %c0_i32_0 : i32, i32
  }
  func.func @transform_21(%arg0: i32) -> (i32, i32) {
    %c0_i32 = arith.constant 0 : i32
    %c0_i32_0 = arith.constant 0 : i32
    %c0_i32_1 = arith.constant 0 : i32
    return %c0_i32, %c0_i32_0 : i32, i32
  }
  func.func @transform_22(%arg0: i32) -> (i32, i32) {
    %c0_i32 = arith.constant 0 : i32
    %c0_i32_0 = arith.constant 0 : i32
    %c0_i32_1 = arith.constant 0 : i32
    return %c0_i32, %c0_i32_0 : i32, i32
  }
  func.func @transform_23(%arg0: i32) -> (i32, i32) {
    %c0_i32 = arith.constant 0 : i32
    %c0_i32_0 = arith.constant 0 : i32
    %c0_i32_1 = arith.constant 0 : i32
    return %c0_i32, %c0_i32_0 : i32, i32
  }
  func.func @transform_24(%arg0: i32) -> (i32, i32) {
    %c0_i32 = arith.constant 0 : i32
    %c0_i32_0 = arith.constant 0 : i32
    %c0_i32_1 = arith.constant 0 : i32
    return %c0_i32, %c0_i32_0 : i32, i32
  }
  func.func @transform_25(%arg0: i32) -> (i32, i32, i32) {
    %c0_i32 = arith.constant 0 : i32
    %c0_i32_0 = arith.constant 0 : i32
    %c0_i32_1 = arith.constant 0 : i32
    return %arg0, %c0_i32, %c0_i32_0 : i32, i32, i32
  }
}

</mosaic_0001>

<bundles_post_ra>
// kernel: effinet_forward.1
= control target key start
LH: loop header
LB: loop body
LE: loop exit
PB: predicated region body
PF: predicated region fallthrough
CT: control target
= control target key end

     0   :  { %s5485_s0 = inlined_call_operand.vmem [shape: f32[2,9,9,4], index: 0, kind: input, shape index: {}]   ;;  %s5486_s1 = inlined_call_operand.vmem [shape: f32[9,16], index: 1, kind: input, shape index: {}]   ;;  %s5487_s2 = inlined_call_operand.vmem [shape: f32[1,16], index: 2, kind: input, shape index: {}]   ;;  %s5488_s3 = inlined_call_operand.vmem [shape: bf16[16,64], index: 3, kind: input, shape index: {}]   ;;  %s5489_s4 = inlined_call_operand.vmem [shape: f32[1,64], index: 4, kind: input, shape index: {}]   ;;  %s5490_s5 = inlined_call_operand.vmem [shape: f32[9,64], index: 5, kind: input, shape index: {}]   ;;  %s5491_s6 = inlined_call_operand.vmem [shape: f32[1,64], index: 6, kind: input, shape index: {}]   ;;  %s5492_s7 = inlined_call_operand.vmem [shape: f32[64,8], index: 7, kind: input, shape index: {}]   ;;  %s5493_s8 = inlined_call_operand.vmem [shape: f32[1,8], index: 8, kind: input, shape index: {}]   ;;  %s5494_s9 = inlined_call_operand.vmem [shape: f32[64,8], index: 9, kind: input, shape index: {}]   ;;  %s5495_s10 = inlined_call_operand.vmem [shape: f32[64,1], index: 10, kind: input, shape index: {}]   ;;  %s5496_s11 = inlined_call_operand.vmem [shape: bf16[64,24], index: 11, kind: input, shape index: {}]   ;;  %s5497_s12 = inlined_call_operand.vmem [shape: f32[1,24], index: 12, kind: input, shape index: {}]   ;;  %s5498_s13 = inlined_call_operand.vmem [shape: bf16[24,96], index: 13, kind: input, shape index: {}]   ;;  %s5499_s14 = inlined_call_operand.vmem [shape: f32[1,96], index: 14, kind: input, shape index: {}]   ;;  %s5500_s15 = inlined_call_operand.vmem [shape: f32[9,96], index: 15, kind: input, shape index: {}]   ;;  %s5501_s16 = inlined_call_operand.vmem [shape: f32[1,96], index: 16, kind: input, shape index: {}]   ;;  %s5502_s17 = inlined_call_operand.vmem [shape: f32[96,8], index: 17, kind: input, shape index: {}]   ;;  %s5503_s18 = inlined_call_operand.vmem [shape: f32[1,8], index: 18, kind: input, shape index: {}]   ;;  %s5504_s19 = inlined_call_operand.vmem [shape: f32[96,8], index: 19, kind: input, shape index: {}]   ;;  %s5505_s20 = inlined_call_operand.vmem [shape: f32[96,1], index: 20, kind: input, shape index: {}]   ;;  %s5506_s21 = inlined_call_operand.vmem [shape: bf16[96,24], index: 21, kind: input, shape index: {}]   ;;  %s5507_s22 = inlined_call_operand.vmem [shape: f32[1,24], index: 22, kind: input, shape index: {}]   ;;  %s5508_s23 = inlined_call_operand.vmem [shape: bf16[24,32], index: 23, kind: input, shape index: {}]   ;;  %s5509_s24 = inlined_call_operand.vmem [shape: f32[1,32], index: 24, kind: input, shape index: {}]   ;;  %s5510_s25 = inlined_call_operand.hbm [shape: f32[2,8,32], index: 25, kind: output, shape index: {}]  }
   0x1   :  { %5532 = sst [smem:[#allocation18_spill]] %s5485_s0 }
   0x2   :  { %5533 = sst [smem:[#allocation19_spill]] %s5486_s1 }
   0x3   :  { %5534 = sst [smem:[#allocation20_spill]] %s5487_s2 }
   0x4   :  { %5535 = sst [smem:[#allocation21_spill]] %s5488_s3 }
   0x5   :  { %5536 = sst [smem:[#allocation22_spill]] %s5489_s4 }
   0x6   :  { %5537 = sst [smem:[#allocation23_spill]] %s5490_s5 }
   0x7   :  { %5538 = sst [smem:[#allocation24_spill]] %s5491_s6 }
   0x8   :  { %5539 = sst [smem:[#allocation25_spill]] %s5492_s7 }
   0x9   :  { %5540 = sst [smem:[#allocation26_spill]] %s5493_s8 }
   0xa   :  { %5541 = sst [smem:[#allocation27_spill]] %s5494_s9 }
   0xb   :  { %5542 = sst [smem:[#allocation28_spill]] %s5495_s10 }
   0xc   :  { %5543 = sst [smem:[#allocation29_spill]] %s5496_s11 }
   0xd   :  { %5544 = sst [smem:[#allocation30_spill]] %s5497_s12 }
   0xe   :  { %5545 = sst [smem:[#allocation31_spill]] %s5498_s13 }
   0xf   :  { %30 = vsyncpa [#allocation5], 0 }
  0x10   :  { %32 = vsyncpa [#allocation5 + $0x1], 0  ;;  %s4105_s29 = smov 0   ;;  %s4107_s2 = smov 0  }
  0x11   :  { %s4109_s6 = smov 0   ;;  %s4111_s30 = smov 0  }
  0x12 LB: > { %5546 = sst [smem:[#allocation7_spill]] %s3962_s6  ;;  %s4126_s7 = sadd.s32 4294967295, %s3966_s30   ;;  %s3966_s30 = sphi %s4111_s30, %s5587_s30   ;;  %s3962_s6 = sphi %s4109_s6, %s5589_s6   ;;  %s3958_s2 = sphi %s4107_s2, %s5591_s2   ;;  %s3954_s29 = sphi %s4105_s29, %s5590_s29  }
  0x13   : > { %s3419_s3 = sadd.s32 4294967294, %s3966_s30   ;;  %s4130_s26 = sadd.s32 1, %s3966_s30  }
  0x14   : > { %5547 = sst [smem:[#allocation8_spill]] %s4130_s26  ;;  %s575_s1 = sadd.s32 1, %s3962_s6 }
  0x15   : > { %s572_s8 = ssub.s32 %s3966_s30, %s4130_s26  ;;  %p585_p0 = scmp.ne.s32.totalorder %s3962_s6, %s3958_s2 }
  0x16   : > { %p573_p1 = scmp.eq.s32.totalorder %s572_s8, 0  ;;  %p586_p2 = scmp.eq.s32.totalorder %s4126_s7, 1 }
  0x17   : > { %p591_p3 = scmp.ne.s32.totalorder %s3958_s2, %s3954_s29  ;;  %p592_p4 = scmp.eq.s32.totalorder %s3419_s3, 1 }
  0x18   : > { %s4141_s27 = scalar_select %p573_p1, %s3962_s6, %s575_s1  }
  0x19   : > { %p4143_p5 = por %p586_p2, %p585_p0  ;;  %p4147_p6 = por %p592_p4, %p591_p3 }
  0x1a   : > { %5548 = sst [smem:[#allocation9_spill]] %s4141_s27  ;;  %p3422_p7 = scmp.ge.s32.totalorder %s3966_s30, 1 }
  0x1b   : > { %s5550_s28 = scalar_select %p4147_p6, 1, 0 }
  0x1c   : > { %p690_p8 = scmp.lt.s32.totalorder %s3966_s30, 3 }
  0x1d   : > { %5551 = sst [smem:[#allocation10_spill]] %s5550_s28 }
  0x1e   : > { %p691_p9 = pnand %p3422_p7, %p690_p8 }
  0x20   : > { %694 = sbr.rel (%p691_p9) target bundleno = 2677 (0xa75), region = 120 }
  0x25   : > { %p758_p10 = scmp.lt.s32.totalorder %s4126_s7, 1  ;;  %v3968_v0 = vmov 1   ;;  %v3969_v1 = vmov 0   ;;  %s5552_s1 = sld [smem:[#allocation18_spill]]  ;;  %v3970_v13 = vmov 2   ;;  %v3971_v14 = vmov 3  }
  0x26   : > { %3737 = vset.pattern.permute.xlu0 %v3968_v0  ;;  %3736 = vset.pattern.permute.xlu1 %v3969_v1  ;;  %s5553_s0 = sld [smem:[#allocation21_spill]]  ;;  %v824_v29 = vlaneseq  ;;  %vm972_vm0 = vcmask 1046528   ;;  %vm1429_vm1 = vcmask 130048   ;;  %vm1547_vm2 = vcmask 523264   ;;  %s3464_s6 = sshll.u32 %s4126_s7, 7 }
  0x27   : > { %s759_s9 = scalar_select %p758_p10, %s4126_s7, 1  ;;  %vm1555_vm3 = vcmask 516096   ;;  %vm1549_vm4 = vcmask 517120   ;;  %vm3973_vm5 = vmmov 0   ;;  %vm2020_vm6 = vcmask 64512  }
  0x28   : > { %v825_v32 = vshrl.u32 %v824_v29, 7  ;;  %s5562_s28 = sld [smem:[#allocation23_spill]]  ;;  %vm2285_vm7 = vcmask 1043456   ;;  %vm2272_vm8 = vcmask 195584   ;;  %vm2394_vm9 = vcmask 785408  }
  0x29   : > { %s3690_s5 = smul.u32 144, %s759_s9  ;;  %s5561_s9 = sld [smem:[#allocation25_spill]]  ;;  %vm2402_vm10 = vcmask 778240   ;;  %vm2396_vm11 = vcmask 779264   ;;  %vm3327_vm12 = vcmask 261120  }
  0x2a   : > { %v4213_v34 = vsub.s32 1, %v825_v32  ;;  %v4218_v36 = vsub.s32 0, %v825_v32  ;;  %v4239_v45 = vsub.s32 2, %v825_v32  ;;  %v4258_v56 = vsub.s32 3, %v825_v32  ;;  %s5565_s3 = sld [smem:[#allocation24_spill]] }
  0x2b   : > { %s4160_s8 = scalar_lea.vmem %s5552_s1, %s3690_s5  ;;  %v4260_v57 = vsub.s32 5, %v825_v32  ;;  %v4264_v61 = vsub.s32 4, %v825_v32  ;;  %s5557_s1 = sld [smem:[#allocation20_spill]] }
  0x2c   : > { %v765_v2 = vld [vmem:[%s4160_s8 + $0x8] sm:$0x1]  ;;  %v764_v3 = vld [vmem:[%s4160_s8] sm:$0xff]  ;;  %v767_v4 = vld [vmem:[%s4160_s8 + $0x18] sm:$0x1]  ;;  %s5566_s26 = sld [smem:[#allocation26_spill]] }
  0x2d   : > { %898 = vperm.xlu1 %3736, %v765_v2   ;;  %845 = vperm.xlu0 %3737, %v764_v3   ;;  %v4166_v5 = vld [vmem:[%s4160_s8 + $0x40] sm:$0xff]  ;;  %v770_v6 = vld [vmem:[%s4160_s8 + $0x30] sm:$0xff]  ;;  %v769_v9 = vld [vmem:[%s4160_s8 + $0x28] sm:$0x1]  ;;  %s5567_s27 = sld [smem:[#allocation27_spill]] }
  0x2e   : > { %v766_v7 = vld [vmem:[%s4160_s8 + $0x10] sm:$0xff]  ;;  %v768_v8 = vld [vmem:[%s4160_s8 + $0x20] sm:$0xff]  ;;  %v771_v10 = vld [vmem:[%s4160_s8 + $0x38] sm:$0x1]  ;;  %s5568_s10 = sld [smem:[#allocation28_spill]] }
  0x2f   : > { %v775_v11 = vld [vmem:[%s4160_s8 + $0x58] sm:$0x1]  ;;  %v778_v15 = vld [vmem:[%s4160_s8 + $0x70] sm:$0xff]  ;;  %v773_v17 = vld [vmem:[%s4160_s8 + $0x48] sm:$0x1]  ;;  %s5569_s11 = sld [smem:[#allocation29_spill]] }
  0x30   : > { %v779_v12 = vld [vmem:[%s4160_s8 + $0x78] sm:$0x1]  ;;  %v774_v16 = vld [vmem:[%s4160_s8 + $0x50] sm:$0xff]  ;;  %v776_v18 = vld [vmem:[%s4160_s8 + $0x60] sm:$0xff]  ;;  %s5570_s13 = sld [smem:[#allocation31_spill]] }
  0x31   : > { %903 = vperm.xlu1 %3736, %v767_v4   ;;  %861 = vperm.xlu0 %3737, %v4166_v5   ;;  %v780_v19 = vld [vmem:[%s4160_s8 + $0x80] sm:$0xff]  ;;  %v777_v20 = vld [vmem:[%s4160_s8 + $0x68] sm:$0x1]  ;;  %s5571_s12 = sld [smem:[#allocation30_spill]] }
  0x32   : > { %v3761_v21 = vld [vmem:[%s5553_s0] sm:$0xff]   ;;  %v781_v26 = vld [vmem:[%s4160_s8 + $0x88] sm:$0x1]  ;;  %s5554_s8 = sld [smem:[#allocation19_spill]] }
  0x33   : > { %3572 = vmatprep.subr.bf16.mxu0 %v3761_v21  ;;  %s5560_s0 = sld [smem:[#allocation22_spill]] }
  0x34   : > { %3573 = vmatpush3.bf16.msra.mxu0 %v3761_v21 }
  0x35   : > { %801 = vperm.xlu1 %3736, %v770_v6   ;;  %3747 = vset.pattern.permute.xlu0 %v3969_v1 }
  0x36   : > { %786 = vperm.xlu0 %3747, %v764_v3  }
  0x38   : > { %v782_v37 = vld [vmem:[%s5554_s8] sm:$0xff] }
  0x39   : > { %3738 = vset.pattern.permute.xlu1 %v3968_v0  ;;  %v4226_v39 = vrot.slane %v782_v37, %v4213_v34  ;;  %v4233_v42 = vrot.slane %v782_v37, %v4218_v36  ;;  %v4248_v49 = vrot.slane %v782_v37, %v4239_v45 }
  0x3a   : > { %849 = vperm.xlu1 %3738, %v766_v7   ;;  %791 = vperm.xlu0 %3747, %v766_v7  }
  0x3e   : > { %3739 = vset.pattern.permute.xlu1 %v3969_v1  ;;  %796 = vperm.xlu0 %3747, %v768_v8  }
  0x3f   : > { %908 = vperm.xlu1 %3739, %v769_v9  }
  0x42   : > { %913 = vperm.xlu0 %3747, %v771_v10  }
  0x43   : > { %3740 = vset.pattern.permute.xlu1 %v3968_v0 }
  0x44   : > { %853 = vperm.xlu1 %3740, %v768_v8  }
  0x46   : > { %806 = vperm.xlu0 %3747, %v4166_v5  }
  0x48   : > { %857 = vperm.xlu1 %3740, %v770_v6  }
  0x4a   : > { %923 = vperm.xlu0 %3747, %v775_v11  }
  0x4c   : > { %3741 = vset.pattern.permute.xlu1 %v3970_v13 }
  0x4d   : > { %1018 = vperm.xlu1 %3741, %v766_v7  }
  0x4e   : > { %933 = vperm.xlu0 %3747, %v779_v12  }
  0x51   : > { %1022 = vperm.xlu1 %3741, %v768_v8  }
  0x52   : > { %3750 = vset.pattern.permute.xlu0 %v3970_v13 }
  0x53   : > { %1014 = vperm.xlu0 %3750, %v764_v3  }
  0x55   : > { %1118 = vperm.xlu1 %3741, %v765_v2  }
  0x57   : > { %1026 = vperm.xlu0 %3750, %v770_v6  }
  0x59   : > { %3742 = vset.pattern.permute.xlu1 %v3971_v14 }
  0x5a   : > { %1066 = vperm.xlu1 %3742, %v764_v3  }
  0x5b   : > { %1122 = vperm.xlu0 %3750, %v767_v4  }
  0x5e   : > { %3743 = vset.pattern.permute.xlu1 %v3970_v13 }
  0x5f   : > { %1126 = vperm.xlu1 %3743, %v769_v9   ;;  %1030 = vperm.xlu0 %3750, %v4166_v5  }
  0x63   : > { %1130 = vperm.xlu1 %3743, %v771_v10   ;;  %1042 = vperm.xlu0 %3750, %v778_v15   ;;  %v4281_v10 = vsub.s32 6, %v825_v32 }
  0x65   : > { %5555 = vst [vmem:[#allocation11_spill] sm:$0xff] %v4281_v10  ;;  %v4294_v21 = vrot.slane %v782_v37, %v4281_v10 }
  0x67   : > { %3744 = vset.pattern.permute.xlu1 %v3969_v1  ;;  %1138 = vperm.xlu0 %3750, %v775_v11  }
  0x68   : > { %811 = vperm.xlu1 %3744, %v774_v16  }
  0x6b   : > { %3753 = vset.pattern.permute.xlu0 %v3971_v14 }
  0x6c   : > { %918 = vperm.xlu1 %3744, %v773_v17   ;;  %1070 = vperm.xlu0 %3753, %v766_v7  }
  0x70   : > { %3745 = vset.pattern.permute.xlu1 %v3971_v14  ;;  %1078 = vperm.xlu0 %3753, %v770_v6  }
  0x71   : > { %1074 = vperm.xlu1 %3745, %v768_v8   ;;  %v4279_v8 = vrot.slane %v782_v37, %v4264_v61 }
  0x74   : > { %1086 = vperm.xlu0 %3753, %v774_v16  }
  0x75   : > { %3746 = vset.pattern.permute.xlu1 %v3969_v1 }
  0x76   : > { %816 = vperm.xlu1 %3746, %v776_v18  }
  0x78   : > { %1090 = vperm.xlu0 %3753, %v776_v18  }
  0x7a   : > { %821 = vperm.xlu1 %3746, %v778_v15  }
  0x7c   : > { %3757 = vset.pattern.permute.xlu0 %v3969_v1 }
  0x7d   : > { %1227 = vperm.xlu0 %3757, %v780_v19  }
  0x7e   : > { %3748 = vset.pattern.permute.xlu1 %v3968_v0 }
  0x7f   : > { %865 = vperm.xlu1 %3748, %v774_v16  }
  0x83   : > { %3749 = vset.pattern.permute.xlu1 %v3969_v1 }
  0x84   : > { %928 = vperm.xlu1 %3749, %v777_v20  }
  0x88   : > { %3751 = vset.pattern.permute.xlu1 %v3968_v0 }
  0x89   : > { %869 = vperm.xlu1 %3751, %v776_v18  }
  0x8d   : > { %873 = vperm.xlu1 %3751, %v778_v15  }
  0x91   : > { %3752 = vset.pattern.permute.xlu1 %v3970_v13 }
  0x92   : > { %1034 = vperm.xlu1 %3752, %v774_v16  }
  0x96   : > { %1038 = vperm.xlu1 %3752, %v776_v18   ;;  %v4289_v18 = vsub.s32 7, %v825_v32 }
  0x98   : > { %5556 = vst [vmem:[#allocation12_spill] sm:$0xff] %v4289_v18 }
  0x9a   : > { %1134 = vperm.xlu1 %3752, %v773_v17   ;;  %v4287_v17 = vld [vmem:[%s5554_s8 + $0x8] ss:$0 sm:$0xff] }
  0x9e   : > { %3754 = vset.pattern.permute.xlu1 %v3971_v14 }
  0x9f   : > { %1082 = vperm.xlu1 %3754, %v4166_v5  }
  0xa3   : > { %3755 = vset.pattern.permute.xlu1 %v3970_v13 }
  0xa4   : > { %1142 = vperm.xlu1 %3755, %v777_v20  }
  0xa8   : > { %v899_v22 = vpop.permute.xlu1 %898  ;;  %1146 = vperm.xlu1 %3755, %v779_v12   ;;  %v846_v23 = vpop.permute.xlu0 %845 }
  0xa9   : > { %v941_v53 = vmul.f32 %v4248_v49, %v899_v22  ;;  %v880_v54 = vmul.f32 %v4226_v39, %v846_v23 }
  0xab   : > { %v974_v62 = vrot.slane %v941_v53, 1  ;;  %v4310_v53 = vrot.slane %v782_v37, %v4289_v18 }
  0xac   : > { %v4198_v24 = vpop.permute.xlu1 %903  ;;  %3756 = vset.pattern.permute.xlu1 %v3971_v14  ;;  %v4200_v25 = vpop.permute.xlu0 %861 }
  0xad   : > { %1094 = vperm.xlu1 %3756, %v778_v15   ;;  %v884_v41 = vmul.f32 %v4226_v39, %v4200_v25  ;;  %v943_v20 = vmul.f32 %v4248_v49, %v4198_v24  ;;  %v1284_v23 = vmul.f32 %v4287_v17, %v4198_v24 }
  0xb0   : > { %v4203_v27 = vpop.permute.xlu1 %801 }
  0xb1   : > { %3758 = vset.pattern.permute.xlu1 %v3969_v1  ;;  %v787_v28 = vpop.permute.xlu0 %786  ;;  %v946_v32 = vmul.f32 %v4248_v49, %v4203_v27 }
  0xb2   : > { %1276 = vperm.xlu1 %3758, %v781_v26   ;;  %v940_v51 = vmul.f32 %v4248_v49, %v787_v28  ;;  %v828_v55 = vmul.f32 %v4233_v42, %v787_v28 }
  0xb4   : > { %v973_v59 = vrot.slane %v940_v51, 1  ;;  %v888_v63 = vadd.f32 %v880_v54, %v828_v55  ;;  %v977_v55 = vrot.slane %v943_v20, 1 }
  0xb5   : > { %v4206_v30 = vpop.permute.xlu1 %849  ;;  %v4208_v31 = vpop.permute.xlu0 %791 }
  0xb6   : > { %3759 = vset.pattern.permute.xlu1 %v3968_v0  ;;  %v4267_v0 = vrot.slane %v782_v37, %v4258_v56  ;;  %v975_v3 = vsel %vm972_vm0, %v973_v59, %v974_v62  ;;  %v942_v22 = vmul.f32 %v4248_v49, %v4208_v31  ;;  %v881_v24 = vmul.f32 %v4226_v39, %v4206_v30 }
  0xb7   : > { %1251 = vperm.xlu1 %3759, %v780_v19   ;;  %v1005_v9 = vadd.f32 %v975_v3, %v888_v63  ;;  %v829_v54 = vmul.f32 %v4233_v42, %v4208_v31  ;;  %v1316_v62 = vrot.slane %v1284_v23, 1 }
  0xb8   : > { %v976_v59 = vrot.slane %v942_v22, 1 }
  0xb9   : > { %v4211_v33 = vpop.permute.xlu0 %796 }
  0xba   : > { %v4215_v35 = vpop.permute.xlu1 %908  ;;  %v944_v63 = vmul.f32 %v4248_v49, %v4211_v33  ;;  %v978_v22 = vsel %vm972_vm0, %v976_v59, %v977_v55 }
  0xbb   : > { %3760 = vset.pattern.permute.xlu1 %v3969_v1  ;;  %v4270_v1 = vrot.slane %v782_v37, %v4260_v57 }
  0xbc   : > { %v979_v23 = vrot.slane %v944_v63, 1 }
  0xbd   : > { %v4223_v38 = vpop.permute.xlu0 %913 }
  0xbf   : > { %v4228_v40 = vpop.permute.xlu1 %853 }
  0xc0   : > { %v882_v20 = vmul.f32 %v4226_v39, %v4228_v40 }
  0xc1   : > { %v4235_v43 = vpop.permute.xlu0 %806 }
  0xc2   : > { %v832_v44 = vmul.f32 %v4233_v42, %v4235_v43 }
  0xc3   : > { %v4241_v46 = vpop.permute.xlu1 %857 }
  0xc4   : > { %v4243_v47 = vadd.f32 %v884_v41, %v832_v44  ;;  %v1234_v41 = vmul.f32 %v4294_v21, %v4208_v31  ;;  %v1283_v44 = vmul.f32 %v4287_v17, %v4208_v31  ;;  %v883_v37 = vmul.f32 %v4226_v39, %v4241_v46 }
  0xc5   : > { %v4245_v48 = vpop.permute.xlu0 %923 }
  0xc6   : > { %v1315_v31 = vrot.slane %v1283_v44, 1 }
  0xc8   : > { %v4250_v50 = vpop.permute.xlu1 %1018 }
  0xc9   : > { %v4253_v52 = vpop.permute.xlu0 %933  ;;  %v1050_v63 = vmul.f32 %v4267_v0, %v4250_v50 }
  0xcc   : > { %v4262_v58 = vpop.permute.xlu1 %1022 }
  0xce   : > { %v1015_v60 = vpop.permute.xlu0 %1014 }
  0xcf   : > { %v1049_v4 = vmul.f32 %v4267_v0, %v1015_v60  ;;  %v1153_v5 = vmul.f32 %v4270_v1, %v1015_v60  ;;  %v947_v60 = vmul.f32 %v4248_v49, %v4223_v38 }
  0xd0   : > { %v1119_v2 = vpop.permute.xlu1 %1118 }
  0xd1   : > { %v1154_v6 = vmul.f32 %v4270_v1, %v1119_v2  ;;  %v1057_v12 = vadd.f32 %v1049_v4, %v1005_v9  ;;  %v1185_v13 = vrot.slane %v1153_v5, 1  ;;  %v945_v2 = vmul.f32 %v4248_v49, %v4215_v35 }
  0xd2   : > { %v4276_v7 = vpop.permute.xlu0 %1026  ;;  %v982_v5 = vrot.slane %v946_v32, 1 }
  0xd3   : > { %v1186_v14 = vrot.slane %v1154_v6, 1  ;;  %v831_v6 = vmul.f32 %v4233_v42, %v4203_v27 }
  0xd5   : > { %v1067_v11 = vpop.permute.xlu1 %1066  ;;  %v1187_v26 = vsel %vm972_vm0, %v1185_v13, %v1186_v14  ;;  %v4336_v13 = vmul.f32 %v4287_v17, %v4215_v35  ;;  %v889_v14 = vadd.f32 %v881_v24, %v829_v54  ;;  %v891_v32 = vadd.f32 %v883_v37, %v831_v6 }
  0xd6   : > { %v1101_v15 = vmul.f32 %v4279_v8, %v1067_v11  ;;  %v1123_v16 = vpop.permute.xlu0 %1122  ;;  %v1258_v11 = vmul.f32 %v4310_v53, %v4206_v30  ;;  %v980_v30 = vrot.slane %v945_v2, 1  ;;  %v1235_v35 = vmul.f32 %v4294_v21, %v4211_v33 }
  0xd7   : > { %v1317_v54 = vsel %vm972_vm0, %v1315_v31, %v1316_v62  ;;  %v4359_v2 = vmul.f32 %v4287_v17, %v4223_v38 }
  0xd8   : > { %v1109_v19 = vadd.f32 %v1101_v15, %v1057_v12  ;;  %v4332_v12 = vmul.f32 %v4287_v17, %v4211_v33  ;;  %v983_v15 = vrot.slane %v947_v60, 1  ;;  %v1006_v60 = vadd.f32 %v978_v22, %v889_v14 }
  0xd9   : > { %v981_v62 = vsel %vm972_vm0, %v979_v23, %v980_v30  ;;  %v4376_v23 = vld [vmem:[%s5557_s1] ss:$0 sm:$0xff] }
  0xda   : > { %v1127_v28 = vpop.permute.xlu1 %1126  ;;  %v4301_v29 = vpop.permute.xlu0 %1030  ;;  %v1217_v51 = vadd.f32 %v1187_v26, %v1109_v19  ;;  %v830_v19 = vmul.f32 %v4233_v42, %v4211_v33  ;;  %v948_v26 = vmul.f32 %v4248_v49, %v4235_v43  ;;  %v984_v37 = vsel %vm972_vm0, %v982_v5, %v983_v15 }
  0xdb   : > { %v1008_v31 = vadd.f32 %v984_v37, %v891_v32  ;;  %v1058_v55 = vadd.f32 %v1050_v63, %v1006_v60 }
  0xdc   : > { %v1242_v9 = vadd.f32 %v1234_v41, %v1217_v51  ;;  %v1156_v51 = vmul.f32 %v4270_v1, %v1123_v16  ;;  %v890_v33 = vadd.f32 %v882_v20, %v830_v19  ;;  %v1155_v16 = vmul.f32 %v4270_v1, %v4250_v50 }
  0xdd   : > { %v985_v6 = vrot.slane %v948_v26, 1  ;;  %v1158_v50 = vmul.f32 %v4270_v1, %v1127_v28  ;;  %v1051_v26 = vmul.f32 %v4267_v0, %v4262_v58  ;;  %v1157_v28 = vmul.f32 %v4270_v1, %v4262_v58 }
  0xde   : > { %v1131_v3 = vpop.permute.xlu1 %1130  ;;  %v4324_v4 = vpop.permute.xlu0 %1042  ;;  %v1266_v44 = vadd.f32 %v1258_v11, %v1242_v9  ;;  %v1052_v9 = vmul.f32 %v4267_v0, %v4276_v7  ;;  %v1159_v11 = vmul.f32 %v4270_v1, %v4276_v7  ;;  %v1189_v14 = vrot.slane %v1156_v51, 1 }
  0xdf   : > { %v1160_v38 = vmul.f32 %v4270_v1, %v1131_v3  ;;  %v1289_v7 = vmul.f32 %v4287_v17, %v4235_v43  ;;  %v1188_v30 = vrot.slane %v1155_v16, 1  ;;  %v1007_v3 = vadd.f32 %v981_v62, %v890_v33 }
  0xe0   : > { %v1347_v20 = vadd.f32 %v1317_v54, %v1266_v44  ;;  %v1060_v32 = vadd.f32 %v1052_v9, %v1008_v31  ;;  %v1194_v54 = vrot.slane %v1159_v11, 1  ;;  %v1192_v59 = vrot.slane %v1158_v50, 1 }
  0xe1   : > { %v1195_v60 = vrot.slane %v1160_v38, 1  ;;  %v1190_v63 = vsel %vm972_vm0, %v1188_v30, %v1189_v14  ;;  %v1059_v10 = vadd.f32 %v1051_v26, %v1007_v3  ;;  %v1259_v9 = vmul.f32 %v4310_v53, %v4228_v40 }
  0xe2   : > { %v4345_v41 = vpop.permute.xlu0 %1138  ;;  %v1191_v11 = vrot.slane %v1157_v28, 1  ;;  %v1236_v40 = vmul.f32 %v4294_v21, %v4203_v27  ;;  %v5558_v28 = vrot.slane %v4336_v13, 1 }
  0xe3   : > { %v4350_v24 = vpop.permute.xlu1 %811 }
  0xe7   : > { %v919_v22 = vpop.permute.xlu1 %918  ;;  %v1071_v19 = vpop.permute.xlu0 %1070 }
  0xe8   : > { %v949_v5 = vmul.f32 %v4248_v49, %v919_v22  ;;  %v1102_v15 = vmul.f32 %v4279_v8, %v1071_v19  ;;  %v4386_v19 = vadd.f32 %v4376_v23, %v1347_v20  ;;  %v1290_v58 = vmul.f32 %v4287_v17, %v919_v22 }
  0xe9   : > { %v1196_v20 = vsel %vm972_vm0, %v1194_v54, %v1195_v60 }
  0xea   : > { %v986_v44 = vrot.slane %v949_v5, 1  ;;  %v1110_v51 = vadd.f32 %v1102_v15, %v1058_v55  ;;  %v1370_v5 = vmul.f32 0.5, %v4386_v19  ;;  %v1193_v15 = vsel %vm972_vm0, %v1191_v11, %v1192_v59 }
  0xeb   : > { %v1079_v37 = vpop.permute.xlu0 %1078  ;;  %v1325_v30 = vrot.slane %v1290_v58, 1 }
  0xec   : > { %v987_v33 = vsel %vm972_vm0, %v985_v6, %v986_v44  ;;  %v1218_v16 = vadd.f32 %v1190_v63, %v1110_v51  ;;  %v1104_v62 = vmul.f32 %v4279_v8, %v1079_v37  ;;  %v1075_v18 = vpop.permute.xlu1 %1074  ;;  %v1287_v6 = vmul.f32 %v4287_v17, %v4203_v27 }
  0xed   : > { %v1103_v55 = vmul.f32 %v4279_v8, %v1075_v18  ;;  %v4393_v31 = vadd.f32 %v987_v33, %v4243_v47  ;;  %v1237_v18 = vmul.f32 %v4294_v21, %v4235_v43  ;;  %v1322_v44 = vrot.slane %v4359_v2, 1 }
  0xee   : > { %v1243_v14 = vadd.f32 %v1235_v35, %v1218_v16  ;;  %v1112_v38 = vadd.f32 %v1104_v62, %v1060_v32  ;;  %v1324_v35 = vrot.slane %v1289_v7, 1  ;;  %v5559_v32 = vrot.slane %v4332_v12, 1 }
  0xef   : > { %v1111_v50 = vadd.f32 %v1103_v55, %v1059_v10  ;;  %v1261_v10 = vmul.f32 %v4310_v53, %v4200_v25  ;;  %v1260_v27 = vmul.f32 %v4310_v53, %v4241_v46  ;;  %3766 = vtanh.f32 %v1370_v5 }
  0xf0   : > { %v1267_v22 = vadd.f32 %v1259_v9, %v1243_v14  ;;  %v1220_v47 = vadd.f32 %v1196_v20, %v1112_v38  ;;  %v1320_v43 = vsel %vm972_vm0, %v5559_v32, %v5558_v28  ;;  %v1321_v54 = vrot.slane %v1287_v6, 1 }
  0xf1   : > { %v1219_v3 = vadd.f32 %v1193_v15, %v1111_v50  ;;  %v4406_v26 = vpop.permute.xlu1 %816  ;;  %v1326_v63 = vsel %vm972_vm0, %v1324_v35, %v1325_v30  ;;  %v951_v6 = vmul.f32 %v4248_v49, %v4245_v48  ;;  %v950_v20 = vmul.f32 %v4248_v49, %v4350_v24 }
  0xf2   : > { %v1245_v59 = vadd.f32 %v1237_v18, %v1220_v47  ;;  %v1348_v51 = vadd.f32 %v1320_v43, %v1267_v22  ;;  %v1323_v13 = vsel %vm972_vm0, %v1321_v54, %v1322_v44  ;;  %v955_v22 = vmul.f32 %v4248_v49, %v4253_v52 }
  0xf3   : > { %v1244_v7 = vadd.f32 %v1236_v40, %v1219_v3  ;;  %v989_v35 = vrot.slane %v951_v6, 1  ;;  %v988_v30 = vrot.slane %v950_v20, 1 }
  0xf4   : > { %v1269_v60 = vadd.f32 %v1261_v10, %v1245_v59  ;;  %v1363_v12 = vadd.f32 %v4376_v23, %v1348_v51  ;;  %v833_v10 = vmul.f32 %v4233_v42, %v4350_v24  ;;  %v1056_v51 = vmul.f32 %v4267_v0, %v4324_v4 }
  0xf5   : > { %v1268_v25 = vadd.f32 %v1260_v27, %v1244_v7  ;;  %v4419_v37 = vpop.permute.xlu1 %821  ;;  %v995_v7 = vrot.slane %v955_v22, 1 }
  0xf6   : > { %v1350_v33 = vadd.f32 %v1326_v63, %v1269_v60  ;;  %v1371_v16 = vmul.f32 0.5, %v1363_v12  ;;  %v954_v50 = vmul.f32 %v4248_v49, %v4419_v37  ;;  %v835_v43 = vmul.f32 %v4233_v42, %v4419_v37  ;;  %v1087_v60 = vpop.permute.xlu0 %1086 }
  0xf7   : > { %v1349_v2 = vadd.f32 %v1323_v13, %v1268_v25 }
  0xf8   : > { %v1365_v62 = vadd.f32 %v4376_v23, %v1350_v33  ;;  %3768 = vtanh.f32 %v1371_v16  ;;  %v994_v3 = vrot.slane %v954_v50, 1  ;;  %v1164_v16 = vmul.f32 %v4270_v1, %v4345_v41 }
  0xf9   : > { %v1364_v46 = vadd.f32 %v4376_v23, %v1349_v2  ;;  %v1106_v50 = vmul.f32 %v4279_v8, %v1087_v60  ;;  %v952_v60 = vmul.f32 %v4248_v49, %v4406_v26 }
  0xfa   : > { %v4425_v58 = vpop.permute.xlu1 %865  ;;  %v1373_v55 = vmul.f32 0.5, %v1365_v62 }
  0xfb   : > { %v1372_v9 = vmul.f32 0.5, %v1364_v46  ;;  %v885_v47 = vmul.f32 %v4226_v39, %v4425_v58 }
  0xfc   : > { %3770 = vtanh.f32 %v1373_v55  ;;  %v3767_v14 = vpop.eup %3766  ;;  %v996_v55 = vsel %vm972_vm0, %v994_v3, %v995_v7 }
  0xfd   : > { %3772 = vtanh.f32 %v1372_v9  ;;  %v1386_v38 = vmul.f32 0.5, %v3767_v14  ;;  %v893_v54 = vadd.f32 %v885_v47, %v833_v10  ;;  %v990_v9 = vsel %vm972_vm0, %v988_v30, %v989_v35 }
  0xff   : > { %v929_v11 = vpop.permute.xlu1 %928  ;;  %v1394_v40 = vadd.f32 0.5, %v1386_v38  ;;  %v1010_v22 = vadd.f32 %v990_v9, %v893_v54 }
 0x100   : > { %v1294_v3 = vmul.f32 %v4287_v17, %v929_v11 }
 0x101   : > { %v1402_v13 = vmul.f32 %v1394_v40, %v4386_v19  ;;  %v1201_v40 = vrot.slane %v1164_v16, 1  ;;  %v1161_v16 = vmul.f32 %v4270_v1, %v4301_v29 }
 0x102   : > { %v1331_v7 = vrot.slane %v1294_v3, 1 }
 0x104   : > { %v870_v5 = vpop.permute.xlu1 %869 }
 0x105   : > { %v3769_v18 = vpop.eup %3768 }
 0x106   : > { %v1387_v15 = vmul.f32 0.5, %v3769_v18 }
 0x108   : > { %v4439_v28 = vpop.permute.xlu1 %873  ;;  %v1395_v59 = vadd.f32 0.5, %v1387_v15 }
 0x109   : > { %v3771_v32 = vpop.eup %3770  ;;  %v887_v44 = vmul.f32 %v4226_v39, %v4439_v28 }
 0x10a   : > { %v3773_v27 = vpop.eup %3772  ;;  %v1389_v63 = vmul.f32 0.5, %v3771_v32  ;;  %v1403_v33 = vmul.f32 %v1395_v59, %v1363_v12  ;;  %v1293_v59 = vmul.f32 %v4287_v17, %v4406_v26 }
 0x10b   : > { %v895_v25 = vadd.f32 %v887_v44, %v835_v43  ;;  %v1388_v2 = vmul.f32 0.5, %v3773_v27 }
 0x10c   : > { %v1397_v14 = vadd.f32 0.5, %v1389_v63  ;;  %v1410_v20 = vpack.c.bf16 %v1403_v33, %v1402_v13  ;;  %v1263_v63 = vmul.f32 %v4310_v53, %v870_v5  ;;  %v1053_v33 = vmul.f32 %v4267_v0, %v4301_v29 }
 0x10d   : > { %v1012_v38 = vadd.f32 %v996_v55, %v895_v25  ;;  %v1035_v6 = vpop.permute.xlu1 %1034  ;;  %v1396_v18 = vadd.f32 0.5, %v1388_v2  ;;  %v1330_v2 = vrot.slane %v1293_v59, 1  ;;  %v1291_v29 = vmul.f32 %v4287_v17, %v4350_v24 }
 0x10e   : > { %v1054_v47 = vmul.f32 %v4267_v0, %v1035_v6  ;;  %v1163_v19 = vmul.f32 %v4270_v1, %v1035_v6  ;;  %v1405_v12 = vmul.f32 %v1397_v14, %v1365_v62  ;;  %3574 = vmatprep.mubr.msk.bf16.mxu0 %vm1429_vm1, %v1410_v20  ;;  %v1239_v62 = vmul.f32 %v4294_v21, %v4406_v26 }
 0x10f   : > { %v1404_v41 = vmul.f32 %v1396_v18, %v1364_v46  ;;  %v4456_v15 = vadd.f32 %v1056_v51, %v1012_v38  ;;  %v953_v46 = vmul.f32 %v4248_v49, %v929_v11  ;;  %v886_v51 = vmul.f32 %v4226_v39, %v870_v5 }
 0x110   : > { %v1062_v35 = vadd.f32 %v1054_v47, %v1010_v22  ;;  %v1200_v30 = vrot.slane %v1163_v19, 1  ;;  %v834_v11 = vmul.f32 %v4233_v42, %v4406_v26  ;;  %v1332_v9 = vsel %vm972_vm0, %v1330_v2, %v1331_v7  ;;  %v1091_v47 = vpop.permute.xlu0 %1090 }
 0x111   : > { %v1039_v10 = vpop.permute.xlu1 %1038  ;;  %v1411_v32 = vpack.c.bf16 %v1405_v12, %v1404_v41  ;;  %v992_v39 = vrot.slane %v953_v46, 1  ;;  %v991_v14 = vrot.slane %v952_v60, 1  ;;  %v1292_v42 = vmul.f32 %v4287_v17, %v4245_v48 }
 0x112   : > { %v1202_v43 = vsel %vm972_vm0, %v1200_v30, %v1201_v40  ;;  %v1114_v44 = vadd.f32 %v1106_v50, %v1062_v35  ;;  %v894_v49 = vadd.f32 %v886_v51, %v834_v11  ;;  %v1055_v20 = vmul.f32 %v4267_v0, %v1039_v10 }
 0x113   : > { %3575 = vmatmul.mubr.msk.bf16.vlgmr.msra.gmra.mxu0 %vm1429_vm1, %v1411_v32  ;;  %v1061_v50 = vadd.f32 %v1053_v33, %v4393_v31  ;;  %v1197_v26 = vrot.slane %v1161_v16, 1  ;;  %v993_v22 = vsel %vm972_vm0, %v991_v14, %v992_v39  ;;  %v1165_v0 = vmul.f32 %v4270_v1, %v1039_v10 }
 0x114   : > { %v1222_v27 = vadd.f32 %v1202_v43, %v1114_v44  ;;  %v1011_v19 = vadd.f32 %v993_v22, %v894_v49  ;;  %v1238_v40 = vmul.f32 %v4294_v21, %v4350_v24  ;;  %v1107_v35 = vmul.f32 %v4279_v8, %v1091_v47 }
 0x115   : > { %v1135_v54 = vpop.permute.xlu1 %1134  ;;  %v1328_v32 = vrot.slane %v1292_v42, 1  ;;  %v1327_v43 = vrot.slane %v1291_v29, 1  ;;  %v1262_v59 = vmul.f32 %v4310_v53, %v4425_v58  ;;  %v1295_v46 = vmul.f32 %v4287_v17, %v4419_v37 }
 0x116   : > { %v1247_v25 = vadd.f32 %v1239_v62, %v1222_v27  ;;  %v1162_v13 = vmul.f32 %v4270_v1, %v1135_v54  ;;  %v1063_v48 = vadd.f32 %v1055_v20, %v1011_v19  ;;  %v1203_v27 = vrot.slane %v1165_v0, 1 }
 0x117   : > { %v1296_v60 = vmul.f32 %v4287_v17, %v4253_v52  ;;  %v1167_v11 = vmul.f32 %v4270_v1, %v4324_v4  ;;  %v1333_v16 = vrot.slane %v1295_v46, 1  ;;  %v1264_v39 = vmul.f32 %v4310_v53, %v4439_v28  ;;  %v1228_v4 = vpop.permute.xlu0 %1227 }
 0x118   : > { %v1271_v55 = vadd.f32 %v1263_v63, %v1247_v25  ;;  %v1198_v38 = vrot.slane %v1162_v13, 1  ;;  %v1115_v7 = vadd.f32 %v1107_v35, %v1063_v48  ;;  %v1329_v63 = vsel %vm972_vm0, %v1327_v43, %v1328_v32 }
 0x119   : > { %v1240_v13 = vmul.f32 %v4294_v21, %v4419_v37  ;;  %v1241_v22 = vmul.f32 %v4294_v21, %v1228_v4 }
 0x11a   : > { %v1352_v5 = vadd.f32 %v1332_v9, %v1271_v55  ;;  %v1083_v6 = vpop.permute.xlu1 %1082  ;;  %v1199_v31 = vsel %vm972_vm0, %v1197_v26, %v1198_v38  ;;  %v1334_v9 = vrot.slane %v1296_v60, 1  ;;  %v1297_v26 = vmul.f32 %v4287_v17, %v1228_v4  ;;  %v4603_v4 = vld [vmem:[%s5562_s28] sm:$0xff] }
 0x11b   : > { %v1105_v18 = vmul.f32 %v4279_v8, %v1083_v6  ;;  %v1206_v6 = vrot.slane %v1167_v11, 1 }
 0x11c   : > { %v4487_v41 = vadd.f32 %v4376_v23, %v1352_v5  ;;  %v1335_v20 = vsel %vm972_vm0, %v1333_v16, %v1334_v9  ;;  %v1336_v19 = vrot.slane %v1297_v26, 1 }
 0x11d   : > { %v1113_v12 = vadd.f32 %v1105_v18, %v1061_v50 }
 0x11e   : > { %v1375_v10 = vmul.f32 0.5, %v4487_v41 }
 0x11f   : > { %v1221_v30 = vadd.f32 %v1199_v31, %v1113_v12  ;;  %v1143_v3 = vpop.permute.xlu1 %1142 }
 0x120   : > { %v1166_v44 = vmul.f32 %v4270_v1, %v1143_v3  ;;  %3774 = vtanh.f32 %v1375_v10 }
 0x121   : > { %v1246_v62 = vadd.f32 %v1238_v40, %v1221_v30 }
 0x122   : > { %v1204_v24 = vrot.slane %v1166_v44, 1 }
 0x123   : > { %v1270_v51 = vadd.f32 %v1262_v59, %v1246_v62  ;;  %v1147_v54 = vpop.permute.xlu1 %1146 }
 0x124   : > { %v1205_v25 = vsel %vm972_vm0, %v1203_v27, %v1204_v24  ;;  %v1168_v58 = vmul.f32 %v4270_v1, %v1147_v54 }
 0x125   : > { %v1351_v33 = vadd.f32 %v1329_v63, %v1270_v51  ;;  %v1223_v2 = vadd.f32 %v1205_v25, %v1115_v7  ;;  %v3972_v25 = vmov 0.0  }
 0x126   : > { %v1207_v49 = vrot.slane %v1168_v58, 1  ;;  %1558 = vst.msk [vmem:[#allocation2 + $0x30] sm:$0x1] %vm1555_vm3, %v3972_v25  ;;  %1566 = vst.msk [vmem:[#allocation2 + $0x39] sm:$0x1] %vm1555_vm3, %v3972_v25  ;;  %3582 = vmatprep.subr.mxu1 %v3972_v25  ;;  %3598 = vmatprep.mubr.msk.f32.mxu1 %vm3973_vm5, %v3972_v25 }
 0x127   : > { %v1248_v52 = vadd.f32 %v1240_v13, %v1223_v2  ;;  %v1366_v55 = vadd.f32 %v4376_v23, %v1351_v33  ;;  %1548 = vst.msk [vmem:[#allocation2] sm:$0xff] %vm1547_vm2, %v3972_v25  ;;  %1552 = vst.msk [vmem:[#allocation2 + $0x90] sm:$0xff] %vm1547_vm2, %v3972_v25 }
 0x128   : > { %v1095_v14 = vpop.permute.xlu1 %1094  ;;  %v1208_v28 = vsel %vm972_vm0, %v1206_v6, %v1207_v49  ;;  %1556 = vst.msk [vmem:[#allocation2 + $0x10] sm:$0x1] %vm1555_vm3, %v3972_v25  ;;  %1557 = vst.msk [vmem:[#allocation2 + $0x20] sm:$0x1] %vm1555_vm3, %v3972_v25  ;;  %v1917_v6 = vld [vmem:[%s5561_s9 + $0x20] sm:$0xff] }
 0x129   : > { %v1272_v5 = vadd.f32 %v1264_v39, %v1248_v52  ;;  %v1108_v38 = vmul.f32 %v4279_v8, %v1095_v14  ;;  %v1374_v37 = vmul.f32 0.5, %v1366_v55  ;;  %1559 = vst.msk [vmem:[#allocation2 + $0x40] sm:$0x1] %vm1555_vm3, %v3972_v25  ;;  %1560 = vst.msk [vmem:[#allocation2 + $0x50] sm:$0x1] %vm1555_vm3, %v3972_v25 }
 0x12a   : > { %1561 = vst.msk [vmem:[#allocation2 + $0x60] sm:$0x1] %vm1555_vm3, %v3972_v25  ;;  %1562 = vst.msk [vmem:[#allocation2 + $0x70] sm:$0x1] %vm1555_vm3, %v3972_v25 }
 0x12b   : > { %v1353_v50 = vadd.f32 %v1335_v20, %v1272_v5  ;;  %v1116_v1 = vadd.f32 %v1108_v38, %v4456_v15  ;;  %3776 = vtanh.f32 %v1374_v37  ;;  %1563 = vst.msk [vmem:[#allocation2 + $0x80] sm:$0x1] %vm1555_vm3, %v3972_v25  ;;  %1564 = vst.msk [vmem:[#allocation2 + $0x19] sm:$0x1] %vm1555_vm3, %v3972_v25  ;;  %v1920_v5 = vld [vmem:[%s5561_s9 + $0x38] sm:$0xff]  ;;  %v1919_v38 = vld [vmem:[%s5561_s9 + $0x30] sm:$0xff] }
 0x12c   : > { %1565 = vst.msk [vmem:[#allocation2 + $0x29] sm:$0x1] %vm1555_vm3, %v3972_v25  ;;  %1567 = vst.msk [vmem:[#allocation2 + $0x49] sm:$0x1] %vm1555_vm3, %v3972_v25  ;;  %3583 = vmatpush3.msra.mxu1 %v1920_v5  ;;  %v1918_v37 = vld [vmem:[%s5561_s9 + $0x28] sm:$0xff]  ;;  %v1916_v20 = vld [vmem:[%s5561_s9 + $0x18] sm:$0xff] }
 0x12d   : > { %v1224_v18 = vadd.f32 %v1208_v28, %v1116_v1  ;;  %v1277_v42 = vpop.permute.xlu1 %1276  ;;  %v1368_v8 = vadd.f32 %v4376_v23, %v1353_v50  ;;  %v3775_v47 = vpop.eup %3774  ;;  %1568 = vst.msk [vmem:[#allocation2 + $0x59] sm:$0x1] %vm1555_vm3, %v3972_v25  ;;  %1569 = vst.msk [vmem:[#allocation2 + $0x69] sm:$0x1] %vm1555_vm3, %v3972_v25  ;;  %3584 = vmatprep.subr.mxu1 %v3972_v25  ;;  %v1915_v1 = vld [vmem:[%s5561_s9 + $0x10] sm:$0xff] }
 0x12e   : > { %v1298_v29 = vmul.f32 %v4287_v17, %v1277_v42  ;;  %v1391_v35 = vmul.f32 0.5, %v3775_v47  ;;  %1570 = vst.msk [vmem:[#allocation2 + $0x79] sm:$0x1] %vm1555_vm3, %v3972_v25  ;;  %1571 = vst.msk [vmem:[#allocation2 + $0x89] sm:$0x1] %vm1555_vm3, %v3972_v25  ;;  %3585 = vmatpush3.msra.mxu1 %v1919_v38  ;;  %v1914_v42 = vld [vmem:[%s5561_s9 + $0x8] sm:$0xff]  ;;  %v4615_v47 = vrot.slane %v4603_v4, %v4218_v36 }
 0x12f   : > { %v1249_v31 = vadd.f32 %v1241_v22, %v1224_v18  ;;  %v1376_v40 = vmul.f32 0.5, %v1368_v8  ;;  %1550 = vst.msk [vmem:[#allocation2 + $0x8] sm:$0x3] %vm1549_vm4, %v3972_v25  ;;  %1553 = vst.msk [vmem:[#allocation2 + $0x98] sm:$0x3] %vm1549_vm4, %v3972_v25  ;;  %3586 = vmatprep.subr.mxu1 %v3972_v25 }
 0x130   : > { %v1337_v12 = vrot.slane %v1298_v29, 1  ;;  %v1399_v43 = vadd.f32 0.5, %v1391_v35  ;;  %3587 = vmatpush3.msra.mxu1 %v1918_v37  ;;  %2405 = vst.msk [vmem:[#allocation3 + $0x30] sm:$0x1] %vm2402_vm10, %v3972_v25  ;;  %2413 = vst.msk [vmem:[#allocation3 + $0x39] sm:$0x1] %vm2402_vm10, %v3972_v25 }
 0x131   : > { %3778 = vtanh.f32 %v1376_v40  ;;  %3588 = vmatprep.subr.mxu1 %v3972_v25  ;;  %2395 = vst.msk [vmem:[#allocation3] sm:$0xff] %vm2394_vm9, %v3972_v25  ;;  %2399 = vst.msk [vmem:[#allocation3 + $0x90] sm:$0xff] %vm2394_vm9, %v3972_v25 }
 0x132   : > { %v1252_v0 = vpop.permute.xlu1 %1251  ;;  %v1338_v30 = vsel %vm972_vm0, %v1336_v19, %v1337_v12  ;;  %v1407_v10 = vmul.f32 %v1399_v43, %v4487_v41  ;;  %v4570_v41 = vld [vmem:[%s5560_s0] ss:$0 sm:$0xff]  ;;  %3589 = vmatpush3.msra.mxu1 %v1917_v6  ;;  %2403 = vst.msk [vmem:[#allocation3 + $0x10] sm:$0x1] %vm2402_vm10, %v3972_v25  ;;  %2404 = vst.msk [vmem:[#allocation3 + $0x20] sm:$0x1] %vm2402_vm10, %v3972_v25 }
 0x133   : > { %v1265_v15 = vmul.f32 %v4310_v53, %v1252_v0  ;;  %3590 = vmatprep.subr.mxu1 %v3972_v25  ;;  %v1913_v19 = vld [vmem:[%s5561_s9] sm:$0xff]  ;;  %2406 = vst.msk [vmem:[#allocation3 + $0x40] sm:$0x1] %vm2402_vm10, %v3972_v25  ;;  %2407 = vst.msk [vmem:[#allocation3 + $0x50] sm:$0x1] %vm2402_vm10, %v3972_v25  ;;  %s755_s9 = sand.u32 1, %s3958_s2  }
 0x134   : > { %3591 = vmatpush3.msra.mxu1 %v1916_v20  ;;  %v5564_v20 = vld [vmem:[#allocation12_spill] sm:$0xff]  ;;  %2408 = vst.msk [vmem:[#allocation3 + $0x60] sm:$0x1] %vm2402_vm10, %v3972_v25  ;;  %2409 = vst.msk [vmem:[#allocation3 + $0x70] sm:$0x1] %vm2402_vm10, %v3972_v25  ;;  %s3423_s1 = sshll.u32 %s755_s9, 3 }
 0x135   : > { %v1273_v48 = vadd.f32 %v1265_v15, %v1249_v31  ;;  %3592 = vmatprep.subr.mxu1 %v3972_v25  ;;  %v1582_v15 = vld [vmem:[#allocation2] sm:$0xff]  ;;  %2410 = vst.msk [vmem:[#allocation3 + $0x80] sm:$0x1] %vm2402_vm10, %v3972_v25  ;;  %2411 = vst.msk [vmem:[#allocation3 + $0x19] sm:$0x1] %vm2402_vm10, %v3972_v25 }
 0x136   : > { %3593 = vmatpush3.msra.mxu1 %v1915_v1  ;;  %v1610_v40 = vld [vmem:[#allocation2 + $0x1] sm:$0xff]  ;;  %2412 = vst.msk [vmem:[#allocation3 + $0x29] sm:$0x1] %vm2402_vm10, %v3972_v25  ;;  %2414 = vst.msk [vmem:[#allocation3 + $0x49] sm:$0x1] %vm2402_vm10, %v3972_v25 }
 0x137   : > { %v1354_v3 = vadd.f32 %v1338_v30, %v1273_v48  ;;  %3594 = vmatprep.subr.mxu1 %v3972_v25  ;;  %2415 = vst.msk [vmem:[#allocation3 + $0x59] sm:$0x1] %vm2402_vm10, %v3972_v25  ;;  %2416 = vst.msk [vmem:[#allocation3 + $0x69] sm:$0x1] %vm2402_vm10, %v3972_v25 }
 0x138   : > { %v3777_v32 = vpop.eup %3776  ;;  %3595 = vmatpush3.msra.mxu1 %v1914_v42  ;;  %2417 = vst.msk [vmem:[#allocation3 + $0x79] sm:$0x1] %vm2402_vm10, %v3972_v25  ;;  %2418 = vst.msk [vmem:[#allocation3 + $0x89] sm:$0x1] %vm2402_vm10, %v3972_v25 }
 0x139   : > { %v1369_v17 = vadd.f32 %v4376_v23, %v1354_v3  ;;  %v1390_v21 = vmul.f32 0.5, %v3777_v32  ;;  %3596 = vmatprep.subr.mxu1 %v3972_v25  ;;  %v4625_v32 = vrot.slane %v4603_v4, %v4239_v45  ;;  %2397 = vst.msk [vmem:[#allocation3 + $0x8] sm:$0x3] %vm2396_vm11, %v3972_v25  ;;  %2400 = vst.msk [vmem:[#allocation3 + $0x98] sm:$0x3] %vm2396_vm11, %v3972_v25 }
 0x13a   : > { %3597 = vmatpush3.msra.mxu1 %v1913_v19 }
 0x13b   : > { %v1377_v44 = vmul.f32 0.5, %v1369_v17  ;;  %v1398_v59 = vadd.f32 0.5, %v1390_v21 }
 0x13d   : > { %3780 = vtanh.f32 %v1377_v44  ;;  %v1406_v62 = vmul.f32 %v1398_v59, %v1366_v55  ;;  %v1638_v59 = vld [vmem:[#allocation2 + $0x2] sm:$0xff] }
 0x13e   : > { %v3779_v53 = vpop.eup %3778 }
 0x13f   : > { %v1412_v46 = vpack.c.bf16 %v1407_v10, %v1406_v62  ;;  %v1392_v27 = vmul.f32 0.5, %v3779_v53  ;;  %v4635_v53 = vrot.slane %v4603_v4, %v4258_v56 }
 0x141   : > { %3578 = vmatprep.mubr.msk.bf16.mxu0 %vm1429_vm1, %v1412_v46  ;;  %v1400_v51 = vadd.f32 0.5, %v1392_v27  ;;  %v1650_v46 = vmul.f32 %v4625_v32, %v1638_v59 }
 0x143   : > { %v1408_v63 = vmul.f32 %v1400_v51, %v1368_v8  ;;  %v4611_v8 = vrot.slane %v4603_v4, %v4213_v34 }
 0x145   : > { %v1622_v21 = vmul.f32 %v4611_v8, %v1610_v40 }
 0x14a   : > { %v3781_v24 = vpop.eup %3780 }
 0x14b   : > { %v1393_v7 = vmul.f32 0.5, %v3781_v24 }
 0x14d   : > { %v1401_v54 = vadd.f32 0.5, %v1393_v7 }
 0x14f   : > { %v1409_v60 = vmul.f32 %v1401_v54, %v1369_v17  ;;  %v1594_v17 = vmul.f32 %v4615_v47, %v1582_v15 }
 0x151   : > { %v1413_v23 = vpack.c.bf16 %v1409_v60, %v1408_v63  ;;  %v1630_v10 = vadd.f32 %v1622_v21, %v1594_v17 }
 0x153   : > { %3579 = vmatmul.mubr.msk.bf16.gmra.mxu0 %vm1429_vm1, %v1413_v23  ;;  %v1658_v7 = vadd.f32 %v1650_v46, %v1630_v10  ;;  %v4642_v23 = vrot.slane %v4603_v4, %v4264_v61 }
 0x1d3   : > { %v3576_v58 = vpop.f32.mrf.mxu0 }
 0x1d4   : > { %v1485_v13 = vadd.f32 %v3576_v58, %v4570_v41 }
 0x1d5   : > { %v1476_v33 = vpop.f32.mrf.mxu0 }
 0x1d6   : > { %v1509_v2 = vmul.f32 0.5, %v1485_v13  ;;  %v1477_v11 = vadd.f32 %v4570_v41, %v1476_v33 }
 0x1d7   : > { %v3577_v16 = vpop.f32.mrf.mxu0 }
 0x1d8   : > { %3782 = vtanh.f32 %v1509_v2  ;;  %v1507_v39 = vmul.f32 0.5, %v1477_v11  ;;  %v1488_v52 = vadd.f32 %v3577_v16, %v4570_v41 }
 0x1d9   : > { %v1479_v55 = vpop.f32.mrf.mxu0 }
 0x1da   : > { %3784 = vtanh.f32 %v1507_v39  ;;  %v1510_v9 = vmul.f32 0.5, %v1488_v52  ;;  %v1480_v49 = vadd.f32 %v4570_v41, %v1479_v55  ;;  %v4648_v39 = vrot.slane %v4603_v4, %v4260_v57 }
 0x1dc   : > { %3786 = vtanh.f32 %v1510_v9  ;;  %v1508_v14 = vmul.f32 0.5, %v1480_v49  ;;  %v5563_v9 = vld [vmem:[#allocation11_spill] sm:$0xff] }
 0x1de   : > { %3788 = vtanh.f32 %v1508_v14 }
 0x1e5   : > { %v3783_v50 = vpop.eup %3782 }
 0x1e6   : > { %v1525_v28 = vmul.f32 0.5, %v3783_v50  ;;  %v4659_v50 = vrot.slane %v4603_v4, %v5564_v20 }
 0x1e7   : > { %v3785_v18 = vpop.eup %3784 }
 0x1e8   : > { %v1533_v26 = vadd.f32 0.5, %v1525_v28  ;;  %v1523_v29 = vmul.f32 0.5, %v3785_v18 }
 0x1e9   : > { %v3787_v22 = vpop.eup %3786 }
 0x1ea   : > { %v1541_v12 = vmul.f32 %v1533_v26, %v1485_v13  ;;  %v1531_v0 = vadd.f32 0.5, %v1523_v29  ;;  %v1526_v31 = vmul.f32 0.5, %v3787_v22 }
 0x1eb   : > { %v3789_v48 = vpop.eup %3788 }
 0x1ec   : > { %1574 = vst.msk [vmem:[#allocation2 + $0x31] sm:$0xff] %vm1547_vm2, %v1541_v12  ;;  %v1539_v35 = vmul.f32 %v1531_v0, %v1477_v11  ;;  %v1534_v30 = vadd.f32 0.5, %v1526_v31  ;;  %v1524_v3 = vmul.f32 0.5, %v3789_v48  ;;  %v4669_v12 = vld [vmem:[%s5562_s28 + $0x8] ss:$0 sm:$0xff] }
 0x1ee   : > { %1572 = vst.msk [vmem:[#allocation2 + $0x11] sm:$0xff] %vm1547_vm2, %v1539_v35  ;;  %v1542_v43 = vmul.f32 %v1534_v30, %v1488_v52  ;;  %v1532_v44 = vadd.f32 0.5, %v1524_v3  ;;  %v4680_v30 = vld [vmem:[%s5565_s3] ss:$0 sm:$0xff]  ;;  %s3358_s3 = scalar_lea.hbm %s5510_s25, %s3464_s6 }
 0x1f0   : > { %1575 = vst.msk [vmem:[#allocation2 + $0x41] sm:$0xff] %vm1547_vm2, %v1542_v43  ;;  %v1540_v62 = vmul.f32 %v1532_v44, %v1480_v49  ;;  %v4653_v49 = vrot.slane %v4603_v4, %v5563_v9 }
 0x1f2   : > { %1573 = vst.msk [vmem:[#allocation2 + $0x21] sm:$0xff] %vm1547_vm2, %v1540_v62 }
 0x1f3   : > { %v4661_v1 = vld [vmem:[#allocation2 + $0x30] sm:$0xff] }
 0x1f4   : > { %v1613_v29 = vld [vmem:[#allocation2 + $0x31] sm:$0xff]  ;;  %v1764_v4 = vmul.f32 %v4653_v49, %v4661_v1 }
 0x1f5   : > { %v1583_v27 = vld [vmem:[#allocation2 + $0x10] sm:$0xff]  ;;  %v1792_v35 = vmul.f32 %v4659_v50, %v1613_v29 }
 0x1f6   : > { %v1611_v24 = vld [vmem:[#allocation2 + $0x11] sm:$0xff]  ;;  %v1595_v51 = vmul.f32 %v4615_v47, %v1583_v27  ;;  %v1678_v63 = vmul.f32 %v4635_v53, %v1583_v27 }
 0x1f7   : > { %v1623_v54 = vmul.f32 %v4611_v8, %v1611_v24  ;;  %v1639_v60 = vld [vmem:[#allocation2 + $0x12] sm:$0xff]  ;;  %v1706_v16 = vmul.f32 %v4642_v23, %v1611_v24 }
 0x1f8   : > { %v1651_v33 = vmul.f32 %v4625_v32, %v1639_v60  ;;  %v1686_v2 = vadd.f32 %v1678_v63, %v1658_v7  ;;  %v1734_v38 = vmul.f32 %v4648_v39, %v1639_v60  ;;  %v4673_v31 = vld [vmem:[#allocation2 + $0x32] sm:$0xff] }
 0x1f9   : > { %v1631_v58 = vadd.f32 %v1623_v54, %v1595_v51  ;;  %v1584_v13 = vld [vmem:[#allocation2 + $0x20] sm:$0xff]  ;;  %v1820_v21 = vmul.f32 %v4669_v12, %v4673_v31 }
 0x1fa   : > { %v1612_v11 = vld [vmem:[#allocation2 + $0x21] sm:$0xff]  ;;  %v1679_v55 = vmul.f32 %v4635_v53, %v1584_v13  ;;  %v1714_v5 = vadd.f32 %v1706_v16, %v1686_v2  ;;  %v1763_v18 = vmul.f32 %v4653_v49, %v1584_v13  ;;  %v1596_v10 = vmul.f32 %v4615_v47, %v1584_v13 }
 0x1fb   : > { %v1659_v52 = vadd.f32 %v1651_v33, %v1631_v58  ;;  %v1640_v14 = vld [vmem:[#allocation2 + $0x22] sm:$0xff]  ;;  %v1707_v6 = vmul.f32 %v4642_v23, %v1612_v11  ;;  %v1791_v19 = vmul.f32 %v4659_v50, %v1612_v11  ;;  %v1624_v46 = vmul.f32 %v4611_v8, %v1612_v11 }
 0x1fc   : > { %v1742_v28 = vadd.f32 %v1734_v38, %v1714_v5  ;;  %v1735_v26 = vmul.f32 %v4648_v39, %v1640_v14  ;;  %v1819_v40 = vmul.f32 %v4669_v12, %v1640_v14  ;;  %v1652_v7 = vmul.f32 %v4625_v32, %v1640_v14 }
 0x1fd   : > { %v1687_v37 = vadd.f32 %v1679_v55, %v1659_v52  ;;  %v1632_v24 = vadd.f32 %v1624_v46, %v1596_v10  ;;  %v1680_v58 = vmul.f32 %v4635_v53, %v4661_v1  ;;  %v1708_v38 = vmul.f32 %v4642_v23, %v1613_v29 }
 0x1fe   : > { %v1771_v22 = vadd.f32 %v1763_v18, %v1742_v28 }
 0x1ff   : > { %v1715_v42 = vadd.f32 %v1707_v6, %v1687_v37  ;;  %v1660_v54 = vadd.f32 %v1652_v7, %v1632_v24 }
 0x200   : > { %v1799_v15 = vadd.f32 %v1791_v19, %v1771_v22  ;;  %v1736_v19 = vmul.f32 %v4648_v39, %v4673_v31 }
 0x201   : > { %v1743_v0 = vadd.f32 %v1735_v26, %v1715_v42  ;;  %v1688_v52 = vadd.f32 %v1680_v58, %v1660_v54 }
 0x202   : > { %v1827_v3 = vadd.f32 %v1819_v40, %v1799_v15 }
 0x203   : > { %v1772_v48 = vadd.f32 %v1764_v4, %v1743_v0  ;;  %v1716_v18 = vadd.f32 %v1708_v38, %v1688_v52  ;;  %v1586_v4 = vld [vmem:[#allocation2 + $0x40] sm:$0xff] }
 0x204   : > { %v1842_v43 = vadd.f32 %v4680_v30, %v1827_v3  ;;  %v1765_v3 = vmul.f32 %v4653_v49, %v1586_v4 }
 0x205   : > { %v1800_v17 = vadd.f32 %v1792_v35, %v1772_v48  ;;  %v1744_v15 = vadd.f32 %v1736_v19, %v1716_v18  ;;  %v1597_v35 = vmul.f32 %v4615_v47, %v4661_v1  ;;  %v1653_v1 = vmul.f32 %v4625_v32, %v4673_v31 }
 0x206   : > { %v1850_v59 = vmul.f32 0.5, %v1842_v43  ;;  %v1598_v31 = vmul.f32 %v4615_v47, %v1586_v4 }
 0x207   : > { %v1828_v44 = vadd.f32 %v1820_v21, %v1800_v17  ;;  %v1614_v21 = vld [vmem:[#allocation2 + $0x41] sm:$0xff] }
 0x208   : > { %3790 = vtanh.f32 %v1850_v59 }
 0x209   : > { %v1843_v62 = vadd.f32 %v4680_v30, %v1828_v44  ;;  %v1773_v44 = vadd.f32 %v1765_v3, %v1744_v15 }
 0x20b   : > { %v1851_v27 = vmul.f32 0.5, %v1843_v62 }
 0x20d   : > { %3792 = vtanh.f32 %v1851_v27 }
 0x213   : > { %v3580_v51 = vpop.f32.mrf.mxu0 }
 0x214   : > { %v1501_v60 = vadd.f32 %v3580_v51, %v4570_v41 }
 0x215   : > { %v1492_v63 = vpop.f32.mrf.mxu0  ;;  %v3791_v16 = vpop.eup %3790 }
 0x216   : > { %v1513_v33 = vmul.f32 0.5, %v1501_v60  ;;  %v1493_v2 = vadd.f32 %v4570_v41, %v1492_v63  ;;  %v1866_v5 = vmul.f32 0.5, %v3791_v16 }
 0x217   : > { %v3581_v13 = vpop.f32.mrf.mxu0 }
 0x218   : > { %3794 = vtanh.f32 %v1513_v33  ;;  %v1511_v11 = vmul.f32 0.5, %v1493_v2  ;;  %v1504_v55 = vadd.f32 %v3581_v13, %v4570_v41  ;;  %v1874_v26 = vadd.f32 0.5, %v1866_v5 }
 0x219   : > { %v1495_v14 = vpop.f32.mrf.mxu0  ;;  %v1681_v13 = vmul.f32 %v4635_v53, %v1586_v4 }
 0x21a   : > { %v3793_v37 = vpop.eup %3792  ;;  %3796 = vtanh.f32 %v1511_v11  ;;  %v1514_v6 = vmul.f32 0.5, %v1504_v55  ;;  %v1496_v28 = vadd.f32 %v4570_v41, %v1495_v14  ;;  %v4698_v40 = vmul.f32 %v1874_v26, %v1842_v43 }
 0x21b   : > { %v1867_v42 = vmul.f32 0.5, %v3793_v37  ;;  %v1625_v41 = vmul.f32 %v4611_v8, %v1613_v29  ;;  %v1793_v43 = vmul.f32 %v4659_v50, %v1614_v21  ;;  %v1626_v37 = vmul.f32 %v4611_v8, %v1614_v21 }
 0x21c   : > { %3798 = vtanh.f32 %v1514_v6  ;;  %v1512_v22 = vmul.f32 0.5, %v1496_v28 }
 0x21d   : > { %v1875_v0 = vadd.f32 0.5, %v1867_v42  ;;  %v1633_v10 = vadd.f32 %v1625_v41, %v1597_v35  ;;  %v1801_v29 = vadd.f32 %v1793_v43, %v1773_v44 }
 0x21e   : > { %3800 = vtanh.f32 %v1512_v22  ;;  %v1709_v22 = vmul.f32 %v4642_v23, %v1614_v21 }
 0x21f   : > { %v4700_v48 = vmul.f32 %v1875_v0, %v1843_v62  ;;  %v1642_v62 = vld [vmem:[#allocation2 + $0x42] sm:$0xff]  ;;  %v1661_v54 = vadd.f32 %v1653_v1, %v1633_v10  ;;  %v1758_v0 = vld [vmem:[#allocation2 + $0x90] sm:$0xff] }
 0x220   : > { %v1821_v63 = vmul.f32 %v4669_v12, %v1642_v62  ;;  %v1654_v4 = vmul.f32 %v4625_v32, %v1642_v62  ;;  %v1737_v41 = vmul.f32 %v4648_v39, %v1642_v62  ;;  %v4738_v10 = vmul.f32 %v4653_v49, %v1758_v0 }
 0x221   : > { %v2161_v17 = vpack.c.bf16 %v4700_v48, %v4698_v40 }
 0x222   : > { %v1829_v11 = vadd.f32 %v1821_v63, %v1801_v29 }
 0x223   : > { %3609 = vmatprep.mubr.msk.bf16.mxu0 %vm1547_vm2, %v2161_v17 }
 0x224   : > { %v4719_v42 = vadd.f32 %v4680_v30, %v1829_v11 }
 0x225   : > { %v3795_v59 = vpop.eup %3794 }
 0x226   : > { %v1529_v46 = vmul.f32 0.5, %v3795_v59  ;;  %v1852_v35 = vmul.f32 0.5, %v4719_v42 }
 0x227   : > { %v3797_v27 = vpop.eup %3796 }
 0x228   : > { %v1537_v24 = vadd.f32 0.5, %v1529_v46  ;;  %v1527_v7 = vmul.f32 0.5, %v3797_v27  ;;  %3802 = vtanh.f32 %v1852_v35 }
 0x229   : > { %v3799_v51 = vpop.eup %3798 }
 0x22a   : > { %v1545_v58 = vmul.f32 %v1537_v24, %v1501_v60  ;;  %v1535_v33 = vadd.f32 0.5, %v1527_v7  ;;  %v1530_v16 = vmul.f32 0.5, %v3799_v51  ;;  %v1689_v60 = vadd.f32 %v1681_v13, %v1661_v54 }
 0x22b   : > { %v3801_v52 = vpop.eup %3800 }
 0x22c   : > { %1578 = vst.msk [vmem:[#allocation2 + $0x71] sm:$0xff] %vm1547_vm2, %v1545_v58  ;;  %v1543_v5 = vmul.f32 %v1535_v33, %v1493_v2  ;;  %v1538_v14 = vadd.f32 0.5, %v1530_v16  ;;  %v1528_v38 = vmul.f32 0.5, %v3801_v52  ;;  %v1634_v2 = vadd.f32 %v1626_v37, %v1598_v31 }
 0x22d   : > { %v1717_v19 = vadd.f32 %v1709_v22, %v1689_v60 }
 0x22e   : > { %1576 = vst.msk [vmem:[#allocation2 + $0x51] sm:$0xff] %vm1547_vm2, %v1543_v5  ;;  %v1546_v6 = vmul.f32 %v1538_v14, %v1504_v55  ;;  %v1536_v18 = vadd.f32 0.5, %v1528_v38  ;;  %v1662_v59 = vadd.f32 %v1654_v4, %v1634_v2 }
 0x22f   : > { %v1745_v1 = vadd.f32 %v1737_v41, %v1717_v19 }
 0x230   : > { %1579 = vst.msk [vmem:[#allocation2 + $0x81] sm:$0xff] %vm1547_vm2, %v1546_v6  ;;  %v1544_v26 = vmul.f32 %v1536_v18, %v1496_v28 }
 0x232   : > { %1577 = vst.msk [vmem:[#allocation2 + $0x61] sm:$0xff] %vm1547_vm2, %v1544_v26 }
 0x233   : > { %v4725_v15 = vld [vmem:[#allocation2 + $0x70] sm:$0xff] }
 0x234   : > { %v4727_v55 = vld [vmem:[#allocation2 + $0x71] sm:$0xff]  ;;  %v1601_v28 = vmul.f32 %v4615_v47, %v4725_v15  ;;  %v1684_v51 = vmul.f32 %v4635_v53, %v4725_v15 }
 0x235   : > { %v1629_v3 = vmul.f32 %v4611_v8, %v4727_v55  ;;  %v4735_v17 = vld [vmem:[#allocation2 + $0x72] sm:$0xff] }
 0x236   : > { %v1587_v21 = vld [vmem:[#allocation2 + $0x50] sm:$0xff]  ;;  %v1657_v24 = vmul.f32 %v4625_v32, %v4735_v17 }
 0x237   : > { %v1615_v44 = vld [vmem:[#allocation2 + $0x51] sm:$0xff]  ;;  %v1599_v43 = vmul.f32 %v4615_v47, %v1587_v21  ;;  %v1682_v62 = vmul.f32 %v4635_v53, %v1587_v21  ;;  %v1766_v29 = vmul.f32 %v4653_v49, %v1587_v21  ;;  %v1673_v7 = vld [vmem:[#allocation2 + $0x80] sm:$0xff]  ;;  %v1637_v33 = vadd.f32 %v1629_v3, %v1601_v28 }
 0x238   : > { %v1627_v46 = vmul.f32 %v4611_v8, %v1615_v44  ;;  %v1643_v27 = vld [vmem:[#allocation2 + $0x52] sm:$0xff]  ;;  %v1710_v63 = vmul.f32 %v4642_v23, %v1615_v44  ;;  %v1794_v38 = vmul.f32 %v4659_v50, %v1615_v44  ;;  %v1685_v18 = vmul.f32 %v4635_v53, %v1673_v7  ;;  %v1701_v60 = vld [vmem:[#allocation2 + $0x81] sm:$0xff] }
 0x239   : > { %v1690_v54 = vadd.f32 %v1682_v62, %v1662_v59  ;;  %v1655_v16 = vmul.f32 %v4625_v32, %v1643_v27  ;;  %v1588_v13 = vld [vmem:[#allocation2 + $0x60] sm:$0xff]  ;;  %v1738_v5 = vmul.f32 %v4648_v39, %v1643_v27  ;;  %v1774_v14 = vadd.f32 %v1766_v29, %v1745_v1 }
 0x23a   : > { %v1635_v58 = vadd.f32 %v1627_v46, %v1599_v43  ;;  %v1616_v52 = vld [vmem:[#allocation2 + $0x61] sm:$0xff]  ;;  %v1600_v31 = vmul.f32 %v4615_v47, %v1588_v13  ;;  %v1767_v26 = vmul.f32 %v4653_v49, %v1588_v13  ;;  %v1822_v2 = vmul.f32 %v4669_v12, %v1643_v27  ;;  %v1786_v27 = vld [vmem:[#allocation2 + $0x91] sm:$0xff] }
 0x23b   : > { %v1644_v11 = vld [vmem:[#allocation2 + $0x62] sm:$0xff]  ;;  %v1628_v37 = vmul.f32 %v4611_v8, %v1616_v52  ;;  %v1718_v6 = vadd.f32 %v1710_v63, %v1690_v54  ;;  %v1802_v22 = vadd.f32 %v1794_v38, %v1774_v14  ;;  %v1665_v41 = vadd.f32 %v1657_v24, %v1637_v33 }
 0x23c   : > { %v1656_v19 = vmul.f32 %v4625_v32, %v1644_v11  ;;  %v1663_v35 = vadd.f32 %v1655_v16, %v1635_v58  ;;  %v1729_v28 = vld [vmem:[#allocation2 + $0x82] sm:$0xff]  ;;  %v1683_v47 = vmul.f32 %v4635_v53, %v1588_v13  ;;  %v1712_v8 = vmul.f32 %v4642_v23, %v4727_v55  ;;  %v1814_v58 = vld [vmem:[#allocation2 + $0x92] sm:$0xff] }
 0x23d   : > { %v1746_v0 = vadd.f32 %v1738_v5, %v1718_v6  ;;  %v1636_v4 = vadd.f32 %v1628_v37, %v1600_v31  ;;  %v1830_v3 = vadd.f32 %v1822_v2, %v1802_v22  ;;  %v1713_v21 = vmul.f32 %v4642_v23, %v1701_v60  ;;  %v3803_v6 = vpop.eup %3802 }
 0x23e   : > { %v1795_v59 = vmul.f32 %v4659_v50, %v1616_v52  ;;  %v1693_v46 = vadd.f32 %v1685_v18, %v1665_v41  ;;  %v1691_v62 = vadd.f32 %v1683_v47, %v1663_v35  ;;  %v1711_v1 = vmul.f32 %v4642_v23, %v1616_v52 }
 0x23f   : > { %v1775_v44 = vadd.f32 %v1767_v26, %v1746_v0  ;;  %v1664_v43 = vadd.f32 %v1656_v19, %v1636_v4  ;;  %v1845_v32 = vadd.f32 %v4680_v30, %v1830_v3  ;;  %v1741_v29 = vmul.f32 %v4648_v39, %v1729_v28 }
 0x240   : > { %v1823_v53 = vmul.f32 %v4669_v12, %v1644_v11  ;;  %v1721_v63 = vadd.f32 %v1713_v21, %v1693_v46  ;;  %v1719_v16 = vadd.f32 %v1711_v1, %v1691_v62  ;;  %v1739_v13 = vmul.f32 %v4648_v39, %v1644_v11 }
 0x241   : > { %v1803_v24 = vadd.f32 %v1795_v59, %v1775_v44  ;;  %v1692_v54 = vadd.f32 %v1684_v51, %v1664_v43  ;;  %v1853_v33 = vmul.f32 0.5, %v1845_v32  ;;  %v1798_v5 = vmul.f32 %v4659_v50, %v1786_v27 }
 0x242   : > { %v1740_v31 = vmul.f32 %v4648_v39, %v4735_v17  ;;  %v1749_v23 = vadd.f32 %v1741_v29, %v1721_v63  ;;  %v1747_v52 = vadd.f32 %v1739_v13, %v1719_v16  ;;  %v1768_v37 = vmul.f32 %v4653_v49, %v4725_v15 }
 0x243   : > { %v1831_v14 = vadd.f32 %v1823_v53, %v1803_v24  ;;  %v1720_v38 = vadd.f32 %v1712_v8, %v1692_v54  ;;  %3804 = vtanh.f32 %v1853_v33  ;;  %v1826_v51 = vmul.f32 %v4669_v12, %v1814_v58 }
 0x244   : > { %v1769_v11 = vmul.f32 %v4653_v49, %v1673_v7  ;;  %v1778_v22 = vadd.f32 %v4738_v10, %v1749_v23  ;;  %v1776_v2 = vadd.f32 %v1768_v37, %v1747_v52  ;;  %v1796_v39 = vmul.f32 %v4659_v50, %v4727_v55 }
 0x245   : > { %v1846_v18 = vadd.f32 %v4680_v30, %v1831_v14  ;;  %v1748_v26 = vadd.f32 %v1740_v31, %v1720_v38  ;;  %v1797_v4 = vmul.f32 %v4659_v50, %v1701_v60  ;;  %v1824_v41 = vmul.f32 %v4669_v12, %v4735_v17 }
 0x246   : > { %v1806_v35 = vadd.f32 %v1798_v5, %v1778_v22  ;;  %v1804_v15 = vadd.f32 %v1796_v39, %v1776_v2  ;;  %v1825_v47 = vmul.f32 %v4669_v12, %v1729_v28  ;;  %v1868_v50 = vmul.f32 0.5, %v3803_v6 }
 0x247   : > { %v1854_v19 = vmul.f32 0.5, %v1846_v18  ;;  %v1777_v0 = vadd.f32 %v1769_v11, %v1748_v26  ;;  %v1891_v24 = vsel %vm1547_vm2, %v4700_v48, 0.0  ;;  %v1890_v63 = vsel %vm1547_vm2, %v4698_v40, 0.0 }
 0x248   : > { %v1834_v49 = vadd.f32 %v1826_v51, %v1806_v35  ;;  %v1832_v7 = vadd.f32 %v1824_v41, %v1804_v15  ;;  %v1876_v46 = vadd.f32 0.5, %v1868_v50 }
 0x249   : > { %3806 = vtanh.f32 %v1854_v19  ;;  %v1805_v3 = vadd.f32 %v1797_v4, %v1777_v0 }
 0x24a   : > { %v1849_v8 = vadd.f32 %v4680_v30, %v1834_v49  ;;  %v1847_v55 = vadd.f32 %v4680_v30, %v1832_v7  ;;  %v4787_v27 = vmul.f32 %v1876_v46, %v4719_v42  ;;  %v2006_v46 = vld [vmem:[%s5567_s27 + $0x30] sm:$0xff] }
 0x24b   : > { %v1833_v10 = vadd.f32 %v1825_v47, %v1805_v3 }
 0x24c   : > { %v1857_v44 = vmul.f32 0.5, %v1849_v8  ;;  %v1855_v60 = vmul.f32 0.5, %v1847_v55  ;;  %v1893_v42 = vsel %vm1547_vm2, %v4787_v27, 0.0 }
 0x24d   : > { %v1848_v21 = vadd.f32 %v4680_v30, %v1833_v10  ;;  %v1921_v10 = vld [vmem:[%s5566_s26] sm:$0x1]  ;;  %s757_s26 = scalar_lea.vmem [#allocation4], %s3423_s1 }
 0x24e   : > { %3808 = vtanh.f32 %v1857_v44  ;;  %s3360_s5 = sshll.u32 %s757_s26, 4  ;;  %s3361_s5 = int_to_ptr.vmem [resolvable:$true] %s3360_s5 }
 0x24f   : > { %v1856_v59 = vmul.f32 0.5, %v1848_v21  ;;  %3810 = vtanh.f32 %v1855_v60 }
 0x250   : > { %v3805_v17 = vpop.eup %3804 }
 0x251   : > { %3812 = vtanh.f32 %v1856_v59  ;;  %v1869_v43 = vmul.f32 0.5, %v3805_v17 }
 0x253   : > { %v1877_v12 = vadd.f32 0.5, %v1869_v43  ;;  %v2007_v43 = vld [vmem:[%s5567_s27 + $0x38] sm:$0xff] }
 0x255   : > { %v4789_v62 = vmul.f32 %v1877_v12, %v1845_v32  ;;  %v1892_v32 = vadd.f32 %v1891_v24, %v1890_v63 }
 0x256   : > { %v3807_v28 = vpop.eup %3806 }
 0x257   : > { %v1870_v1 = vmul.f32 0.5, %v3807_v28  ;;  %v2162_v30 = vpack.c.bf16 %v4789_v62, %v4787_v27  ;;  %v1895_v13 = vsel %vm1547_vm2, %v4789_v62, 0.0  ;;  %v1894_v14 = vadd.f32 %v1893_v42, %v1892_v32  ;;  %v2004_v28 = vld [vmem:[%s5567_s27 + $0x20] sm:$0xff]  ;;  %v2005_v32 = vld [vmem:[%s5567_s27 + $0x28] sm:$0xff] }
 0x258   : > { %v3763_v62 = vld [vmem:[%s5570_s13] sm:$0xff]  }
 0x259   : > { %v1878_v29 = vadd.f32 0.5, %v1870_v1  ;;  %v1896_v52 = vadd.f32 %v1895_v13, %v1894_v14  ;;  %v2002_v1 = vld [vmem:[%s5567_s27 + $0x10] sm:$0xff] }
 0x25b   : > { %v3809_v53 = vpop.eup %3808  ;;  %v4795_v54 = vmul.f32 %v1878_v29, %v1846_v18 }
 0x25c   : > { %v3811_v58 = vpop.eup %3810  ;;  %v1873_v33 = vmul.f32 0.5, %v3809_v53 }
 0x25d   : > { %v1871_v5 = vmul.f32 0.5, %v3811_v58  ;;  %v1897_v31 = vsel %vm1547_vm2, %v4795_v54, 0.0 }
 0x25e   : > { %v3813_v16 = vpop.eup %3812  ;;  %v1881_v48 = vadd.f32 0.5, %v1873_v33  ;;  %v1898_v51 = vadd.f32 %v1897_v31, %v1896_v52  ;;  %v2000_v33 = vld [vmem:[%s5567_s27] sm:$0xff]  ;;  %v2001_v52 = vld [vmem:[%s5567_s27 + $0x8] sm:$0xff] }
 0x25f   : > { %v1872_v38 = vmul.f32 0.5, %v3813_v16  ;;  %v1879_v23 = vadd.f32 0.5, %v1871_v5 }
 0x260   : > { %v4809_v18 = vmul.f32 %v1881_v48, %v1849_v8 }
 0x261   : > { %v1880_v40 = vadd.f32 0.5, %v1872_v38  ;;  %v4805_v37 = vmul.f32 %v1879_v23, %v1847_v55  ;;  %v2003_v38 = vld [vmem:[%s5567_s27 + $0x18] sm:$0xff] }
 0x262   : > { %v1903_v0 = vsel %vm1547_vm2, %v4809_v18, 0.0 }
 0x263   : > { %v4807_v6 = vmul.f32 %v1880_v40, %v1848_v21  ;;  %v1899_v26 = vsel %vm1547_vm2, %v4805_v37, 0.0  ;;  %v2163_v11 = vpack.c.bf16 %v4805_v37, %v4795_v54 }
 0x264   : > { %v1900_v22 = vadd.f32 %v1899_v26, %v1898_v51 }
 0x265   : > { %v1901_v2 = vsel %vm1547_vm2, %v4807_v6, 0.0  ;;  %v2164_v39 = vpack.c.bf16 %v4809_v18, %v4807_v6  ;;  %v3436_v6 = vld [vmem:[%s5571_s12] ss:$0 sm:$0xff]  ;;  %s3974_s12 = smov [#allocation4]  }
 0x266   : > { %v1902_v19 = vadd.f32 %v1901_v2, %v1900_v22  ;;  %v2052_v22 = vld [vmem:[%s5568_s10 + $0x38] sm:$0xff]  ;;  %v2051_v2 = vld [vmem:[%s5568_s10 + $0x30] sm:$0xff] }
 0x268   : > { %v1904_v4 = vadd.f32 %v1903_v0, %v1902_v19 }
 0x26a   : > { %v1905_v35 = vrot.slane %v1904_v4, 4 }
 0x26c   : > { %v1906_v15 = vadd.f32 %v1905_v35, %v1904_v4 }
 0x26e   : > { %v1907_v41 = vrot.slane %v1906_v15, 2 }
 0x270   : > { %v1908_v3 = vadd.f32 %v1907_v41, %v1906_v15  ;;  %v2049_v15 = vld [vmem:[%s5568_s10 + $0x20] sm:$0xff]  ;;  %v2047_v41 = vld [vmem:[%s5568_s10 + $0x10] sm:$0xff] }
 0x272   : > { %v1909_v47 = vrot.slane %v1908_v3, 1 }
 0x274   : > { %v1910_v49 = vadd.f32 %v1909_v47, %v1908_v3 }
 0x276   : > { %v1912_v7 = vmul.f32 0.015625, %v1910_v49 }
 0x278   : > { %3599 = vmatmul.mubr.msk.f32.vlgmr.msra.gmra.mxu1 %vm1547_vm2, %v1912_v7 }
 0x338   : > { %v1991_v8 = vpop.f32.mrf.mxu1 }
 0x339   : > { %v1992_v55 = vadd.f32 %v1991_v8, %v1921_v10 }
 0x33a   : > { %v3600_v21 = vpop.f32.mrf.mxu1 }
 0x33b   : > { %v1995_v44 = vmul.f32 0.5, %v1992_v55  ;;  %v2045_v21 = vld [vmem:[%s5568_s10] sm:$0xff] }
 0x33d   : > { %3814 = vtanh.f32 %v1995_v44 }
 0x34a   : > { %v3815_v50 = vpop.eup %3814 }
 0x34b   : > { %v1997_v60 = vmul.f32 0.5, %v3815_v50 }
 0x34d   : > { %v1998_v59 = vadd.f32 0.5, %v1997_v60 }
 0x34f   : > { %v1999_v17 = vmul.f32 %v1998_v59, %v1992_v55  ;;  %v2050_v55 = vld [vmem:[%s5568_s10 + $0x28] sm:$0xff] }
 0x351   : > { %v2011_v12 = vrot.slane %v1999_v17, %v4218_v36 }
 0x353   : > { %v2019_v29 = vmul.f32 %v2011_v12, %v2007_v43  ;;  %v2018_v24 = vmul.f32 %v2011_v12, %v2006_v46  ;;  %v2016_v42 = vmul.f32 %v2011_v12, %v2004_v28  ;;  %v2014_v58 = vmul.f32 %v2011_v12, %v2002_v1  ;;  %v2048_v46 = vld [vmem:[%s5568_s10 + $0x18] sm:$0xff] }
 0x354   : > { %v2017_v5 = vmul.f32 %v2011_v12, %v2005_v32  ;;  %v2012_v14 = vmul.f32 %v2011_v12, %v2000_v33  ;;  %v2015_v23 = vmul.f32 %v2011_v12, %v2003_v38  ;;  %v2013_v51 = vmul.f32 %v2011_v12, %v2001_v52 }
 0x355   : > { %v2042_v53 = vsel %vm2020_vm6, %v2019_v29, 0.0  ;;  %v2039_v63 = vsel %vm2020_vm6, %v2018_v24, 0.0  ;;  %v2033_v16 = vsel %vm2020_vm6, %v2016_v42, 0.0  ;;  %v2027_v13 = vsel %vm2020_vm6, %v2014_v58, 0.0  ;;  %v2046_v24 = vld [vmem:[%s5568_s10 + $0x8] sm:$0xff]  ;;  %s3347_s10 = scalar_lea.sflag [#allocation5], %s755_s9 }
 0x356   : > { %2043 = vadd.xlane.f32.xlu1 %v2042_v53  ;;  %2040 = vadd.xlane.f32.xlu0 %v2039_v63  ;;  %v2036_v48 = vsel %vm2020_vm6, %v2017_v5, 0.0  ;;  %v2021_v31 = vsel %vm2020_vm6, %v2012_v14, 0.0  ;;  %v2030_v40 = vsel %vm2020_vm6, %v2015_v23, 0.0  ;;  %v2024_v26 = vsel %vm2020_vm6, %v2013_v51, 0.0 }
 0x35a   : > { %2034 = vadd.xlane.f32.xlu0 %v2033_v16  ;;  %2028 = vadd.xlane.f32.xlu1 %v2027_v13 }
 0x35e   : > { %2037 = vadd.xlane.f32.xlu0 %v2036_v48  ;;  %2022 = vadd.xlane.f32.xlu1 %v2021_v31 }
 0x362   : > { %2031 = vadd.xlane.f32.xlu0 %v2030_v40 }
 0x366   : > { %2025 = vadd.xlane.f32.xlu0 %v2024_v26 }
 0x3df   : > { %v2044_v19 = vpop.xlane.xlu1 %2043  ;;  %v2041_v0 = vpop.xlane.xlu0 %2040 }
 0x3e0   : > { %v2060_v4 = vadd.f32 %v2052_v22, %v2044_v19  ;;  %v2059_v35 = vadd.f32 %v2051_v2, %v2041_v0 }
 0x3e2   : > { %v2068_v3 = vmul.f32 0.5, %v2060_v4  ;;  %v2067_v47 = vmul.f32 0.5, %v2059_v35 }
 0x3e3   : > { %v2035_v49 = vpop.xlane.xlu0 %2034  ;;  %v2029_v7 = vpop.xlane.xlu1 %2028 }
 0x3e4   : > { %3816 = vtanh.f32 %v2068_v3  ;;  %v2057_v10 = vadd.f32 %v2049_v15, %v2035_v49  ;;  %v2055_v8 = vadd.f32 %v2047_v41, %v2029_v7  ;;  %v3509_v49 = vld [vmem:[%s5569_s11 + $0x18] sm:$0xff]  }
 0x3e5   : > { %3818 = vtanh.f32 %v2067_v47  ;;  %v3482_v7 = vunpack.c.h.bf16 %v3509_v49 }
 0x3e6   : > { %v2065_v44 = vmul.f32 0.5, %v2057_v10  ;;  %v2063_v50 = vmul.f32 0.5, %v2055_v8  ;;  %v3481_v10 = vunpack.c.l.bf16 %v3509_v49 }
 0x3e7   : > { %v2038_v60 = vpop.xlane.xlu0 %2037  ;;  %v2023_v59 = vpop.xlane.xlu1 %2022 }
 0x3e8   : > { %3820 = vtanh.f32 %v2065_v44  ;;  %v2058_v17 = vadd.f32 %v2050_v55, %v2038_v60  ;;  %v2053_v43 = vadd.f32 %v2045_v21, %v2023_v59 }
 0x3e9   : > { %3822 = vtanh.f32 %v2063_v50  ;;  %v3508_v50 = vld [vmem:[%s5569_s11 + $0x10] sm:$0xff]  }
 0x3ea   : > { %v2066_v12 = vmul.f32 0.5, %v2058_v17  ;;  %v2061_v28 = vmul.f32 0.5, %v2053_v43  ;;  %v3477_v17 = vunpack.c.l.bf16 %v3508_v50  ;;  %v3478_v43 = vunpack.c.h.bf16 %v3508_v50  ;;  %v2764_v50 = vld [vmem:[%s5502_s17 + $0x28] sm:$0xff] }
 0x3eb   : > { %v2032_v1 = vpop.xlane.xlu0 %2031 }
 0x3ec   : > { %3824 = vtanh.f32 %v2066_v12  ;;  %v2056_v29 = vadd.f32 %v2048_v46, %v2032_v1  ;;  %v3507_v46 = vld [vmem:[%s5569_s11 + $0x8] sm:$0xff]  }
 0x3ed   : > { %3826 = vtanh.f32 %v2061_v28  ;;  %v3473_v1 = vunpack.c.l.bf16 %v3507_v46 }
 0x3ee   : > { %v2064_v53 = vmul.f32 0.5, %v2056_v29 }
 0x3ef   : > { %v2026_v63 = vpop.xlane.xlu0 %2025 }
 0x3f0   : > { %3828 = vtanh.f32 %v2064_v53  ;;  %v2054_v42 = vadd.f32 %v2046_v24, %v2026_v63  ;;  %v3474_v53 = vunpack.c.h.bf16 %v3507_v46  ;;  %v3468_v63 = vld [vmem:[%s5569_s11] sm:$0xff]   ;;  %s3906_s11 = scalar_lea.vmem %s3361_s5, 128 }
 0x3f1   : > { %v3817_v58 = vpop.eup %3816  ;;  %v2759_v46 = vld [vmem:[%s5502_s17] sm:$0xff]  ;;  %p3907_p11 = scmp.ne.s32.totalorder %s3361_s5, %s3906_s11 }
 0x3f2   : > { %v3819_v32 = vpop.eup %3818  ;;  %v2062_v33 = vmul.f32 0.5, %v2054_v42  ;;  %v2084_v16 = vmul.f32 0.5, %v3817_v58 }
 0x3f3   : > { %v2083_v13 = vmul.f32 0.5, %v3819_v32  ;;  %p3908_p12 = pnand %p3907_p11, %p4143_p5 }
 0x3f4   : > { %3830 = vtanh.f32 %v2062_v33  ;;  %v2092_v5 = vadd.f32 0.5, %v2084_v16  ;;  %v3469_v33 = vunpack.c.l.bf16 %v3468_v63 }
 0x3f5   : > { %v3821_v14 = vpop.eup %3820  ;;  %v2091_v38 = vadd.f32 0.5, %v2083_v13  ;;  %v3470_v13 = vunpack.c.h.bf16 %v3468_v63  ;;  %p3909_p13 = pneg %p3908_p12 }
 0x3f6   : > { %v3823_v48 = vpop.eup %3822  ;;  %2146 = vperm.xlu0 %3757, %v2092_v5   ;;  %v2081_v31 = vmul.f32 0.5, %v3821_v14 }
 0x3f7   : > { %2141 = vperm.xlu1 %3760, %v2091_v38   ;;  %v2079_v23 = vmul.f32 0.5, %v3823_v48 }
 0x3f8   : > { %v2089_v52 = vadd.f32 0.5, %v2081_v31 }
 0x3f9   : > { %v3825_v40 = vpop.eup %3824  ;;  %v2087_v51 = vadd.f32 0.5, %v2079_v23 }
 0x3fa   : > { %v3827_v26 = vpop.eup %3826  ;;  %v2082_v22 = vmul.f32 0.5, %v3825_v40 }
 0x3fb   : > { %2121 = vperm.xlu0 %3757, %v2087_v51   ;;  %2131 = vperm.xlu1 %3760, %v2089_v52   ;;  %v2077_v2 = vmul.f32 0.5, %v3827_v26  ;;  %v3762_v52 = vld [vmem:[%s5570_s13 + $0x8] ss:$0 sps:$4 sm:$0xff]   ;;  %s3910_s13 = sshll.u32 %s3974_s12, 4  ;;  %s3911_s13 = int_to_ptr.vmem [resolvable:$false] %s3910_s13 }
 0x3fc   : > { %v2090_v19 = vadd.f32 0.5, %v2082_v22  ;;  %3688 = vmatprep.subr.msk.bf16.mxu1 %vm2285_vm7, %v3762_v52  ;;  %v2287_v27 = vsel %vm2285_vm7, %v3762_v52, 0  ;;  %s3912_s7 = scalar_lea.vmem %s3911_s13, 256  ;;  %p3913_p0 = scmp.lt.s32.totalorder %s3361_s5, %s3911_s13 }
 0x3fd   : > { %v3829_v0 = vpop.eup %3828  ;;  %v2085_v4 = vadd.f32 0.5, %v2077_v2  ;;  %3618 = vmatpush3.bf16.msra.mxu1 %v2287_v27  ;;  %p3914_p1 = scmp.lt.s32.totalorder %s3912_s7, %s3906_s11 }
 0x3fe   : > { %v2080_v35 = vmul.f32 0.5, %v3829_v0  ;;  %3619 = vmatprep.subr.bf16.mxu1 %v3763_v62 }
 0x3ff   : > { %2136 = vperm.xlu1 %3760, %v2090_v19   ;;  %2111 = vperm.xlu0 %3757, %v2085_v4   ;;  %p3915_p2 = por %p3914_p1, %p3913_p0 }
 0x400   : > { %v2088_v15 = vadd.f32 0.5, %v2080_v35 }
 0x401   : > { %v3831_v41 = vpop.eup %3830  ;;  %3620 = vmatpush3.bf16.msra.mxu1 %v3763_v62  ;;  %p3916_p3 = pnand %p3915_p2, %p3909_p13 }
 0x402   : > { %v2078_v3 = vmul.f32 0.5, %v3831_v41 }
 0x403   : > { %2126 = vperm.xlu1 %3760, %v2088_v15  }
 0x404   : > { %v2086_v47 = vadd.f32 0.5, %v2078_v3 }
 0x407   : > { %2116 = vperm.xlu1 %3760, %v2086_v47  }
 0x471   : > { %v2147_v8 = vpop.permute.xlu0 %2146 }
 0x472   : > { %v2156_v55 = vmul.f32 %v3482_v7, %v2147_v8  ;;  %v2142_v21 = vpop.permute.xlu1 %2141  ;;  %v2770_v7 = vld [vmem:[%s5502_s17 + $0x58] sm:$0xff]  ;;  %v2768_v8 = vld [vmem:[%s5502_s17 + $0x48] sm:$0xff] }
 0x473   : > { %v2155_v44 = vmul.f32 %v3481_v10, %v2142_v21  ;;  %v2769_v10 = vld [vmem:[%s5502_s17 + $0x50] sm:$0xff]  ;;  %v2766_v21 = vld [vmem:[%s5502_s17 + $0x38] sm:$0xff] }
 0x475   : > { %v2160_v60 = vpack.c.bf16 %v2156_v55, %v2155_v44  ;;  %v2767_v55 = vld [vmem:[%s5502_s17 + $0x40] sm:$0xff]  ;;  %v2765_v44 = vld [vmem:[%s5502_s17 + $0x30] sm:$0xff] }
 0x476   : > { %v2132_v59 = vpop.permute.xlu1 %2131  ;;  %v2122_v12 = vpop.permute.xlu0 %2121 }
 0x477   : > { %3601 = vmatprep.subr.bf16.mxu0 %v2160_v60  ;;  %v2153_v29 = vmul.f32 %v3477_v17, %v2132_v59  ;;  %v2151_v32 = vmul.f32 %v3473_v1, %v2122_v12  ;;  %v2762_v59 = vld [vmem:[%s5502_s17 + $0x18] sm:$0xff]  ;;  %v2761_v17 = vld [vmem:[%s5502_s17 + $0x10] sm:$0xff]  ;;  %v3441_v12 = vld [vmem:[%s5499_s14] ss:$0 sm:$0xff] }
 0x478   : > { %3602 = vmatpush3.bf16.msra.mxu0 %v2160_v60  ;;  %v2763_v60 = vld [vmem:[%s5502_s17 + $0x20] sm:$0xff] }
 0x47a   : > { %v2137_v28 = vpop.permute.xlu1 %2136  ;;  %v2112_v5 = vpop.permute.xlu0 %2111 }
 0x47b   : > { %v2154_v24 = vmul.f32 %v3478_v43, %v2137_v28  ;;  %v2149_v48 = vmul.f32 %v3469_v33, %v2112_v5  ;;  %v2760_v43 = vld [vmem:[%s5502_s17 + $0x8] sm:$0xff] }
 0x47d   : > { %v2159_v42 = vpack.c.bf16 %v2154_v24, %v2153_v29 }
 0x47e   : > { %v2127_v58 = vpop.permute.xlu1 %2126 }
 0x47f   : > { %v2152_v16 = vmul.f32 %v3474_v53, %v2127_v58  ;;  %3603 = vmatprep.subr.bf16.mxu0 %v2159_v42 }
 0x480   : > { %3604 = vmatpush3.bf16.msra.mxu0 %v2159_v42 }
 0x481   : > { %v2158_v14 = vpack.c.bf16 %v2152_v16, %v2151_v32 }
 0x482   : > { %v2117_v38 = vpop.permute.xlu1 %2116 }
 0x483   : > { %v2150_v31 = vmul.f32 %v3470_v13, %v2117_v38  ;;  %3605 = vmatprep.subr.bf16.mxu0 %v2158_v14 }
 0x484   : > { %3606 = vmatpush3.bf16.msra.mxu0 %v2158_v14 }
 0x485   : > { %v2157_v23 = vpack.c.bf16 %v2150_v31, %v2149_v48 }
 0x487   : > { %3607 = vmatprep.subr.bf16.mxu0 %v2157_v23 }
 0x488   : > { %3608 = vmatpush3.bf16.msra.mxu0 %v2157_v23 }
 0x489   : > { %3629 = vmatprep.subr.mxu0 %v3972_v25 }
 0x48b   : > { %3610 = vmatmul.mubr.msk.bf16.vlgmr.msra.gmra.mxu0 %vm1547_vm2, %v2162_v30 }
 0x48c   : > { %3613 = vmatprep.mubr.msk.bf16.mxu0 %vm1547_vm2, %v2163_v11  ;;  %3630 = vmatpush3.msra.mxu0 %v2770_v7 }
 0x48d   : > { %3631 = vmatprep.subr.mxu0 %v3972_v25 }
 0x48e   : > { %3632 = vmatpush3.msra.mxu0 %v2769_v10 }
 0x48f   : > { %3633 = vmatprep.subr.mxu0 %v3972_v25 }
 0x490   : > { %3634 = vmatpush3.msra.mxu0 %v2768_v8 }
 0x491   : > { %3635 = vmatprep.subr.mxu0 %v3972_v25 }
 0x492   : > { %3636 = vmatpush3.msra.mxu0 %v2767_v55 }
 0x493   : > { %3614 = vmatmul.mubr.msk.bf16.gmra.mxu0 %vm1547_vm2, %v2164_v39  ;;  %3637 = vmatprep.subr.mxu0 %v3972_v25 }
 0x494   : > { %3653 = vmatprep.mubr.msk.f32.mxu0 %vm3973_vm5, %v3972_v25  ;;  %3638 = vmatpush3.msra.mxu0 %v2766_v21 }
 0x495   : > { %3639 = vmatprep.subr.mxu0 %v3972_v25 }
 0x496   : > { %3640 = vmatpush3.msra.mxu0 %v2765_v44 }
 0x497   : > { %3641 = vmatprep.subr.mxu0 %v3972_v25 }
 0x498   : > { %3642 = vmatpush3.msra.mxu0 %v2764_v50 }
 0x499   : > { %3643 = vmatprep.subr.mxu0 %v3972_v25 }
 0x49a   : > { %3644 = vmatpush3.msra.mxu0 %v2763_v60 }
 0x49b   : > { %3645 = vmatprep.subr.mxu0 %v3972_v25 }
 0x49c   : > { %3646 = vmatpush3.msra.mxu0 %v2762_v59 }
 0x49d   : > { %3647 = vmatprep.subr.mxu0 %v3972_v25 }
 0x49e   : > { %3648 = vmatpush3.msra.mxu0 %v2761_v17  ;;  %v2485_v17 = vld [vmem:[#allocation3 + $0x2] sm:$0xff] }
 0x49f   : > { %3649 = vmatprep.subr.mxu0 %v3972_v25 }
 0x4a0   : > { %3650 = vmatpush3.msra.mxu0 %v2760_v43 }
 0x4a1   : > { %3651 = vmatprep.subr.mxu0 %v3972_v25 }
 0x4a2   : > { %3652 = vmatpush3.msra.mxu0 %v2759_v46 }
 0x54b   : > { %v3611_v30 = vpop.f32.mrf.mxu0 }
 0x54c   : > { %v4926_v51 = vadd.f32 %v3611_v30, %v3436_v6 }
 0x54d   : > { %v2218_v54 = vpop.f32.mrf.mxu0 }
 0x54e   : > { %v4922_v39 = vadd.f32 %v3436_v6, %v2218_v54  ;;  %5574 = vst [vmem:[#allocation13_spill] sm:$0xff] %v4926_v51  ;;  %v2427_v54 = vld [vmem:[%s5500_s15] sm:$0xff] }
 0x54f   : > { %v3612_v37 = vpop.f32.mrf.mxu0  ;;  %v5055_v21 = vrot.slane %v2427_v54, %v4239_v45 }
 0x550   : > { %v4920_v18 = vadd.f32 %v3612_v37, %v3436_v6  ;;  %5572 = vst [vmem:[#allocation11_spill] sm:$0xff] %v4922_v39 }
 0x551   : > { %v2221_v11 = vpop.f32.mrf.mxu0  ;;  %v2497_v45 = vmul.f32 %v5055_v21, %v2485_v17 }
 0x552   : > { %v4924_v40 = vadd.f32 %v3436_v6, %v2221_v11  ;;  %v2250_v2 = vpack.c.bf16 %v4920_v18, %v4926_v51 }
 0x553   : > { %v3615_v26 = vpop.f32.mrf.mxu0 }
 0x554   : > { %5573 = vst [vmem:[#allocation12_spill] sm:$0xff] %v4924_v40  ;;  %v2249_v22 = vpack.c.bf16 %v4924_v40, %v4922_v39  ;;  %v4940_v3 = vadd.f32 %v3615_v26, %v3436_v6 }
 0x555   : > { %v2234_v19 = vpop.f32.mrf.mxu0 }
 0x556   : > { %3621 = vmatprep.mubr.msk.bf16.mxu1 %vm2272_vm8, %v2249_v22  ;;  %v4936_v15 = vadd.f32 %v3436_v6, %v2234_v19  ;;  %5578 = vst [vmem:[#allocation17_spill] sm:$0xff] %v4940_v3  ;;  %v5049_v22 = vrot.slane %v2427_v54, %v4213_v34 }
 0x557   : > { %v3616_v0 = vpop.f32.mrf.mxu0  ;;  %3622 = vmatmul.mubr.msk.bf16.vlgmr.msra.gmra.mxu1 %vm2272_vm8, %v2250_v2  ;;  %v5052_v2 = vrot.slane %v2427_v54, %v4218_v36 }
 0x558   : > { %v4934_v4 = vadd.f32 %v3616_v0, %v3436_v6  ;;  %5576 = vst [vmem:[#allocation15_spill] sm:$0xff] %v4936_v15 }
 0x559   : > { %v2237_v35 = vpop.f32.mrf.mxu0 }
 0x55a   : > { %5575 = vst [vmem:[#allocation14_spill] sm:$0xff] %v4934_v4  ;;  %v4938_v41 = vadd.f32 %v3436_v6, %v2237_v35  ;;  %v2252_v49 = vpack.c.bf16 %v4934_v4, %v4940_v3  ;;  %v2429_v35 = vld [vmem:[#allocation3] sm:$0xff] }
 0x55b   : > { %v2441_v44 = vmul.f32 %v5052_v2, %v2429_v35 }
 0x55c   : > { %5577 = vst [vmem:[#allocation16_spill] sm:$0xff] %v4938_v41  ;;  %v2251_v47 = vpack.c.bf16 %v4938_v41, %v4936_v15 }
 0x55e   : > { %3625 = vmatprep.mubr.msk.bf16.mxu1 %vm2272_vm8, %v2251_v47  ;;  %v2457_v47 = vld [vmem:[#allocation3 + $0x1] sm:$0xff] }
 0x55f   : > { %3626 = vmatmul.mubr.msk.bf16.gmra.mxu1 %vm2272_vm8, %v2252_v49  ;;  %v2469_v34 = vmul.f32 %v5049_v22, %v2457_v47 }
 0x617   : > { %v3623_v28 = vpop.f32.mrf.mxu1 }
 0x618   : > { %v2332_v1 = vadd.f32 %v3623_v28, %v3441_v12 }
 0x619   : > { %v2323_v29 = vpop.f32.mrf.mxu1 }
 0x61a   : > { %v2356_v24 = vmul.f32 0.5, %v2332_v1  ;;  %v2324_v53 = vadd.f32 %v3441_v12, %v2323_v29  ;;  %v2477_v29 = vadd.f32 %v2469_v34, %v2441_v44 }
 0x61b   : > { %v3624_v63 = vpop.f32.mrf.mxu1 }
 0x61c   : > { %3832 = vtanh.f32 %v2356_v24  ;;  %v2354_v42 = vmul.f32 0.5, %v2324_v53  ;;  %v2335_v58 = vadd.f32 %v3624_v63, %v3441_v12 }
 0x61d   : > { %v2326_v32 = vpop.f32.mrf.mxu1 }
 0x61e   : > { %3834 = vtanh.f32 %v2354_v42  ;;  %v2357_v33 = vmul.f32 0.5, %v2335_v58  ;;  %v2327_v16 = vadd.f32 %v3441_v12, %v2326_v32  ;;  %v2605_v32 = vld [vmem:[#allocation3 + $0x90] sm:$0xff] }
 0x61f   : > { %v3627_v13 = vpop.f32.mrf.mxu1 }
 0x620   : > { %3836 = vtanh.f32 %v2357_v33  ;;  %v2355_v25 = vmul.f32 0.5, %v2327_v16  ;;  %v2348_v5 = vadd.f32 %v3627_v13, %v3441_v12  ;;  %v5064_v13 = vrot.slane %v2427_v54, %v5564_v20 }
 0x621   : > { %v2339_v14 = vpop.f32.mrf.mxu1 }
 0x622   : > { %3838 = vtanh.f32 %v2355_v25  ;;  %v2360_v38 = vmul.f32 0.5, %v2348_v5  ;;  %v5036_v48 = vadd.f32 %v3441_v12, %v2339_v14  ;;  %v5067_v25 = vrot.slane %v2427_v54, %v5563_v9 }
 0x623   : > { %v3628_v31 = vpop.f32.mrf.mxu1  ;;  %v5073_v14 = vrot.slane %v2427_v54, %v4264_v61  ;;  %v5083_v9 = vrot.slane %v2427_v54, %v4260_v57 }
 0x624   : > { %3840 = vtanh.f32 %v2360_v38  ;;  %v2358_v23 = vmul.f32 0.5, %v5036_v48  ;;  %v5039_v52 = vadd.f32 %v3628_v31, %v3441_v12 }
 0x625   : > { %v2342_v27 = vpop.f32.mrf.mxu1 }
 0x626   : > { %3842 = vtanh.f32 %v2358_v23  ;;  %v2361_v62 = vmul.f32 0.5, %v5039_v52  ;;  %v5042_v30 = vadd.f32 %v3441_v12, %v2342_v27 }
 0x628   : > { %3844 = vtanh.f32 %v2361_v62  ;;  %v2359_v37 = vmul.f32 0.5, %v5042_v30 }
 0x629   : > { %v3833_v6 = vpop.eup %3832 }
 0x62a   : > { %v2372_v11 = vmul.f32 0.5, %v3833_v6  ;;  %3846 = vtanh.f32 %v2359_v37  ;;  %v5086_v37 = vmul.f32 %v5067_v25, %v2605_v32 }
 0x62b   : > { %v3835_v26 = vpop.eup %3834 }
 0x62c   : > { %v2380_v19 = vadd.f32 0.5, %v2372_v11  ;;  %v2370_v0 = vmul.f32 0.5, %v3835_v26 }
 0x62d   : > { %v3837_v49 = vpop.eup %3836 }
 0x62e   : > { %v2388_v7 = vmul.f32 %v2380_v19, %v2332_v1  ;;  %v2378_v10 = vadd.f32 0.5, %v2370_v0  ;;  %v2373_v8 = vmul.f32 0.5, %v3837_v49 }
 0x62f   : > { %v3839_v55 = vpop.eup %3838 }
 0x630   : > { %2421 = vst.msk [vmem:[#allocation3 + $0x31] sm:$0xff] %vm2394_vm9, %v2388_v7  ;;  %v2386_v50 = vmul.f32 %v2378_v10, %v2324_v53  ;;  %v2381_v60 = vadd.f32 0.5, %v2373_v8  ;;  %v2371_v59 = vmul.f32 0.5, %v3839_v55  ;;  %v2633_v53 = vld [vmem:[#allocation3 + $0x91] sm:$0xff] }
 0x631   : > { %v3841_v43 = vpop.eup %3840  ;;  %v5089_v61 = vmul.f32 %v5064_v13, %v2633_v53 }
 0x632   : > { %2419 = vst.msk [vmem:[#allocation3 + $0x11] sm:$0xff] %vm2394_vm9, %v2386_v50  ;;  %v2389_v46 = vmul.f32 %v2381_v60, %v2335_v58  ;;  %v2379_v12 = vadd.f32 0.5, %v2371_v59  ;;  %v2376_v28 = vmul.f32 0.5, %v3841_v43  ;;  %v5070_v58 = vrot.slane %v2427_v54, %v4258_v56 }
 0x633   : > { %v3843_v1 = vpop.eup %3842  ;;  %v2505_v56 = vadd.f32 %v2497_v45, %v2477_v29 }
 0x634   : > { %2422 = vst.msk [vmem:[#allocation3 + $0x41] sm:$0xff] %vm2394_vm9, %v2389_v46  ;;  %v2387_v24 = vmul.f32 %v2379_v12, %v2327_v16  ;;  %v2384_v63 = vadd.f32 0.5, %v2376_v28  ;;  %v2374_v42 = vmul.f32 0.5, %v3843_v1 }
 0x635   : > { %v3845_v33 = vpop.eup %3844 }
 0x636   : > { %2420 = vst.msk [vmem:[#allocation3 + $0x21] sm:$0xff] %vm2394_vm9, %v2387_v24  ;;  %v2392_v16 = vmul.f32 %v2384_v63, %v2348_v5  ;;  %v2382_v38 = vadd.f32 0.5, %v2374_v42  ;;  %v2377_v31 = vmul.f32 0.5, %v3845_v33 }
 0x637   : > { %v3847_v23 = vpop.eup %3846  ;;  %v5076_v27 = vld [vmem:[#allocation3 + $0x30] sm:$0xff] }
 0x638   : > { %v5078_v62 = vld [vmem:[#allocation3 + $0x31] sm:$0xff]  ;;  %v2444_v5 = vmul.f32 %v5052_v2, %v5076_v27  ;;  %2425 = vst.msk [vmem:[#allocation3 + $0x71] sm:$0xff] %vm2394_vm9, %v2392_v16  ;;  %v2390_v11 = vmul.f32 %v2382_v38, %v5036_v48  ;;  %v2385_v26 = vadd.f32 0.5, %v2377_v31  ;;  %v2375_v57 = vmul.f32 0.5, %v3847_v23 }
 0x639   : > { %v5080_v20 = vld [vmem:[#allocation3 + $0x32] sm:$0xff]  ;;  %v2472_v6 = vmul.f32 %v5049_v22, %v5078_v62  ;;  %v5103_v47 = vmul.f32 %v5070_v58, %v5076_v27  ;;  %v5107_v49 = vmul.f32 %v5073_v14, %v5078_v62 }
 0x63a   : > { %v2430_v54 = vld [vmem:[#allocation3 + $0x10] sm:$0xff]  ;;  %v2500_v35 = vmul.f32 %v5055_v21, %v5080_v20  ;;  %2423 = vst.msk [vmem:[#allocation3 + $0x51] sm:$0xff] %vm2394_vm9, %v2390_v11  ;;  %v2393_v48 = vmul.f32 %v2385_v26, %v5039_v52  ;;  %v2383_v50 = vadd.f32 0.5, %v2375_v57 }
 0x63b   : > { %v2458_v19 = vld [vmem:[#allocation3 + $0x11] sm:$0xff]  ;;  %v2442_v7 = vmul.f32 %v5052_v2, %v2430_v54  ;;  %v2480_v8 = vadd.f32 %v2472_v6, %v2444_v5  ;;  %v5113_v55 = vld [vmem:[#allocation3 + $0x40] sm:$0xff]  ;;  %v2525_v59 = vmul.f32 %v5070_v58, %v2430_v54 }
 0x63c   : > { %v5097_v0 = vld [vmem:[#allocation3 + $0x12] sm:$0xff]  ;;  %v2470_v10 = vmul.f32 %v5049_v22, %v2458_v19  ;;  %v5115_v44 = vld [vmem:[#allocation3 + $0x41] sm:$0xff]  ;;  %v2553_v17 = vmul.f32 %v5073_v14, %v2458_v19  ;;  %v2445_v52 = vmul.f32 %v5052_v2, %v5113_v55  ;;  %2426 = vst.msk [vmem:[#allocation3 + $0x81] sm:$0xff] %vm2394_vm9, %v2393_v48  ;;  %v2391_v29 = vmul.f32 %v2383_v50, %v5042_v30 }
 0x63d   : > { %v5117_v34 = vld [vmem:[#allocation3 + $0x42] sm:$0xff]  ;;  %v2498_v60 = vmul.f32 %v5055_v21, %v5097_v0  ;;  %v2473_v43 = vmul.f32 %v5049_v22, %v5115_v44  ;;  %v2508_v24 = vadd.f32 %v2500_v35, %v2480_v8  ;;  %v2528_v63 = vmul.f32 %v5070_v58, %v5113_v55 }
 0x63e   : > { %v2501_v46 = vmul.f32 %v5055_v21, %v5117_v34  ;;  %v2478_v12 = vadd.f32 %v2470_v10, %v2442_v7  ;;  %v5130_v28 = vld [vmem:[#allocation3 + $0x20] sm:$0xff]  ;;  %v2533_v42 = vadd.f32 %v2525_v59, %v2505_v56  ;;  %2424 = vst.msk [vmem:[#allocation3 + $0x61] sm:$0xff] %vm2394_vm9, %v2391_v29 }
 0x63f   : > { %v5132_v1 = vld [vmem:[#allocation3 + $0x21] sm:$0xff]  ;;  %v2443_v32 = vmul.f32 %v5052_v2, %v5130_v28  ;;  %v2481_v33 = vadd.f32 %v2473_v43, %v2445_v52  ;;  %v5145_v38 = vld [vmem:[#allocation3 + $0x70] sm:$0xff]  ;;  %v2526_v56 = vmul.f32 %v5070_v58, %v5130_v28  ;;  %v2536_v5 = vadd.f32 %v2528_v63, %v2508_v24 }
 0x640   : > { %v5135_v45 = vld [vmem:[#allocation3 + $0x22] sm:$0xff]  ;;  %v2471_v53 = vmul.f32 %v5049_v22, %v5132_v1  ;;  %v5147_v30 = vld [vmem:[#allocation3 + $0x71] sm:$0xff]  ;;  %v2506_v23 = vadd.f32 %v2498_v60, %v2478_v12  ;;  %v2554_v6 = vmul.f32 %v5073_v14, %v5132_v1  ;;  %v2448_v11 = vmul.f32 %v5052_v2, %v5145_v38 }
 0x641   : > { %v2499_v16 = vmul.f32 %v5055_v21, %v5135_v45  ;;  %v5149_v31 = vld [vmem:[#allocation3 + $0x72] sm:$0xff]  ;;  %v2476_v26 = vmul.f32 %v5049_v22, %v5147_v30  ;;  %v2531_v54 = vmul.f32 %v5070_v58, %v5145_v38  ;;  %v5166_v19 = vmul.f32 %v5073_v14, %v5147_v30 }
 0x642   : > { %v2504_v57 = vmul.f32 %v5055_v21, %v5149_v31  ;;  %v2434_v35 = vld [vmem:[#allocation3 + $0x50] sm:$0xff]  ;;  %v2479_v10 = vadd.f32 %v2471_v53, %v2443_v32  ;;  %v2509_v8 = vadd.f32 %v2501_v46, %v2481_v33  ;;  %v2534_v50 = vadd.f32 %v2526_v56, %v2506_v23 }
 0x643   : > { %v5168_v48 = vld [vmem:[#allocation3 + $0x51] sm:$0xff]  ;;  %v2484_v60 = vadd.f32 %v2476_v26, %v2448_v11  ;;  %v2446_v59 = vmul.f32 %v5052_v2, %v2434_v35  ;;  %v2520_v12 = vld [vmem:[#allocation3 + $0x80] sm:$0xff]  ;;  %v2529_v3 = vmul.f32 %v5070_v58, %v2434_v35  ;;  %v2556_v46 = vmul.f32 %v5073_v14, %v5115_v44 }
 0x644   : > { %v5170_v7 = vld [vmem:[#allocation3 + $0x52] sm:$0xff]  ;;  %v2474_v52 = vmul.f32 %v5049_v22, %v5168_v48  ;;  %v5177_v29 = vld [vmem:[#allocation3 + $0x81] sm:$0xff]  ;;  %v2507_v63 = vadd.f32 %v2499_v16, %v2479_v10  ;;  %v2557_v32 = vmul.f32 %v5073_v14, %v5168_v48  ;;  %v2532_v23 = vmul.f32 %v5070_v58, %v2520_v12 }
 0x645   : > { %v2502_v43 = vmul.f32 %v5055_v21, %v5170_v7  ;;  %v5179_v24 = vld [vmem:[#allocation3 + $0x82] sm:$0xff]  ;;  %v2512_v53 = vadd.f32 %v2504_v57, %v2484_v60  ;;  %v5189_v56 = vmul.f32 %v5073_v14, %v5177_v29  ;;  %v2537_v26 = vadd.f32 %v2529_v3, %v2509_v8 }
 0x646   : > { %v2482_v33 = vadd.f32 %v2474_v52, %v2446_v59  ;;  %v5193_v11 = vmul.f32 %v5083_v9, %v5179_v24  ;;  %v2535_v16 = vadd.f32 %v5103_v47, %v2507_v63  ;;  %v2561_v10 = vadd.f32 %v2553_v17, %v2533_v42  ;;  %v2435_v15 = vld [vmem:[#allocation3 + $0x60] sm:$0xff] }
 0x647   : > { %v5196_v41 = vadd.f32 %v2532_v23, %v2512_v53  ;;  %v2463_v4 = vld [vmem:[#allocation3 + $0x61] sm:$0xff]  ;;  %v2562_v59 = vadd.f32 %v2554_v6, %v2534_v50  ;;  %v2564_v52 = vadd.f32 %v2556_v46, %v2536_v5  ;;  %v2447_v51 = vmul.f32 %v5052_v2, %v2435_v15 }
 0x648   : > { %v5198_v57 = vld [vmem:[#allocation3 + $0x62] sm:$0xff]  ;;  %v2510_v60 = vadd.f32 %v2502_v43, %v2482_v33  ;;  %v2475_v40 = vmul.f32 %v5049_v22, %v2463_v4  ;;  %v2530_v47 = vmul.f32 %v5070_v58, %v2435_v15  ;;  %v2558_v3 = vmul.f32 %v5073_v14, %v2463_v4 }
 0x649   : > { %v2503_v39 = vmul.f32 %v5055_v21, %v5198_v57  ;;  %v2563_v17 = vadd.f32 %v5107_v49, %v2535_v16  ;;  %v2565_v42 = vadd.f32 %v2557_v32, %v2537_v26  ;;  %v2581_v8 = vmul.f32 %v5083_v9, %v5097_v0 }
 0x64a   : > { %v2483_v43 = vadd.f32 %v2475_v40, %v2447_v51  ;;  %v2538_v6 = vadd.f32 %v2530_v47, %v2510_v60  ;;  %v2582_v2 = vmul.f32 %v5083_v9, %v5135_v45  ;;  %v2583_v22 = vmul.f32 %v5083_v9, %v5080_v20 }
 0x64b   : > { %v2584_v21 = vmul.f32 %v5083_v9, %v5117_v34  ;;  %v2585_v58 = vmul.f32 %v5083_v9, %v5170_v7  ;;  %v2586_v14 = vmul.f32 %v5083_v9, %v5198_v57  ;;  %v2587_v0 = vmul.f32 %v5083_v9, %v5149_v31 }
 0x64c   : > { %v2511_v40 = vadd.f32 %v2503_v39, %v2483_v43  ;;  %v2566_v51 = vadd.f32 %v2558_v3, %v2538_v6  ;;  %v2589_v49 = vadd.f32 %v2581_v8, %v2561_v10  ;;  %v2590_v5 = vadd.f32 %v2582_v2, %v2562_v59 }
 0x64d   : > { %v2591_v50 = vadd.f32 %v2583_v22, %v2563_v17  ;;  %v2592_v63 = vadd.f32 %v2584_v21, %v2564_v52  ;;  %v2593_v46 = vadd.f32 %v2585_v58, %v2565_v42  ;;  %v2610_v32 = vmul.f32 %v5067_v25, %v5130_v28 }
 0x64e   : > { %v2539_v53 = vadd.f32 %v2531_v54, %v2511_v40  ;;  %v2594_v33 = vadd.f32 %v2586_v14, %v2566_v51  ;;  %v2611_v23 = vmul.f32 %v5067_v25, %v5076_v27  ;;  %v2612_v16 = vmul.f32 %v5067_v25, %v5113_v55 }
 0x64f   : > { %v2613_v9 = vmul.f32 %v5067_v25, %v2434_v35  ;;  %v2614_v39 = vmul.f32 %v5067_v25, %v2435_v15  ;;  %v2615_v26 = vmul.f32 %v5067_v25, %v5145_v38  ;;  %v2616_v10 = vmul.f32 %v5067_v25, %v2520_v12  ;;  %v3448_v15 = vld [vmem:[%s5500_s15 + $0x8] ss:$0 sm:$0xff] }
 0x650   : > { %v2567_v60 = vadd.f32 %v5166_v19, %v2539_v53  ;;  %v2618_v28 = vadd.f32 %v2610_v32, %v2589_v49  ;;  %v2619_v54 = vadd.f32 %v2611_v23, %v2590_v5  ;;  %v2620_v59 = vadd.f32 %v2612_v16, %v2591_v50  ;;  %v2661_v5 = vld [vmem:[#allocation3 + $0x92] sm:$0xff] }
 0x651   : > { %v2621_v52 = vadd.f32 %v2613_v9, %v2592_v63  ;;  %v2622_v47 = vadd.f32 %v2614_v39, %v2593_v46  ;;  %v2623_v27 = vadd.f32 %v2615_v26, %v2594_v33  ;;  %v2638_v55 = vmul.f32 %v5064_v13, %v5132_v1 }
 0x652   : > { %v2595_v35 = vadd.f32 %v2587_v0, %v2567_v60  ;;  %v2639_v38 = vmul.f32 %v5064_v13, %v5078_v62  ;;  %v2640_v25 = vmul.f32 %v5064_v13, %v5115_v44  ;;  %v2641_v19 = vmul.f32 %v5064_v13, %v5168_v48 }
 0x653   : > { %v2642_v12 = vmul.f32 %v5064_v13, %v2463_v4  ;;  %v2643_v3 = vmul.f32 %v5064_v13, %v5147_v30  ;;  %v2644_v1 = vmul.f32 %v5064_v13, %v5177_v29  ;;  %v2646_v17 = vadd.f32 %v2638_v55, %v2618_v28  ;;  %v3449_v13 = vld [vmem:[%s5501_s16] ss:$0 sm:$0xff] }
 0x654   : > { %v2624_v42 = vadd.f32 %v2616_v10, %v2595_v35  ;;  %v2647_v8 = vadd.f32 %v2639_v38, %v2619_v54  ;;  %v2648_v43 = vadd.f32 %v2640_v25, %v2620_v59  ;;  %v2649_v6 = vadd.f32 %v2641_v19, %v2621_v52 }
 0x655   : > { %v2650_v62 = vadd.f32 %v2642_v12, %v2622_v47  ;;  %v2651_v2 = vadd.f32 %v2643_v3, %v2623_v27  ;;  %v2666_v44 = vmul.f32 %v3448_v15, %v5135_v45  ;;  %v2667_v22 = vmul.f32 %v3448_v15, %v5080_v20 }
 0x656   : > { %v2652_v48 = vadd.f32 %v2644_v1, %v2624_v42  ;;  %v2668_v4 = vmul.f32 %v3448_v15, %v5117_v34  ;;  %v2669_v21 = vmul.f32 %v3448_v15, %v5170_v7  ;;  %v2670_v30 = vmul.f32 %v3448_v15, %v5198_v57 }
 0x657   : > { %v2671_v29 = vmul.f32 %v3448_v15, %v5149_v31  ;;  %v2672_v58 = vmul.f32 %v3448_v15, %v5179_v24  ;;  %v2674_v14 = vadd.f32 %v2666_v44, %v2646_v17  ;;  %v2675_v0 = vadd.f32 %v2667_v22, %v2647_v8 }
 0x658   : > { %v2676_v45 = vadd.f32 %v2668_v4, %v2648_v43  ;;  %v2677_v40 = vadd.f32 %v2669_v21, %v2649_v6  ;;  %v2678_v20 = vadd.f32 %v2670_v30, %v2650_v62  ;;  %v2568_v34 = vadd.f32 %v5189_v56, %v5196_v41 }
 0x659   : > { %v2679_v51 = vadd.f32 %v2671_v29, %v2651_v2  ;;  %v2680_v7 = vadd.f32 %v2672_v58, %v2652_v48  ;;  %v2689_v49 = vadd.f32 %v3449_v13, %v2674_v14  ;;  %v2690_v57 = vadd.f32 %v3449_v13, %v2675_v0 }
 0x65a   : > { %v2691_v50 = vadd.f32 %v3449_v13, %v2676_v45  ;;  %v2692_v63 = vadd.f32 %v3449_v13, %v2677_v40  ;;  %v2693_v46 = vadd.f32 %v3449_v13, %v2678_v20  ;;  %v2596_v31 = vadd.f32 %v5193_v11, %v2568_v34 }
 0x65b   : > { %v2694_v32 = vadd.f32 %v3449_v13, %v2679_v51  ;;  %v2695_v24 = vadd.f32 %v3449_v13, %v2680_v7  ;;  %v2697_v53 = vmul.f32 0.5, %v2689_v49  ;;  %v2698_v33 = vmul.f32 0.5, %v2690_v57 }
 0x65c   : > { %v2699_v23 = vmul.f32 0.5, %v2691_v50  ;;  %v2700_v16 = vmul.f32 0.5, %v2692_v63  ;;  %v2625_v9 = vadd.f32 %v5086_v37, %v2596_v31  ;;  %v2673_v39 = vmul.f32 %v3448_v15, %v2661_v5 }
 0x65d   : > { %v2701_v41 = vmul.f32 0.5, %v2693_v46  ;;  %3848 = vtanh.f32 %v2697_v53  ;;  %v2702_v56 = vmul.f32 0.5, %v2694_v32  ;;  %v2703_v10 = vmul.f32 0.5, %v2695_v24 }
 0x65e   : > { %3850 = vtanh.f32 %v2698_v33  ;;  %v2653_v26 = vadd.f32 %v5089_v61, %v2625_v9 }
 0x65f   : > { %3852 = vtanh.f32 %v2699_v23 }
 0x660   : > { %3854 = vtanh.f32 %v2700_v16  ;;  %v2681_v60 = vadd.f32 %v2673_v39, %v2653_v26 }
 0x661   : > { %3856 = vtanh.f32 %v2701_v41 }
 0x662   : > { %3858 = vtanh.f32 %v2702_v56  ;;  %v2696_v11 = vadd.f32 %v3449_v13, %v2681_v60 }
 0x663   : > { %3860 = vtanh.f32 %v2703_v10  ;;  %v2771_v10 = vld [vmem:[%s5503_s18] sm:$0x1] }
 0x664   : > { %v2704_v28 = vmul.f32 0.5, %v2696_v11 }
 0x666   : > { %3862 = vtanh.f32 %v2704_v28 }
 0x66a   : > { %v3849_v54 = vpop.eup %3848 }
 0x66b   : > { %v3851_v59 = vpop.eup %3850  ;;  %v2713_v37 = vmul.f32 0.5, %v3849_v54 }
 0x66c   : > { %v3853_v52 = vpop.eup %3852  ;;  %v2714_v47 = vmul.f32 0.5, %v3851_v59 }
 0x66d   : > { %v3855_v27 = vpop.eup %3854  ;;  %v2715_v55 = vmul.f32 0.5, %v3853_v52  ;;  %v2721_v15 = vadd.f32 0.5, %v2713_v37 }
 0x66e   : > { %v3857_v35 = vpop.eup %3856  ;;  %v2716_v61 = vmul.f32 0.5, %v3855_v27  ;;  %v2722_v38 = vadd.f32 0.5, %v2714_v47  ;;  %v2861_v27 = vld [vmem:[%s5504_s19 + $0x58] sm:$0xff] }
 0x66f   : > { %v3859_v25 = vpop.eup %3858  ;;  %v2717_v19 = vmul.f32 0.5, %v3857_v35  ;;  %v2723_v12 = vadd.f32 0.5, %v2715_v55  ;;  %v2729_v3 = vmul.f32 %v2721_v15, %v2689_v49  ;;  %v2860_v55 = vld [vmem:[%s5504_s19 + $0x50] sm:$0xff]  ;;  %v2858_v35 = vld [vmem:[%s5504_s19 + $0x40] sm:$0xff] }
 0x670   : > { %v3861_v1 = vpop.eup %3860  ;;  %v2718_v17 = vmul.f32 0.5, %v3859_v25  ;;  %v2724_v42 = vadd.f32 0.5, %v2716_v61  ;;  %v2730_v8 = vmul.f32 %v2722_v38, %v2690_v57  ;;  %v2856_v61 = vld [vmem:[%s5504_s19 + $0x30] sm:$0xff] }
 0x671   : > { %v2719_v43 = vmul.f32 0.5, %v3861_v1  ;;  %v2725_v6 = vadd.f32 0.5, %v2717_v19  ;;  %v5264_v62 = vmul.f32 %v2723_v12, %v2691_v50  ;;  %v2737_v2 = vsel %vm2394_vm9, %v2729_v3, 0.0 }
 0x672   : > { %v2726_v44 = vadd.f32 0.5, %v2718_v17  ;;  %v5267_v22 = vmul.f32 %v2724_v42, %v2692_v63  ;;  %v2738_v48 = vsel %vm2394_vm9, %v2730_v8, 0.0  ;;  %v3088_v4 = vpack.c.bf16 %v2730_v8, %v2729_v3  ;;  %v2854_v17 = vld [vmem:[%s5504_s19 + $0x20] sm:$0xff] }
 0x673   : > { %v3863_v21 = vpop.eup %3862  ;;  %v2727_v30 = vadd.f32 0.5, %v2719_v43  ;;  %v2739_v13 = vadd.f32 %v2738_v48, %v2737_v2  ;;  %v2740_v29 = vsel %vm2394_vm9, %v5264_v62, 0.0  ;;  %v5272_v58 = vmul.f32 %v2725_v6, %v2693_v46  ;;  %v2857_v2 = vld [vmem:[%s5504_s19 + $0x38] sm:$0xff] }
 0x674   : > { %v5274_v14 = vmul.f32 %v2726_v44, %v2694_v32  ;;  %3668 = vmatprep.mubr.msk.bf16.mxu1 %vm2394_vm9, %v3088_v4  ;;  %v2720_v0 = vmul.f32 0.5, %v3863_v21  ;;  %v3089_v45 = vpack.c.bf16 %v5267_v22, %v5264_v62  ;;  %v2742_v34 = vsel %vm2394_vm9, %v5267_v22, 0.0  ;;  %v2852_v44 = vld [vmem:[%s5504_s19 + $0x10] sm:$0xff]  ;;  %v3765_v22 = vld [vmem:[%s5508_s23] sm:$0xff]  }
 0x675   : > { %v2741_v40 = vadd.f32 %v2740_v29, %v2739_v13  ;;  %v5279_v20 = vmul.f32 %v2727_v30, %v2695_v24  ;;  %v2744_v57 = vsel %vm2394_vm9, %v5272_v58, 0.0  ;;  %v2855_v13 = vld [vmem:[%s5504_s19 + $0x28] sm:$0xff]  ;;  %v2850_v29 = vld [vmem:[%s5504_s19] sm:$0xff] }
 0x676   : > { %v2728_v51 = vadd.f32 0.5, %v2720_v0  ;;  %v3090_v7 = vpack.c.bf16 %v5274_v14, %v5272_v58  ;;  %v2746_v63 = vsel %vm2394_vm9, %v5274_v14, 0.0 }
 0x677   : > { %v2743_v49 = vadd.f32 %v2742_v34, %v2741_v40  ;;  %v2748_v46 = vsel %vm2394_vm9, %v5279_v20, 0.0 }
 0x678   : > { %v5287_v5 = vmul.f32 %v2728_v51, %v2696_v11 }
 0x679   : > { %v2745_v50 = vadd.f32 %v2744_v57, %v2743_v49  ;;  %v2853_v49 = vld [vmem:[%s5504_s19 + $0x18] sm:$0xff] }
 0x67a   : > { %v3091_v31 = vpack.c.bf16 %v5287_v5, %v5279_v20  ;;  %v2750_v53 = vsel %vm2394_vm9, %v5287_v5, 0.0 }
 0x67b   : > { %v2747_v32 = vadd.f32 %v2746_v63, %v2745_v50 }
 0x67d   : > { %v2749_v24 = vadd.f32 %v2748_v46, %v2747_v32  ;;  %v2851_v46 = vld [vmem:[%s5504_s19 + $0x8] sm:$0xff] }
 0x67f   : > { %v2751_v33 = vadd.f32 %v2750_v53, %v2749_v24 }
 0x681   : > { %v2752_v23 = vrot.slane %v2751_v33, 4 }
 0x683   : > { %v2753_v16 = vadd.f32 %v2752_v23, %v2751_v33  ;;  %v2925_v33 = vld [vmem:[%s5505_s20 + $0x58] sm:$0xff]  ;;  %v2924_v23 = vld [vmem:[%s5505_s20 + $0x50] sm:$0xff] }
 0x685   : > { %v2754_v9 = vrot.slane %v2753_v16, 2 }
 0x687   : > { %v2755_v39 = vadd.f32 %v2754_v9, %v2753_v16 }
 0x689   : > { %v2756_v41 = vrot.slane %v2755_v39, 1 }
 0x68b   : > { %v2757_v56 = vadd.f32 %v2756_v41, %v2755_v39 }
 0x68d   : > { %v2758_v26 = vmul.f32 0.015625, %v2757_v56  ;;  %v2922_v56 = vld [vmem:[%s5505_s20 + $0x40] sm:$0xff] }
 0x68f   : > { %3654 = vmatmul.mubr.msk.f32.vlgmr.msra.gmra.mxu0 %vm2394_vm9, %v2758_v26  ;;  %v2920_v26 = vld [vmem:[%s5505_s20 + $0x30] sm:$0xff] }
 0x74f   : > { %v2841_v60 = vpop.f32.mrf.mxu0 }
 0x750   : > { %v2842_v11 = vadd.f32 %v2841_v60, %v2771_v10 }
 0x751   : > { %v3655_v28 = vpop.f32.mrf.mxu0 }
 0x752   : > { %v2845_v54 = vmul.f32 0.5, %v2842_v11 }
 0x754   : > { %3864 = vtanh.f32 %v2845_v54 }
 0x761   : > { %v3865_v59 = vpop.eup %3864 }
 0x762   : > { %v2847_v37 = vmul.f32 0.5, %v3865_v59 }
 0x764   : > { %v2848_v52 = vadd.f32 0.5, %v2847_v37  ;;  %v2923_v37 = vld [vmem:[%s5505_s20 + $0x48] sm:$0xff] }
 0x766   : > { %v2849_v47 = vmul.f32 %v2848_v52, %v2842_v11  ;;  %v2918_v52 = vld [vmem:[%s5505_s20 + $0x20] sm:$0xff] }
 0x768   : > { %v2865_v15 = vrot.slane %v2849_v47, %v4218_v36  ;;  %v2859_v36 = vld [vmem:[%s5504_s19 + $0x48] sm:$0xff] }
 0x76a   : > { %v2877_v38 = vmul.f32 %v2865_v15, %v2861_v27  ;;  %v2876_v25 = vmul.f32 %v2865_v15, %v2860_v55  ;;  %v2874_v3 = vmul.f32 %v2865_v15, %v2858_v35  ;;  %v2872_v1 = vmul.f32 %v2865_v15, %v2856_v61 }
 0x76b   : > { %v2875_v43 = vmul.f32 %v2865_v15, %v2859_v36  ;;  %v2870_v6 = vmul.f32 %v2865_v15, %v2854_v17  ;;  %v2873_v21 = vmul.f32 %v2865_v15, %v2857_v2  ;;  %v2868_v30 = vmul.f32 %v2865_v15, %v2852_v44 }
 0x76c   : > { %v2911_v19 = vsel %vm2020_vm6, %v2877_v38, 0.0  ;;  %v2908_v12 = vsel %vm2020_vm6, %v2876_v25, 0.0  ;;  %v2902_v42 = vsel %vm2020_vm6, %v2874_v3, 0.0  ;;  %v2896_v8 = vsel %vm2020_vm6, %v2872_v1, 0.0  ;;  %v2921_v38 = vld [vmem:[%s5505_s20 + $0x38] sm:$0xff]  ;;  %v2916_v25 = vld [vmem:[%s5505_s20 + $0x10] sm:$0xff] }
 0x76d   : > { %2912 = vadd.xlane.f32.xlu1 %v2911_v19  ;;  %2909 = vadd.xlane.f32.xlu0 %v2908_v12  ;;  %v2905_v48 = vsel %vm2020_vm6, %v2875_v43, 0.0  ;;  %v2890_v4 = vsel %vm2020_vm6, %v2870_v6, 0.0  ;;  %v2899_v0 = vsel %vm2020_vm6, %v2873_v21, 0.0  ;;  %v2884_v40 = vsel %vm2020_vm6, %v2868_v30, 0.0  ;;  %v2917_v30 = vld [vmem:[%s5505_s20 + $0x18] sm:$0xff] }
 0x76e   : > { %v2871_v34 = vmul.f32 %v2865_v15, %v2855_v13  ;;  %v2866_v51 = vmul.f32 %v2865_v15, %v2850_v29  ;;  %v2869_v63 = vmul.f32 %v2865_v15, %v2853_v49  ;;  %v2867_v24 = vmul.f32 %v2865_v15, %v2851_v46  ;;  %v2915_v46 = vld [vmem:[%s5505_s20 + $0x8] sm:$0xff] }
 0x770   : > { %v2893_v57 = vsel %vm2020_vm6, %v2871_v34, 0.0  ;;  %v2878_v50 = vsel %vm2020_vm6, %v2866_v51, 0.0  ;;  %v2887_v32 = vsel %vm2020_vm6, %v2869_v63, 0.0  ;;  %v2881_v53 = vsel %vm2020_vm6, %v2867_v24, 0.0 }
 0x771   : > { %2903 = vadd.xlane.f32.xlu0 %v2902_v42  ;;  %2897 = vadd.xlane.f32.xlu1 %v2896_v8  ;;  %v2919_v42 = vld [vmem:[%s5505_s20 + $0x28] sm:$0xff]  ;;  %v2914_v8 = vld [vmem:[%s5505_s20] sm:$0xff] }
 0x775   : > { %2906 = vadd.xlane.f32.xlu0 %v2905_v48  ;;  %2891 = vadd.xlane.f32.xlu1 %v2890_v4 }
 0x779   : > { %2900 = vadd.xlane.f32.xlu0 %v2899_v0  ;;  %2885 = vadd.xlane.f32.xlu1 %v2884_v40 }
 0x77d   : > { %2894 = vadd.xlane.f32.xlu0 %v2893_v57  ;;  %2879 = vadd.xlane.f32.xlu1 %v2878_v50 }
 0x781   : > { %2888 = vadd.xlane.f32.xlu0 %v2887_v32 }
 0x785   : > { %2882 = vadd.xlane.f32.xlu0 %v2881_v53 }
 0x7f6   : > { %v2913_v16 = vpop.xlane.xlu1 %2912  ;;  %v2910_v9 = vpop.xlane.xlu0 %2909 }
 0x7f7   : > { %v2937_v39 = vadd.f32 %v2925_v33, %v2913_v16  ;;  %v2936_v41 = vadd.f32 %v2924_v23, %v2910_v9 }
 0x7f9   : > { %v2949_v10 = vmul.f32 0.5, %v2937_v39  ;;  %v2948_v60 = vmul.f32 0.5, %v2936_v41 }
 0x7fa   : > { %v2904_v11 = vpop.xlane.xlu0 %2903  ;;  %v2898_v28 = vpop.xlane.xlu1 %2897 }
 0x7fb   : > { %3866 = vtanh.f32 %v2949_v10  ;;  %v2934_v54 = vadd.f32 %v2922_v56, %v2904_v11  ;;  %v2932_v59 = vadd.f32 %v2920_v26, %v2898_v28 }
 0x7fc   : > { %3868 = vtanh.f32 %v2948_v60 }
 0x7fd   : > { %v2946_v47 = vmul.f32 0.5, %v2934_v54  ;;  %v2944_v27 = vmul.f32 0.5, %v2932_v59 }
 0x7fe   : > { %v2907_v55 = vpop.xlane.xlu0 %2906  ;;  %v2892_v15 = vpop.xlane.xlu1 %2891 }
 0x7ff   : > { %3870 = vtanh.f32 %v2946_v47  ;;  %v2935_v35 = vadd.f32 %v2923_v37, %v2907_v55  ;;  %v2930_v61 = vadd.f32 %v2918_v52, %v2892_v15 }
 0x800   : > { %3872 = vtanh.f32 %v2944_v27 }
 0x801   : > { %v2947_v19 = vmul.f32 0.5, %v2935_v35  ;;  %v2942_v12 = vmul.f32 0.5, %v2930_v61 }
 0x802   : > { %v2901_v3 = vpop.xlane.xlu0 %2900  ;;  %v2886_v1 = vpop.xlane.xlu1 %2885 }
 0x803   : > { %3874 = vtanh.f32 %v2947_v19  ;;  %v2933_v36 = vadd.f32 %v2921_v38, %v2901_v3  ;;  %v2928_v17 = vadd.f32 %v2916_v25, %v2886_v1 }
 0x804   : > { %3876 = vtanh.f32 %v2942_v12 }
 0x805   : > { %v2945_v43 = vmul.f32 0.5, %v2933_v36  ;;  %v2940_v6 = vmul.f32 0.5, %v2928_v17 }
 0x806   : > { %v2895_v2 = vpop.xlane.xlu0 %2894  ;;  %v2880_v44 = vpop.xlane.xlu1 %2879 }
 0x807   : > { %3878 = vtanh.f32 %v2945_v43  ;;  %v2931_v48 = vadd.f32 %v2919_v42, %v2895_v2  ;;  %v2926_v4 = vadd.f32 %v2914_v8, %v2880_v44  ;;  %v3514_v42 = vld [vmem:[%s5506_s21 + $0x28] sm:$0xff]  }
 0x808   : > { %v3867_v21 = vpop.eup %3866  ;;  %3880 = vtanh.f32 %v2940_v6  ;;  %v3506_v8 = vunpack.c.h.bf16 %v3514_v42  ;;  %v3505_v43 = vunpack.c.l.bf16 %v3514_v42 }
 0x809   : > { %v3869_v13 = vpop.eup %3868  ;;  %v2943_v29 = vmul.f32 0.5, %v2931_v48  ;;  %v2938_v0 = vmul.f32 0.5, %v2926_v4  ;;  %v2973_v40 = vmul.f32 0.5, %v3867_v21  ;;  %v3513_v4 = vld [vmem:[%s5506_s21 + $0x20] sm:$0xff]  }
 0x80a   : > { %v2889_v34 = vpop.xlane.xlu0 %2888  ;;  %v2972_v51 = vmul.f32 0.5, %v3869_v13 }
 0x80b   : > { %3882 = vtanh.f32 %v2943_v29  ;;  %v2929_v49 = vadd.f32 %v2917_v30, %v2889_v34  ;;  %v2985_v57 = vadd.f32 0.5, %v2973_v40  ;;  %v3501_v29 = vunpack.c.l.bf16 %v3513_v4  ;;  %v3512_v40 = vld [vmem:[%s5506_s21 + $0x18] sm:$0xff]  }
 0x80c   : > { %v3871_v50 = vpop.eup %3870  ;;  %3884 = vtanh.f32 %v2938_v0  ;;  %v2984_v63 = vadd.f32 0.5, %v2972_v51  ;;  %v3502_v0 = vunpack.c.h.bf16 %v3513_v4  ;;  %v3497_v51 = vunpack.c.l.bf16 %v3512_v40 }
 0x80d   : > { %v3873_v32 = vpop.eup %3872  ;;  %v2941_v24 = vmul.f32 0.5, %v2929_v49  ;;  %3067 = vperm.xlu0 %3757, %v2985_v57   ;;  %v2970_v53 = vmul.f32 0.5, %v3871_v50  ;;  %v3498_v50 = vunpack.c.h.bf16 %v3512_v40  ;;  %v5582_v40 = vld [vmem:[#allocation14_spill] sm:$0xff] }
 0x80e   : > { %3062 = vperm.xlu1 %3760, %v2984_v63   ;;  %v2883_v33 = vpop.xlane.xlu0 %2882  ;;  %v2968_v23 = vmul.f32 0.5, %v3873_v32  ;;  %v3511_v63 = vld [vmem:[%s5506_s21 + $0x10] sm:$0xff]  }
 0x80f   : > { %3886 = vtanh.f32 %v2941_v24  ;;  %v2927_v16 = vadd.f32 %v2915_v46, %v2883_v33  ;;  %v2982_v9 = vadd.f32 0.5, %v2970_v53  ;;  %v3493_v33 = vunpack.c.l.bf16 %v3511_v63 }
 0x810   : > { %v3875_v39 = vpop.eup %3874  ;;  %v2980_v41 = vadd.f32 0.5, %v2968_v23 }
 0x811   : > { %v3877_v56 = vpop.eup %3876  ;;  %v2939_v26 = vmul.f32 0.5, %v2927_v16  ;;  %v2971_v10 = vmul.f32 0.5, %v3875_v39  ;;  %v3494_v16 = vunpack.c.h.bf16 %v3511_v63  ;;  %v5585_v63 = vld [vmem:[#allocation17_spill] sm:$0xff] }
 0x812   : > { %3042 = vperm.xlu0 %3757, %v2980_v41   ;;  %3052 = vperm.xlu1 %3760, %v2982_v9   ;;  %v2966_v60 = vmul.f32 0.5, %v3877_v56  ;;  %v3510_v9 = vld [vmem:[%s5506_s21 + $0x8] sm:$0xff]  }
 0x813   : > { %3888 = vtanh.f32 %v2939_v26  ;;  %v2983_v11 = vadd.f32 0.5, %v2971_v10  ;;  %v3489_v10 = vunpack.c.l.bf16 %v3510_v9 }
 0x814   : > { %v3879_v28 = vpop.eup %3878  ;;  %v2978_v54 = vadd.f32 0.5, %v2966_v60 }
 0x815   : > { %v3881_v59 = vpop.eup %3880  ;;  %v2969_v37 = vmul.f32 0.5, %v3879_v28  ;;  %v3484_v28 = vld [vmem:[%s5506_s21] sm:$0xff]  }
 0x816   : > { %3032 = vperm.xlu0 %3757, %v2978_v54   ;;  %3057 = vperm.xlu1 %3760, %v2983_v11   ;;  %v2964_v52 = vmul.f32 0.5, %v3881_v59  ;;  %v3490_v11 = vunpack.c.h.bf16 %v3510_v9 }
 0x817   : > { %v2981_v47 = vadd.f32 0.5, %v2969_v37 }
 0x818   : > { %v3883_v27 = vpop.eup %3882  ;;  %v2976_v55 = vadd.f32 0.5, %v2964_v52  ;;  %v3485_v52 = vunpack.c.l.bf16 %v3484_v28 }
 0x819   : > { %v3885_v15 = vpop.eup %3884  ;;  %v2967_v35 = vmul.f32 0.5, %v3883_v27  ;;  %v3486_v27 = vunpack.c.h.bf16 %v3484_v28 }
 0x81a   : > { %3022 = vperm.xlu0 %3757, %v2976_v55   ;;  %3047 = vperm.xlu1 %3760, %v2981_v47   ;;  %v2962_v61 = vmul.f32 0.5, %v3885_v15 }
 0x81b   : > { %v2979_v38 = vadd.f32 0.5, %v2967_v35 }
 0x81c   : > { %v3887_v25 = vpop.eup %3886  ;;  %v2974_v19 = vadd.f32 0.5, %v2962_v61 }
 0x81d   : > { %v2965_v12 = vmul.f32 0.5, %v3887_v25 }
 0x81e   : > { %3037 = vperm.xlu1 %3760, %v2979_v38   ;;  %3012 = vperm.xlu0 %3757, %v2974_v19   ;;  %v3764_v19 = vld [vmem:[%s5508_s23 + $0x8] ss:$0 sps:$4 sm:$0xff]  }
 0x81f   : > { %v2977_v3 = vadd.f32 0.5, %v2965_v12  ;;  %3689 = vmatprep.subr.msk.bf16.mxu0 %vm2285_vm7, %v3764_v19  ;;  %v3220_v62 = vsel %vm2285_vm7, %v3764_v19, 0 }
 0x820   : > { %v3889_v1 = vpop.eup %3888  ;;  %3677 = vmatpush3.bf16.msra.mxu0 %v3220_v62 }
 0x821   : > { %v2963_v36 = vmul.f32 0.5, %v3889_v1  ;;  %3678 = vmatprep.subr.bf16.mxu0 %v3765_v22 }
 0x822   : > { %3027 = vperm.xlu1 %3760, %v2977_v3  }
 0x823   : > { %v2975_v17 = vadd.f32 0.5, %v2963_v36 }
 0x824   : > { %3679 = vmatpush3.bf16.msra.mxu0 %v3765_v22 }
 0x826   : > { %3017 = vperm.xlu1 %3760, %v2975_v17   ;;  %v5579_v17 = vld [vmem:[#allocation11_spill] sm:$0xff] }
 0x888   : > { %v3068_v6 = vpop.permute.xlu0 %3067 }
 0x889   : > { %v3081_v2 = vmul.f32 %v3506_v8, %v3068_v6  ;;  %v3063_v44 = vpop.permute.xlu1 %3062  ;;  %v5580_v8 = vld [vmem:[#allocation12_spill] sm:$0xff]  ;;  %v5581_v6 = vld [vmem:[#allocation13_spill] sm:$0xff] }
 0x88a   : > { %v3080_v48 = vmul.f32 %v3505_v43, %v3063_v44 }
 0x88c   : > { %v3087_v21 = vpack.c.bf16 %v3081_v2, %v3080_v48 }
 0x88d   : > { %v3043_v30 = vpop.permute.xlu0 %3042  ;;  %v3053_v13 = vpop.permute.xlu1 %3052 }
 0x88e   : > { %3656 = vmatprep.subr.bf16.mxu1 %v3087_v21  ;;  %v3078_v49 = vmul.f32 %v3501_v29, %v3053_v13  ;;  %v3076_v53 = vmul.f32 %v3497_v51, %v3043_v30  ;;  %v5583_v51 = vld [vmem:[#allocation15_spill] sm:$0xff] }
 0x88f   : > { %3657 = vmatpush3.bf16.msra.mxu1 %v3087_v21 }
 0x891   : > { %v3058_v34 = vpop.permute.xlu1 %3057  ;;  %v3033_v46 = vpop.permute.xlu0 %3032 }
 0x892   : > { %v3079_v57 = vmul.f32 %v3502_v0, %v3058_v34  ;;  %v3074_v26 = vmul.f32 %v3493_v33, %v3033_v46 }
 0x894   : > { %v3086_v32 = vpack.c.bf16 %v3079_v57, %v3078_v49  ;;  %v5584_v57 = vld [vmem:[#allocation16_spill] sm:$0xff] }
 0x895   : > { %v3048_v24 = vpop.permute.xlu1 %3047  ;;  %v3023_v41 = vpop.permute.xlu0 %3022 }
 0x896   : > { %v3077_v23 = vmul.f32 %v3498_v50, %v3048_v24  ;;  %3658 = vmatprep.subr.bf16.mxu1 %v3086_v32  ;;  %v3072_v37 = vmul.f32 %v3489_v10, %v3023_v41 }
 0x897   : > { %3659 = vmatpush3.bf16.msra.mxu1 %v3086_v32 }
 0x898   : > { %v3085_v39 = vpack.c.bf16 %v3077_v23, %v3076_v53  ;;  %v3456_v53 = vld [vmem:[%s5509_s24] ss:$0 sm:$0xff] }
 0x899   : > { %v3038_v56 = vpop.permute.xlu1 %3037  ;;  %v3013_v55 = vpop.permute.xlu0 %3012 }
 0x89a   : > { %v3075_v60 = vmul.f32 %v3494_v16, %v3038_v56  ;;  %3660 = vmatprep.subr.bf16.mxu1 %v3085_v39  ;;  %v3070_v61 = vmul.f32 %v3485_v52, %v3013_v55 }
 0x89b   : > { %3661 = vmatpush3.bf16.msra.mxu1 %v3085_v39 }
 0x89c   : > { %v3084_v54 = vpack.c.bf16 %v3075_v60, %v3074_v26 }
 0x89d   : > { %v3028_v59 = vpop.permute.xlu1 %3027 }
 0x89e   : > { %v3073_v47 = vmul.f32 %v3490_v11, %v3028_v59  ;;  %3662 = vmatprep.subr.bf16.mxu1 %v3084_v54 }
 0x89f   : > { %3663 = vmatpush3.bf16.msra.mxu1 %v3084_v54 }
 0x8a0   : > { %v3083_v15 = vpack.c.bf16 %v3073_v47, %v3072_v37 }
 0x8a1   : > { %v3018_v35 = vpop.permute.xlu1 %3017 }
 0x8a2   : > { %v3071_v38 = vmul.f32 %v3486_v27, %v3018_v35  ;;  %3664 = vmatprep.subr.bf16.mxu1 %v3083_v15 }
 0x8a3   : > { %3665 = vmatpush3.bf16.msra.mxu1 %v3083_v15 }
 0x8a4   : > { %v3082_v25 = vpack.c.bf16 %v3071_v38, %v3070_v61 }
 0x8a6   : > { %3666 = vmatprep.subr.bf16.mxu1 %v3082_v25 }
 0x8a7   : > { %3667 = vmatpush3.bf16.msra.mxu1 %v3082_v25 }
 0x8aa   : > { %3669 = vmatmul.mubr.msk.bf16.vlgmr.msra.gmra.mxu1 %vm2394_vm9, %v3089_v45  ;;  %v3451_v45 = vld [vmem:[%s5507_s22] ss:$0 sm:$0xff] }
 0x8ab   : > { %3672 = vmatprep.mubr.msk.bf16.mxu1 %vm2394_vm9, %v3090_v7 }
 0x8b2   : > { %3673 = vmatmul.mubr.msk.bf16.gmra.mxu1 %vm2394_vm9, %v3091_v31 }
 0x96a   : > { %v3670_v58 = vpop.f32.mrf.mxu1 }
 0x96b   : > { %v3154_v31 = vadd.f32 %v3670_v58, %v3451_v45 }
 0x96c   : > { %v3145_v14 = vpop.f32.mrf.mxu1 }
 0x96d   : > { %v3146_v7 = vadd.f32 %v3451_v45, %v3145_v14  ;;  %v3178_v2 = vadd.f32 %v3154_v31, %v5581_v6 }
 0x96e   : > { %v3671_v20 = vpop.f32.mrf.mxu1 }
 0x96f   : > { %v3157_v5 = vadd.f32 %v3671_v20, %v3451_v45  ;;  %v3176_v42 = vadd.f32 %v3146_v7, %v5579_v17 }
 0x970   : > { %v3148_v12 = vpop.f32.mrf.mxu1 }
 0x971   : > { %v3149_v3 = vadd.f32 %v3451_v45, %v3148_v12  ;;  %v3179_v1 = vadd.f32 %v3157_v5, %v4920_v18 }
 0x972   : > { %v3674_v36 = vpop.f32.mrf.mxu1 }
 0x973   : > { %v3177_v43 = vadd.f32 %v3149_v3, %v5580_v8  ;;  %v3185_v4 = vpack.c.bf16 %v3179_v1, %v3178_v2  ;;  %v3170_v29 = vadd.f32 %v3674_v36, %v3451_v45 }
 0x974   : > { %v3161_v44 = vpop.f32.mrf.mxu1 }
 0x975   : > { %v3184_v48 = vpack.c.bf16 %v3177_v43, %v3176_v42  ;;  %v3162_v30 = vadd.f32 %v3451_v45, %v3161_v44  ;;  %v3182_v46 = vadd.f32 %v3170_v29, %v5585_v63 }
 0x976   : > { %v3675_v21 = vpop.f32.mrf.mxu1 }
 0x977   : > { %v3173_v13 = vadd.f32 %v3675_v21, %v3451_v45  ;;  %3680 = vmatprep.mubr.msk.bf16.mxu0 %vm2272_vm8, %v3184_v48  ;;  %v3180_v49 = vadd.f32 %v3162_v30, %v5583_v51 }
 0x978   : > { %v3164_v0 = vpop.f32.mrf.mxu1  ;;  %3681 = vmatmul.mubr.msk.bf16.vlgmr.msra.gmra.mxu0 %vm2272_vm8, %v3185_v4 }
 0x979   : > { %v3165_v18 = vadd.f32 %v3451_v45, %v3164_v0  ;;  %v3183_v34 = vadd.f32 %v3173_v13, %v5582_v40 }
 0x97b   : > { %v3181_v50 = vadd.f32 %v3165_v18, %v5584_v57  ;;  %v3187_v24 = vpack.c.bf16 %v3183_v34, %v3182_v46 }
 0x97d   : > { %v3186_v32 = vpack.c.bf16 %v3181_v50, %v3180_v49 }
 0x97f   : > { %3684 = vmatprep.mubr.msk.bf16.mxu0 %vm2272_vm8, %v3186_v32 }
 0x980   : > { %3685 = vmatmul.mubr.msk.bf16.gmra.mxu0 %vm2272_vm8, %v3187_v24 }
 0xa38   : > { %v3682_v33 = vpop.f32.mrf.mxu0 }
 0xa39   : > { %v3265_v23 = vadd.f32 %v3682_v33, %v3456_v53 }
 0xa3a   : > { %v3256_v16 = vpop.f32.mrf.mxu0 }
 0xa3b   : > { %v3289_v9 = vmul.f32 0.5, %v3265_v23  ;;  %v3257_v39 = vadd.f32 %v3456_v53, %v3256_v16 }
 0xa3c   : > { %v3683_v41 = vpop.f32.mrf.mxu0 }
 0xa3d   : > { %3890 = vtanh.f32 %v3289_v9  ;;  %v3287_v56 = vmul.f32 0.5, %v3257_v39  ;;  %v3268_v26 = vadd.f32 %v3683_v41, %v3456_v53 }
 0xa3e   : > { %v3259_v10 = vpop.f32.mrf.mxu0 }
 0xa3f   : > { %3892 = vtanh.f32 %v3287_v56  ;;  %v3290_v60 = vmul.f32 0.5, %v3268_v26  ;;  %v3260_v11 = vadd.f32 %v3456_v53, %v3259_v10 }
 0xa40   : > { %v3686_v28 = vpop.f32.mrf.mxu0 }
 0xa41   : > { %3894 = vtanh.f32 %v3290_v60  ;;  %v3288_v54 = vmul.f32 0.5, %v3260_v11  ;;  %v3281_v59 = vadd.f32 %v3686_v28, %v3456_v53 }
 0xa42   : > { %v3272_v37 = vpop.f32.mrf.mxu0 }
 0xa43   : > { %3896 = vtanh.f32 %v3288_v54  ;;  %v3293_v52 = vmul.f32 0.5, %v3281_v59  ;;  %v3273_v47 = vadd.f32 %v3456_v53, %v3272_v37 }
 0xa44   : > { %v3687_v27 = vpop.f32.mrf.mxu0 }
 0xa45   : > { %3898 = vtanh.f32 %v3293_v52  ;;  %v3291_v55 = vmul.f32 0.5, %v3273_v47  ;;  %v3284_v15 = vadd.f32 %v3687_v27, %v3456_v53 }
 0xa46   : > { %v3275_v35 = vpop.f32.mrf.mxu0 }
 0xa47   : > { %3900 = vtanh.f32 %v3291_v55  ;;  %v3294_v61 = vmul.f32 0.5, %v3284_v15  ;;  %v3276_v38 = vadd.f32 %v3456_v53, %v3275_v35 }
 0xa49   : > { %3902 = vtanh.f32 %v3294_v61  ;;  %v3292_v25 = vmul.f32 0.5, %v3276_v38 }
 0xa4a   : > { %v3891_v19 = vpop.eup %3890 }
 0xa4b   : > { %3904 = vtanh.f32 %v3292_v25  ;;  %v3305_v22 = vmul.f32 0.5, %v3891_v19 }
 0xa4c   : > { %v3893_v62 = vpop.eup %3892 }
 0xa4d   : > { %v3303_v58 = vmul.f32 0.5, %v3893_v62  ;;  %v3313_v5 = vadd.f32 0.5, %v3305_v22 }
 0xa4e   : > { %v3895_v14 = vpop.eup %3894 }
 0xa4f   : > { %v3311_v45 = vadd.f32 0.5, %v3303_v58  ;;  %v3306_v20 = vmul.f32 0.5, %v3895_v14  ;;  %v3321_v42 = vmul.f32 %v3313_v5, %v3265_v23 }
 0xa50   : > { %v3897_v7 = vpop.eup %3896 }
 0xa51   : > { %v3304_v31 = vmul.f32 0.5, %v3897_v7  ;;  %v3319_v3 = vmul.f32 %v3311_v45, %v3257_v39  ;;  %v3314_v1 = vadd.f32 0.5, %v3306_v20  ;;  %v3331_v0 = vsel %vm3327_vm12, %v3321_v42, 0.0 }
 0xa52   : > { %v3899_v12 = vpop.eup %3898 }
 0xa53   : > { %v3312_v36 = vadd.f32 0.5, %v3304_v31  ;;  %v3309_v43 = vmul.f32 0.5, %v3899_v12  ;;  %v3328_v44 = vsel %vm3327_vm12, %v3319_v3, 0.0  ;;  %v3322_v48 = vmul.f32 %v3314_v1, %v3268_v26 }
 0xa54   : > { %v3901_v17 = vpop.eup %3900 }
 0xa55   : > { %v3320_v8 = vmul.f32 %v3312_v36, %v3260_v11  ;;  %v3307_v6 = vmul.f32 0.5, %v3901_v17  ;;  %v3317_v18 = vadd.f32 0.5, %v3309_v43  ;;  %v3333_v49 = vsel %vm3327_vm12, %v3322_v48, 0.0 }
 0xa56   : > { %v3903_v2 = vpop.eup %3902 }
 0xa57   : > { %v3329_v4 = vsel %vm3327_vm12, %v3320_v8, 0.0  ;;  %v3315_v21 = vadd.f32 0.5, %v3307_v6  ;;  %v3310_v30 = vmul.f32 0.5, %v3903_v2  ;;  %v3325_v46 = vmul.f32 %v3317_v18, %v3281_v59 }
 0xa58   : > { %v3905_v13 = vpop.eup %3904  ;;  %v3330_v29 = vadd.f32 %v3329_v4, %v3328_v44 }
 0xa59   : > { %v3323_v40 = vmul.f32 %v3315_v21, %v3273_v47  ;;  %v3308_v34 = vmul.f32 0.5, %v3905_v13  ;;  %v3318_v57 = vadd.f32 0.5, %v3310_v30  ;;  %v3339_v9 = vsel %vm3327_vm12, %v3325_v46, 0.0 }
 0xa5a   : > { %v3332_v51 = vadd.f32 %v3331_v0, %v3330_v29 }
 0xa5b   : > { %v3316_v50 = vadd.f32 0.5, %v3308_v34  ;;  %v3335_v32 = vsel %vm3327_vm12, %v3323_v40, 0.0  ;;  %v3326_v33 = vmul.f32 %v3318_v57, %v3284_v15 }
 0xa5c   : > { %v3334_v63 = vadd.f32 %v3333_v49, %v3332_v51 }
 0xa5d   : > { %v3324_v24 = vmul.f32 %v3316_v50, %v3276_v38  ;;  %v3341_v41 = vsel %vm3327_vm12, %v3326_v33, 0.0 }
 0xa5e   : > { %v3336_v53 = vadd.f32 %v3335_v32, %v3334_v63 }
 0xa5f   : > { %v3337_v23 = vsel %vm3327_vm12, %v3324_v24, 0.0 }
 0xa60   : > { %v3338_v16 = vadd.f32 %v3337_v23, %v3336_v53 }
 0xa62   : > { %v3340_v39 = vadd.f32 %v3339_v9, %v3338_v16 }
 0xa64   : > { %v3342_v56 = vadd.f32 %v3341_v41, %v3340_v39 }
 0xa66   : > { %v3344_v26 = vmul.f32 0.125, %v3342_v56 }
 0xa68   : > { %3345 = vst.msk [vmem:[%s757_s26] sm:$0xff] %vm3327_vm12, %v3344_v26 }
 0xa69   : > { %3919 = shalt.err (!%p3916_p3)
}
 0xa6a   : > { %s3920_s1 = scalar_lea.hbm %s3358_s3, 128  ;;  %s3924_s26 = scalar_lea.hbm %s5510_s25, 256 }
 0xa6b   : > { %p3921_p4 = scmp.ne.s32.totalorder %s3358_s3, %s3920_s1  ;;  %p3925_p9 = scmp.lt.s32.totalorder %s3358_s3, %s5510_s25 }
 0xa6c   : > { %p3926_p10 = scmp.lt.s32.totalorder %s3924_s26, %s3920_s1 }
 0xa6d   : > { %p3922_p7 = pnand %p3921_p4, %p4143_p5 }
 0xa6e   : > { %p3927_p11 = por %p3926_p10, %p3925_p9 }
 0xa6f   : > { %p3923_p8 = pneg %p3922_p7 }
 0xa71   : > { %p3928_p12 = pnand %p3927_p11, %p3923_p8 }
 0xa73   : > { %3931 = shalt.err (!%p3928_p12)
}
 0xa74   : > { %3691 = dma.vmem_to_hbm [thread:$0]  (%p4143_p5), %s3361_s5, 128, %s3358_s3, %s3347_s10  }
 0xa75 PF: > { %p3697_p13 = scmp.ge.s32.totalorder %s3966_s30, 2  ;;  %s3372_s12 = sand.u32 1, %s3954_s29  }
 0xa76   : > { %s3373_s13 = scalar_lea.sflag [#allocation5], %s3372_s12 }
 0xa77   : > { %p3694_p0 = pnand %p3697_p13, %p4147_p6 }
 0xa79   : > { %p3695_p1 = pneg %p3694_p0 }
 0xa7b   : > { %3949 = dma.done.wait (%p3695_p1), %s3373_s13, 128  }
 0xa7c   : > { %3951 = vsyncadd (%p3695_p1), %s3373_s13, 4294967168  ;;  %s5587_s30 = sld [smem:[#allocation8_spill]]  ;;  %s5590_s29 = smov %s3958_s2 }
 0xa7d   : > { %s5588_s7 = sld [smem:[#allocation7_spill]] }
 0xa7e   : > { %s5589_s6 = sld [smem:[#allocation9_spill]] }
 0xa82   : > { %p35_p2 = scmp.ge.s32.totalorder %s5587_s30, 4  }
 0xa83   : > { %s5591_s2 = smov %s5588_s7 }
 0xa84   :  { %37 = sbr.rel (!%p35_p2) target bundleno = 18 (0x12), region = 161 }
 0xa89   :  { %3378 = vsyncpa [#allocation5], 1 }
 0xa8a   :  { %3380 = vsyncpa [#allocation5 + $0x1], 1 }

</bundles_post_ra>
